<compile_context>
chip_gen: v6e
topology: v6e:2x2x1
jax: 0.10.0
libtpu: 0.0.40
codegen_flags: <defaults>
</compile_context>

<pallas_src>
import numpy as np

import jax
import jax.numpy as jnp
from jax.experimental import pallas as pl
from jax.experimental.pallas import tpu as pltpu


LOCAL_KERNEL_SIZE = 7          # module default (padding = 3)


# ------------------------- fused block (wrapper + kernel) -------------------------

def gcc_cvx_test_block_v3(x, p):
    """Forward pass of gcc_cvx_test_Block_v3. x: (N, dim, H, W) float."""
    N, C, H, W = x.shape
    assert C % 3 == 0, "dim must be divisible by 3"
    D3 = C // 3
    K = p['w1H'].shape[1]
    assert K == H and K == W, "instance_kernel_method=None requires meta_kernel_size == H == W"
    HW = H * W
    LK = LOCAL_KERNEL_SIZE
    P = LK // 2
    f32, bf16 = jnp.float32, jnp.bfloat16

    # pixel tile for the LN/MLP stage (single pass at small HW, bounded live set at large HW)
    CH = HW
    if HW > 2048:
        cands = [c for c in range(256, 2049) if HW % c == 0]
        if cands:
            CH = max(cands)

    # ---- static 0/1 masks (numpy, trace-time constants) ----
    rows = np.arange(HW) // W
    cols = np.arange(HW) % W
    wcol = np.stack([(cols < (W - k)) for k in range(K)], axis=0)                      # (K, HW)
    colm = np.stack([((cols + d >= 0) & (cols + d < W)) for d in range(-P, P + 1)], 0)  # (7, HW)
    rowm = np.stack([((rows + d >= 0) & (rows + d < H)) for d in range(-P, P + 1)], 0)  # (7, HW)
    masks = jnp.asarray(np.concatenate([wcol, colm, rowm], axis=0).astype(np.float32))

    # ---- lane-dense flattening + operand packing ----
    xf = x.astype(f32).reshape(N, C, HW)
    pe = jnp.concatenate([
        jnp.broadcast_to(p['pe1H'][:, :, None], (D3, H, W)).reshape(D3, HW),
        jnp.broadcast_to(p['pe2W'][:, None, :], (D3, H, W)).reshape(D3, HW)],
        axis=0).astype(f32)                                                            # (2*D3, HW)
    wg = jnp.concatenate([p['w1H'], p['w2W']], axis=0).astype(f32)                     # (2*D3, K)
    dww = p['dw_w'].reshape(D3, LK * LK).astype(f32)                                   # (D3, 49)
    vec = jnp.stack([p['dw_b'], p['b1H'], p['b2W'],
                     p['ln_l_w'], p['ln_l_b'],
                     p['ln_g_w'][:D3], p['ln_g_b'][:D3],
                     p['ln_g_w'][D3:], p['ln_g_b'][D3:]], axis=1).astype(f32)          # (D3, 9)
    b1 = jnp.concatenate([p['b1g'], p['b1l']]).reshape(4 * C, 1).astype(f32)           # (4*C, 1)
    cg = jnp.stack([p['b2'], p['gamma']], axis=1).astype(f32)                          # (C, 2)
    # fused block-diagonal pwconv1: rows [global(8*D3); local(4*D3)], cols [n1; n2; nl]
    W1f = jnp.zeros((4 * C, C), f32)
    W1f = W1f.at[:8 * D3, :2 * D3].set(p['W1g'])
    W1f = W1f.at[8 * D3:, 2 * D3:].set(p['W1l'])
    W1f = W1f.astype(bf16)                                                             # (4*C, C)
    W2f = p['W2'].astype(bf16)                                                         # (C, 4*C)

    def kernel(x_ref, m_ref, dww_ref, wg_ref, pe_ref, vec_ref, b1_ref, cg_ref,
               w1_ref, w2_ref, o_ref):
        x = x_ref[...]                               # (C, HW) f32
        x1 = x[:D3]                                  # global branch 1
        x2 = x[D3:2 * D3]                            # global branch 2
        xl = x[2 * D3:]                              # local branch

        m = m_ref[...]                               # (K + 2*LK, HW) 0/1 masks
        dww = dww_ref[...]                           # (D3, 49)
        wg = wg_ref[...]                             # (2*D3, K)
        pe = pe_ref[...]                             # (2*D3, HW)
        vec = vec_ref[...]                           # (D3, 9)
        b1 = b1_ref[...]                             # (4*C, 1)
        cg = cg_ref[...]                             # (C, 2)
        w1m = w1_ref[...]                            # (4*C, C) bf16
        w2m = w2_ref[...]                            # (C, 4*C) bf16

        def adv(v, s):
            # adv(v, s)[p] == v[(p + s) % HW]   (s: static python int)
            s = s % HW
            if s == 0:
                return v
            return pltpu.roll(v, HW - s, axis=1)     # np.roll semantics, XLU rotate

        # ---------- local branch: 7x7 depthwise conv, zero padding 3 ----------
        # dwmask(dh,dw) = rowmask(dh) * colmask(dw): the 7 column masks are folded into the
        # 7 precomputed dw-shifted copies, the row mask is applied once per dh after the dw-sum.
        xc = []
        for j in range(LK):
            dw = j - P
            v = adv(xl, dw)
            if dw != 0:
                v = v * m[K + j:K + j + 1]
            xc.append(v)
        acc_l = None
        for i in range(LK):
            dh = i - P
            s = None
            for j in range(LK):
                tap = i * LK + j
                term = dww[:, tap:tap + 1] * adv(xc[j], dh * W)
                s = term if s is None else s + term
            if dh != 0:
                s = s * m[K + LK + i:K + LK + i + 1]
            acc_l = s if acc_l is None else acc_l + s
        acc_l = acc_l + vec[:, 0:1]                  # dwconv bias

        # ---------- global branch 1: gcc_Conv2d type 'H' (circular conv along H) ----------
        t1 = x1 + pe[:D3]
        w1h = wg[:D3]
        g1 = w1h[:, 0:1] * t1
        for k in range(1, K):
            g1 = g1 + w1h[:, k:k + 1] * adv(t1, k * W)   # roll by k rows == circular H-shift
        g1 = g1 + vec[:, 1:2]

        # ---------- global branch 2: gcc_Conv2d type 'W' (circular conv along W) ----------
        t2 = x2 + pe[D3:]
        w2w = wg[D3:]
        g2 = w2w[:, 0:1] * t2
        for k in range(1, K):
            a = adv(t2, k)                           # valid where col <  W - k
            b = adv(t2, k - W)                       # valid where col >= W - k (wrapped part)
            g2 = g2 + w2w[:, k:k + 1] * jnp.where(m[k:k + 1] > 0.0, a, b)
        g2 = g2 + vec[:, 2:3]

        # ---------- pixel-tiled: LayerNorms -> fused pwconv1 -> GELU -> pwconv2 -> residual ----
        lnl_w, lnl_b = vec[:, 3:4], vec[:, 4:5]
        lg_w1, lg_b1 = vec[:, 5:6], vec[:, 6:7]
        lg_w2, lg_b2 = vec[:, 7:8], vec[:, 8:9]
        b2c, gamma = cg[:, 0:1], cg[:, 1:2]
        inv_d = 1.0 / D3
        inv_2d = 1.0 / (2 * D3)

        def csum(t):
            # channel (sublane) reduction; use a ones-row MXU dot when the group is large
            if t.shape[0] >= 32:
                ones = jnp.ones((1, t.shape[0]), jnp.float32)
                return jnp.dot(ones, t, preferred_element_type=jnp.float32)
            return jnp.sum(t, axis=0, keepdims=True)

        for c0 in range(0, HW, CH):
            al = acc_l[:, c0:c0 + CH]
            a1 = g1[:, c0:c0 + CH]
            a2 = g2[:, c0:c0 + CH]

            # norm_local (per-pixel LN over D3 channels)
            mean_l = csum(al) * inv_d
            dl = al - mean_l
            var_l = csum(dl * dl) * inv_d
            nl = lnl_w * (dl * jax.lax.rsqrt(var_l + 1e-6)) + lnl_b

            # norm_global (per-pixel LN over the 2*D3 global channels)
            mean_g = (csum(a1) + csum(a2)) * inv_2d
            d1 = a1 - mean_g
            d2 = a2 - mean_g
            var_g = (csum(d1 * d1) + csum(d2 * d2)) * inv_2d
            ig = jax.lax.rsqrt(var_g + 1e-6)
            n1 = lg_w1 * (d1 * ig) + lg_b1
            n2 = lg_w2 * (d2 * ig) + lg_b2

            # fused pwconv1 (block-diagonal, K = C) + GELU (tanh approx, EUP) + pwconv2
            rhs = jnp.concatenate([n1, n2, nl], axis=0).astype(bf16)          # (C, CH)
            h = jnp.dot(w1m, rhs, preferred_element_type=jnp.float32) + b1    # (4*C, CH)
            gh = jax.nn.gelu(h, approximate=True)
            y = jnp.dot(w2m, gh.astype(bf16), preferred_element_type=jnp.float32) + b2c
            o_ref[:, c0:c0 + CH] = x[:, c0:c0 + CH] + gamma * y

    consts = (masks, dww, wg, pe, vec, b1, cg, W1f, W2f)

    def cspec(a):
        r = a.ndim
        return pl.BlockSpec(a.shape, lambda n, r=r: (0,) * r)

    in_specs = [pl.BlockSpec((None, C, HW), lambda n: (n, 0, 0))] + [cspec(a) for a in consts]
    out_spec = pl.BlockSpec((None, C, HW), lambda n: (n, 0, 0))

    const_bytes = sum(int(np.prod(a.shape)) * a.dtype.itemsize for a in consts)
    block_bytes = C * HW * 4
    work_bytes = 8 * C * HW * 4 + 12 * C * CH * 4           # conv temps + MLP-chunk temps (rough)
    vmem_limit = int(min(max(4 * block_bytes + 2 * const_bytes + work_bytes,
                             32 * 2 ** 20), 48 * 2 ** 20))

    flops = N * (16 * C * C * HW + 2 * (LK * LK + 2 * K) * D3 * HW + 12 * C * HW)
    cost = pl.CostEstimate(flops=int(flops),
                           transcendentals=int(N * (4 * C * HW + 2 * HW)),
                           bytes_accessed=int(2 * N * C * HW * 4 + const_bytes))

    outf = pl.pallas_call(
        kernel,
        out_shape=jax.ShapeDtypeStruct((N, C, HW), f32),
        grid=(N,),
        in_specs=in_specs,
        out_specs=out_spec,
        input_output_aliases={0: 0},
        cost_estimate=cost,
        compiler_params=pltpu.CompilerParams(
            dimension_semantics=("parallel",),
            vmem_limit_bytes=vmem_limit),
    )(xf, *consts)
    return outf.reshape(N, C, H, W)


# ------------------------- pure-JAX reference (module semantics) -------------------------

def ref_forward(x, p):
    N, C, H, W = x.shape
    D3 = C // 3
    x1, x2, xl = x[:, :D3], x[:, D3:2 * D3], x[:, 2 * D3:]

    # local branch: 7x7 depthwise conv, padding=3
    xl = jax.lax.conv_general_dilated(
        xl, p['dw_w'], window_strides=(1, 1), padding=((3, 3), (3, 3)),
        dimension_numbers=('NCHW', 'OIHW', 'NCHW'),
        feature_group_count=D3) + p['dw_b'][None, :, None, None]

    def ln(t, w, b):                       # channels-last LayerNorm, eps=1e-6
        m = t.mean(-1, keepdims=True)
        v = ((t - m) ** 2).mean(-1, keepdims=True)
        return (t - m) / jnp.sqrt(v + 1e-6) * w + b

    tl = jnp.transpose(xl, (0, 2, 3, 1))
    tl = ln(tl, p['ln_l_w'], p['ln_l_b'])
    tl = tl @ p['W1l'].T + p['b1l']                               # (N,H,W,4*D3)

    def gcc(xc, w, b, pe, axis):           # exact global circular depthwise conv
        xc = xc + (pe[None, :, :, None] if axis == 2 else pe[None, :, None, :])
        out = jnp.zeros_like(xc)
        for k in range(w.shape[1]):
            out = out + w[None, :, k, None, None] * jnp.roll(xc, -k, axis=axis)
        return out + b[None, :, None, None]

    g = jnp.concatenate([gcc(x1, p['w1H'], p['b1H'], p['pe1H'], 2),
                         gcc(x2, p['w2W'], p['b2W'], p['pe2W'], 3)], axis=1)
    tg = jnp.transpose(g, (0, 2, 3, 1))
    tg = ln(tg, p['ln_g_w'], p['ln_g_b'])
    tg = tg @ p['W1g'].T + p['b1g']                               # (N,H,W,8*D3)

    t = jnp.concatenate([tg, tl], axis=-1)                        # global first, then local
    t = 0.5 * t * (1.0 + jax.lax.erf(t / jnp.sqrt(2.0)))          # exact GELU (nn.GELU default)
    t = t @ p['W2'].T + p['b2']
    t = p['gamma'] * t
    return x + jnp.transpose(t, (0, 3, 1, 2))


# ------------------------- synthetic parameter init -------------------------

def init_params(key, dim, K, lk=LOCAL_KERNEL_SIZE):
    D3 = dim // 3
    ks = jax.random.split(key, 18)

    def nrm(k, shape, s):
        return jax.random.normal(k, shape, jnp.float32) * s

    return dict(
        # 7x7 depthwise conv (dim//3 groups)
        dw_w=nrm(ks[0], (D3, 1, lk, lk), 0.08), dw_b=nrm(ks[1], (D3,), 0.1),
        # gcc_conv_1H / gcc_conv_2W: depthwise kernel (dim//3, K), bias, PE
        w1H=nrm(ks[2], (D3, K), 0.1), b1H=nrm(ks[3], (D3,), 0.1), pe1H=nrm(ks[4], (D3, K), 0.5),
        w2W=nrm(ks[5], (D3, K), 0.1), b2W=nrm(ks[6], (D3,), 0.1), pe2W=nrm(ks[7], (D3, K), 0.5),
        # LayerNorms
        ln_l_w=jnp.ones((D3,), jnp.float32) + nrm(ks[8], (D3,), 0.1),
        ln_l_b=nrm(ks[9], (D3,), 0.1),
        ln_g_w=jnp.ones((2 * D3,), jnp.float32) + nrm(ks[10], (2 * D3,), 0.1),
        ln_g_b=nrm(ks[11], (2 * D3,), 0.1),
        # pwconv1_local: Linear(dim//3, 4*dim//3); pwconv1_global: Linear(2*dim//3, 8*dim//3)
        W1l=nrm(ks[12], (4 * D3, D3), 0.4), b1l=nrm(ks[13], (4 * D3,), 0.1),
        W1g=nrm(ks[14], (8 * D3, 2 * D3), 0.3), b1g=nrm(ks[15], (8 * D3,), 0.1),
        # pwconv2: Linear(4*dim, dim)
        W2=nrm(ks[16], (dim, 4 * dim), 0.15), b2=nrm(ks[17], (dim,), 0.1),
        # layer scale (init value is a hyperparameter; 0.1 keeps the correctness check meaningful)
        gamma=jnp.full((dim,), 0.1, jnp.float32),
    )


if __name__ == "__main__":
    N, dim, H, W = 2, 12, 16, 16          # dim divisible by 3; meta_kernel_size == H == W
    meta_kernel_size = 16

    key = jax.random.PRNGKey(0)
    kx, kp = jax.random.split(key)
    x = jax.random.normal(kx, (N, dim, H, W), jnp.float32)
    params = init_params(kp, dim, meta_kernel_size)

    out = jax.jit(lambda xx: gcc_cvx_test_block_v3(xx, params))(x)
    out = jax.block_until_ready(out)

    ref = ref_forward(x, params)
    assert out.shape == (N, dim, H, W)
    max_err = float(jnp.max(jnp.abs(out - ref)))
    if max_err < 1e-2:
        print("KERNEL_OK")
    else:
        print(f"MISMATCH max_abs_err={max_err}")
</pallas_src>

<mosaic_0001>
module attributes {stable_mosaic.version = 11 : i64} {
  func.func @kernel(%arg0: i32, %arg1: memref<1x12x256xf32, #tpu.memory_space<vmem>>, %arg2: memref<30x256xf32, #tpu.memory_space<vmem>>, %arg3: memref<4x49xf32, #tpu.memory_space<vmem>>, %arg4: memref<8x16xf32, #tpu.memory_space<vmem>>, %arg5: memref<8x256xf32, #tpu.memory_space<vmem>>, %arg6: memref<4x9xf32, #tpu.memory_space<vmem>>, %arg7: memref<48x1xf32, #tpu.memory_space<vmem>>, %arg8: memref<12x2xf32, #tpu.memory_space<vmem>>, %arg9: memref<48x12xbf16, #tpu.memory_space<vmem>>, %arg10: memref<12x48xbf16, #tpu.memory_space<vmem>>, %arg11: memref<1x12x256xf32, #tpu.memory_space<vmem>>) attributes {dimension_semantics = [#tpu.dimension_semantics<parallel>], iteration_bounds = array<i64: 2>, scalar_prefetch = 0 : i64, scratch_operands = 0 : i64, tpu.core_type = #tpu.core_type<tc>, window_params = [{transform_indices = @transform_0, window_bounds = array<i64: 1, 12, 256>}, {pipeline_mode = #tpu.pipeline_mode<synchronous>, transform_indices = @transform_1, window_bounds = array<i64: 30, 256>}, {pipeline_mode = #tpu.pipeline_mode<synchronous>, transform_indices = @transform_2, window_bounds = array<i64: 4, 49>}, {pipeline_mode = #tpu.pipeline_mode<synchronous>, transform_indices = @transform_3, window_bounds = array<i64: 8, 16>}, {pipeline_mode = #tpu.pipeline_mode<synchronous>, transform_indices = @transform_4, window_bounds = array<i64: 8, 256>}, {pipeline_mode = #tpu.pipeline_mode<synchronous>, transform_indices = @transform_5, window_bounds = array<i64: 4, 9>}, {pipeline_mode = #tpu.pipeline_mode<synchronous>, transform_indices = @transform_6, window_bounds = array<i64: 48, 1>}, {pipeline_mode = #tpu.pipeline_mode<synchronous>, transform_indices = @transform_7, window_bounds = array<i64: 12, 2>}, {pipeline_mode = #tpu.pipeline_mode<synchronous>, transform_indices = @transform_8, window_bounds = array<i64: 48, 12>}, {pipeline_mode = #tpu.pipeline_mode<synchronous>, transform_indices = @transform_9, window_bounds = array<i64: 12, 48>}, {transform_indices = @transform_10, window_bounds = array<i64: 1, 12, 256>}]} {
    %c0 = arith.constant 0 : index
    %c0_0 = arith.constant 0 : index
    %c0_1 = arith.constant 0 : index
    %0 = vector.load %arg1[%c0, %c0_0, %c0_1] : memref<1x12x256xf32, #tpu.memory_space<vmem>>, vector<1x12x256xf32>
    %1 = vector.shape_cast %0 : vector<1x12x256xf32> to vector<12x256xf32>
    %2 = vector.extract_strided_slice %1 {offsets = [0, 0], sizes = [4, 256], strides = [1, 1]} : vector<12x256xf32> to vector<4x256xf32>
    %3 = vector.extract_strided_slice %1 {offsets = [4, 0], sizes = [4, 256], strides = [1, 1]} : vector<12x256xf32> to vector<4x256xf32>
    %4 = vector.extract_strided_slice %1 {offsets = [8, 0], sizes = [4, 256], strides = [1, 1]} : vector<12x256xf32> to vector<4x256xf32>
    %c0_2 = arith.constant 0 : index
    %c0_3 = arith.constant 0 : index
    %5 = vector.load %arg2[%c0_2, %c0_3] : memref<30x256xf32, #tpu.memory_space<vmem>>, vector<30x256xf32>
    %c0_4 = arith.constant 0 : index
    %c0_5 = arith.constant 0 : index
    %6 = vector.load %arg3[%c0_4, %c0_5] : memref<4x49xf32, #tpu.memory_space<vmem>>, vector<4x49xf32>
    %c0_6 = arith.constant 0 : index
    %c0_7 = arith.constant 0 : index
    %7 = vector.load %arg4[%c0_6, %c0_7] : memref<8x16xf32, #tpu.memory_space<vmem>>, vector<8x16xf32>
    %c0_8 = arith.constant 0 : index
    %c0_9 = arith.constant 0 : index
    %8 = vector.load %arg5[%c0_8, %c0_9] : memref<8x256xf32, #tpu.memory_space<vmem>>, vector<8x256xf32>
    %c0_10 = arith.constant 0 : index
    %c0_11 = arith.constant 0 : index
    %9 = vector.load %arg6[%c0_10, %c0_11] : memref<4x9xf32, #tpu.memory_space<vmem>>, vector<4x9xf32>
    %c0_12 = arith.constant 0 : index
    %c0_13 = arith.constant 0 : index
    %10 = vector.load %arg7[%c0_12, %c0_13] : memref<48x1xf32, #tpu.memory_space<vmem>>, vector<48x1xf32>
    %c0_14 = arith.constant 0 : index
    %c0_15 = arith.constant 0 : index
    %11 = vector.load %arg8[%c0_14, %c0_15] : memref<12x2xf32, #tpu.memory_space<vmem>>, vector<12x2xf32>
    %c0_16 = arith.constant 0 : index
    %c0_17 = arith.constant 0 : index
    %12 = vector.load %arg9[%c0_16, %c0_17] : memref<48x12xbf16, #tpu.memory_space<vmem>>, vector<48x12xbf16>
    %c0_18 = arith.constant 0 : index
    %c0_19 = arith.constant 0 : index
    %13 = vector.load %arg10[%c0_18, %c0_19] : memref<12x48xbf16, #tpu.memory_space<vmem>>, vector<12x48xbf16>
    %c3_i32 = arith.constant 3 : i32
    %14 = tpu.dynamic_rotate %4 by %c3_i32 dim 1 : vector<4x256xf32>, i32 -> vector<4x256xf32>
    %15 = vector.extract_strided_slice %5 {offsets = [16, 0], sizes = [1, 256], strides = [1, 1]} : vector<30x256xf32> to vector<1x256xf32>
    %16 = vector.broadcast %15 : vector<1x256xf32> to vector<4x256xf32>
    %17 = arith.mulf %14, %16 : vector<4x256xf32>
    %c2_i32 = arith.constant 2 : i32
    %18 = tpu.dynamic_rotate %4 by %c2_i32 dim 1 : vector<4x256xf32>, i32 -> vector<4x256xf32>
    %19 = vector.extract_strided_slice %5 {offsets = [17, 0], sizes = [1, 256], strides = [1, 1]} : vector<30x256xf32> to vector<1x256xf32>
    %20 = vector.broadcast %19 : vector<1x256xf32> to vector<4x256xf32>
    %21 = arith.mulf %18, %20 : vector<4x256xf32>
    %c1_i32 = arith.constant 1 : i32
    %22 = tpu.dynamic_rotate %4 by %c1_i32 dim 1 : vector<4x256xf32>, i32 -> vector<4x256xf32>
    %23 = vector.extract_strided_slice %5 {offsets = [18, 0], sizes = [1, 256], strides = [1, 1]} : vector<30x256xf32> to vector<1x256xf32>
    %24 = vector.broadcast %23 : vector<1x256xf32> to vector<4x256xf32>
    %25 = arith.mulf %22, %24 : vector<4x256xf32>
    %c255_i32 = arith.constant 255 : i32
    %26 = tpu.dynamic_rotate %4 by %c255_i32 dim 1 : vector<4x256xf32>, i32 -> vector<4x256xf32>
    %27 = vector.extract_strided_slice %5 {offsets = [20, 0], sizes = [1, 256], strides = [1, 1]} : vector<30x256xf32> to vector<1x256xf32>
    %28 = vector.broadcast %27 : vector<1x256xf32> to vector<4x256xf32>
    %29 = arith.mulf %26, %28 : vector<4x256xf32>
    %c254_i32 = arith.constant 254 : i32
    %30 = tpu.dynamic_rotate %4 by %c254_i32 dim 1 : vector<4x256xf32>, i32 -> vector<4x256xf32>
    %31 = vector.extract_strided_slice %5 {offsets = [21, 0], sizes = [1, 256], strides = [1, 1]} : vector<30x256xf32> to vector<1x256xf32>
    %32 = vector.broadcast %31 : vector<1x256xf32> to vector<4x256xf32>
    %33 = arith.mulf %30, %32 : vector<4x256xf32>
    %c253_i32 = arith.constant 253 : i32
    %34 = tpu.dynamic_rotate %4 by %c253_i32 dim 1 : vector<4x256xf32>, i32 -> vector<4x256xf32>
    %35 = vector.extract_strided_slice %5 {offsets = [22, 0], sizes = [1, 256], strides = [1, 1]} : vector<30x256xf32> to vector<1x256xf32>
    %36 = vector.broadcast %35 : vector<1x256xf32> to vector<4x256xf32>
    %37 = arith.mulf %34, %36 : vector<4x256xf32>
    %38 = vector.extract_strided_slice %6 {offsets = [0, 0], sizes = [4, 1], strides = [1, 1]} : vector<4x49xf32> to vector<4x1xf32>
    %c48_i32 = arith.constant 48 : i32
    %39 = tpu.dynamic_rotate %17 by %c48_i32 dim 1 : vector<4x256xf32>, i32 -> vector<4x256xf32>
    %40 = vector.broadcast %38 : vector<4x1xf32> to vector<4x256xf32>
    %41 = arith.mulf %40, %39 : vector<4x256xf32>
    %42 = vector.extract_strided_slice %6 {offsets = [0, 1], sizes = [4, 1], strides = [1, 1]} : vector<4x49xf32> to vector<4x1xf32>
    %c48_i32_20 = arith.constant 48 : i32
    %43 = tpu.dynamic_rotate %21 by %c48_i32_20 dim 1 : vector<4x256xf32>, i32 -> vector<4x256xf32>
    %44 = vector.broadcast %42 : vector<4x1xf32> to vector<4x256xf32>
    %45 = arith.mulf %44, %43 : vector<4x256xf32>
    %46 = arith.addf %41, %45 : vector<4x256xf32>
    %47 = vector.extract_strided_slice %6 {offsets = [0, 2], sizes = [4, 1], strides = [1, 1]} : vector<4x49xf32> to vector<4x1xf32>
    %c48_i32_21 = arith.constant 48 : i32
    %48 = tpu.dynamic_rotate %25 by %c48_i32_21 dim 1 : vector<4x256xf32>, i32 -> vector<4x256xf32>
    %49 = vector.broadcast %47 : vector<4x1xf32> to vector<4x256xf32>
    %50 = arith.mulf %49, %48 : vector<4x256xf32>
    %51 = arith.addf %46, %50 : vector<4x256xf32>
    %52 = vector.extract_strided_slice %6 {offsets = [0, 3], sizes = [4, 1], strides = [1, 1]} : vector<4x49xf32> to vector<4x1xf32>
    %c48_i32_22 = arith.constant 48 : i32
    %53 = tpu.dynamic_rotate %4 by %c48_i32_22 dim 1 : vector<4x256xf32>, i32 -> vector<4x256xf32>
    %54 = vector.broadcast %52 : vector<4x1xf32> to vector<4x256xf32>
    %55 = arith.mulf %54, %53 : vector<4x256xf32>
    %56 = arith.addf %51, %55 : vector<4x256xf32>
    %57 = vector.extract_strided_slice %6 {offsets = [0, 4], sizes = [4, 1], strides = [1, 1]} : vector<4x49xf32> to vector<4x1xf32>
    %c48_i32_23 = arith.constant 48 : i32
    %58 = tpu.dynamic_rotate %29 by %c48_i32_23 dim 1 : vector<4x256xf32>, i32 -> vector<4x256xf32>
    %59 = vector.broadcast %57 : vector<4x1xf32> to vector<4x256xf32>
    %60 = arith.mulf %59, %58 : vector<4x256xf32>
    %61 = arith.addf %56, %60 : vector<4x256xf32>
    %62 = vector.extract_strided_slice %6 {offsets = [0, 5], sizes = [4, 1], strides = [1, 1]} : vector<4x49xf32> to vector<4x1xf32>
    %c48_i32_24 = arith.constant 48 : i32
    %63 = tpu.dynamic_rotate %33 by %c48_i32_24 dim 1 : vector<4x256xf32>, i32 -> vector<4x256xf32>
    %64 = vector.broadcast %62 : vector<4x1xf32> to vector<4x256xf32>
    %65 = arith.mulf %64, %63 : vector<4x256xf32>
    %66 = arith.addf %61, %65 : vector<4x256xf32>
    %67 = vector.extract_strided_slice %6 {offsets = [0, 6], sizes = [4, 1], strides = [1, 1]} : vector<4x49xf32> to vector<4x1xf32>
    %c48_i32_25 = arith.constant 48 : i32
    %68 = tpu.dynamic_rotate %37 by %c48_i32_25 dim 1 : vector<4x256xf32>, i32 -> vector<4x256xf32>
    %69 = vector.broadcast %67 : vector<4x1xf32> to vector<4x256xf32>
    %70 = arith.mulf %69, %68 : vector<4x256xf32>
    %71 = arith.addf %66, %70 : vector<4x256xf32>
    %72 = vector.extract_strided_slice %5 {offsets = [23, 0], sizes = [1, 256], strides = [1, 1]} : vector<30x256xf32> to vector<1x256xf32>
    %73 = vector.broadcast %72 : vector<1x256xf32> to vector<4x256xf32>
    %74 = arith.mulf %71, %73 : vector<4x256xf32>
    %75 = vector.extract_strided_slice %6 {offsets = [0, 7], sizes = [4, 1], strides = [1, 1]} : vector<4x49xf32> to vector<4x1xf32>
    %c32_i32 = arith.constant 32 : i32
    %76 = tpu.dynamic_rotate %17 by %c32_i32 dim 1 : vector<4x256xf32>, i32 -> vector<4x256xf32>
    %77 = vector.broadcast %75 : vector<4x1xf32> to vector<4x256xf32>
    %78 = arith.mulf %77, %76 : vector<4x256xf32>
    %79 = vector.extract_strided_slice %6 {offsets = [0, 8], sizes = [4, 1], strides = [1, 1]} : vector<4x49xf32> to vector<4x1xf32>
    %c32_i32_26 = arith.constant 32 : i32
    %80 = tpu.dynamic_rotate %21 by %c32_i32_26 dim 1 : vector<4x256xf32>, i32 -> vector<4x256xf32>
    %81 = vector.broadcast %79 : vector<4x1xf32> to vector<4x256xf32>
    %82 = arith.mulf %81, %80 : vector<4x256xf32>
    %83 = arith.addf %78, %82 : vector<4x256xf32>
    %84 = vector.extract_strided_slice %6 {offsets = [0, 9], sizes = [4, 1], strides = [1, 1]} : vector<4x49xf32> to vector<4x1xf32>
    %c32_i32_27 = arith.constant 32 : i32
    %85 = tpu.dynamic_rotate %25 by %c32_i32_27 dim 1 : vector<4x256xf32>, i32 -> vector<4x256xf32>
    %86 = vector.broadcast %84 : vector<4x1xf32> to vector<4x256xf32>
    %87 = arith.mulf %86, %85 : vector<4x256xf32>
    %88 = arith.addf %83, %87 : vector<4x256xf32>
    %89 = vector.extract_strided_slice %6 {offsets = [0, 10], sizes = [4, 1], strides = [1, 1]} : vector<4x49xf32> to vector<4x1xf32>
    %c32_i32_28 = arith.constant 32 : i32
    %90 = tpu.dynamic_rotate %4 by %c32_i32_28 dim 1 : vector<4x256xf32>, i32 -> vector<4x256xf32>
    %91 = vector.broadcast %89 : vector<4x1xf32> to vector<4x256xf32>
    %92 = arith.mulf %91, %90 : vector<4x256xf32>
    %93 = arith.addf %88, %92 : vector<4x256xf32>
    %94 = vector.extract_strided_slice %6 {offsets = [0, 11], sizes = [4, 1], strides = [1, 1]} : vector<4x49xf32> to vector<4x1xf32>
    %c32_i32_29 = arith.constant 32 : i32
    %95 = tpu.dynamic_rotate %29 by %c32_i32_29 dim 1 : vector<4x256xf32>, i32 -> vector<4x256xf32>
    %96 = vector.broadcast %94 : vector<4x1xf32> to vector<4x256xf32>
    %97 = arith.mulf %96, %95 : vector<4x256xf32>
    %98 = arith.addf %93, %97 : vector<4x256xf32>
    %99 = vector.extract_strided_slice %6 {offsets = [0, 12], sizes = [4, 1], strides = [1, 1]} : vector<4x49xf32> to vector<4x1xf32>
    %c32_i32_30 = arith.constant 32 : i32
    %100 = tpu.dynamic_rotate %33 by %c32_i32_30 dim 1 : vector<4x256xf32>, i32 -> vector<4x256xf32>
    %101 = vector.broadcast %99 : vector<4x1xf32> to vector<4x256xf32>
    %102 = arith.mulf %101, %100 : vector<4x256xf32>
    %103 = arith.addf %98, %102 : vector<4x256xf32>
    %104 = vector.extract_strided_slice %6 {offsets = [0, 13], sizes = [4, 1], strides = [1, 1]} : vector<4x49xf32> to vector<4x1xf32>
    %c32_i32_31 = arith.constant 32 : i32
    %105 = tpu.dynamic_rotate %37 by %c32_i32_31 dim 1 : vector<4x256xf32>, i32 -> vector<4x256xf32>
    %106 = vector.broadcast %104 : vector<4x1xf32> to vector<4x256xf32>
    %107 = arith.mulf %106, %105 : vector<4x256xf32>
    %108 = arith.addf %103, %107 : vector<4x256xf32>
    %109 = vector.extract_strided_slice %5 {offsets = [24, 0], sizes = [1, 256], strides = [1, 1]} : vector<30x256xf32> to vector<1x256xf32>
    %110 = vector.broadcast %109 : vector<1x256xf32> to vector<4x256xf32>
    %111 = arith.mulf %108, %110 : vector<4x256xf32>
    %112 = arith.addf %74, %111 : vector<4x256xf32>
    %113 = vector.extract_strided_slice %6 {offsets = [0, 14], sizes = [4, 1], strides = [1, 1]} : vector<4x49xf32> to vector<4x1xf32>
    %c16_i32 = arith.constant 16 : i32
    %114 = tpu.dynamic_rotate %17 by %c16_i32 dim 1 : vector<4x256xf32>, i32 -> vector<4x256xf32>
    %115 = vector.broadcast %113 : vector<4x1xf32> to vector<4x256xf32>
    %116 = arith.mulf %115, %114 : vector<4x256xf32>
    %117 = vector.extract_strided_slice %6 {offsets = [0, 15], sizes = [4, 1], strides = [1, 1]} : vector<4x49xf32> to vector<4x1xf32>
    %c16_i32_32 = arith.constant 16 : i32
    %118 = tpu.dynamic_rotate %21 by %c16_i32_32 dim 1 : vector<4x256xf32>, i32 -> vector<4x256xf32>
    %119 = vector.broadcast %117 : vector<4x1xf32> to vector<4x256xf32>
    %120 = arith.mulf %119, %118 : vector<4x256xf32>
    %121 = arith.addf %116, %120 : vector<4x256xf32>
    %122 = vector.extract_strided_slice %6 {offsets = [0, 16], sizes = [4, 1], strides = [1, 1]} : vector<4x49xf32> to vector<4x1xf32>
    %c16_i32_33 = arith.constant 16 : i32
    %123 = tpu.dynamic_rotate %25 by %c16_i32_33 dim 1 : vector<4x256xf32>, i32 -> vector<4x256xf32>
    %124 = vector.broadcast %122 : vector<4x1xf32> to vector<4x256xf32>
    %125 = arith.mulf %124, %123 : vector<4x256xf32>
    %126 = arith.addf %121, %125 : vector<4x256xf32>
    %127 = vector.extract_strided_slice %6 {offsets = [0, 17], sizes = [4, 1], strides = [1, 1]} : vector<4x49xf32> to vector<4x1xf32>
    %c16_i32_34 = arith.constant 16 : i32
    %128 = tpu.dynamic_rotate %4 by %c16_i32_34 dim 1 : vector<4x256xf32>, i32 -> vector<4x256xf32>
    %129 = vector.broadcast %127 : vector<4x1xf32> to vector<4x256xf32>
    %130 = arith.mulf %129, %128 : vector<4x256xf32>
    %131 = arith.addf %126, %130 : vector<4x256xf32>
    %132 = vector.extract_strided_slice %6 {offsets = [0, 18], sizes = [4, 1], strides = [1, 1]} : vector<4x49xf32> to vector<4x1xf32>
    %c16_i32_35 = arith.constant 16 : i32
    %133 = tpu.dynamic_rotate %29 by %c16_i32_35 dim 1 : vector<4x256xf32>, i32 -> vector<4x256xf32>
    %134 = vector.broadcast %132 : vector<4x1xf32> to vector<4x256xf32>
    %135 = arith.mulf %134, %133 : vector<4x256xf32>
    %136 = arith.addf %131, %135 : vector<4x256xf32>
    %137 = vector.extract_strided_slice %6 {offsets = [0, 19], sizes = [4, 1], strides = [1, 1]} : vector<4x49xf32> to vector<4x1xf32>
    %c16_i32_36 = arith.constant 16 : i32
    %138 = tpu.dynamic_rotate %33 by %c16_i32_36 dim 1 : vector<4x256xf32>, i32 -> vector<4x256xf32>
    %139 = vector.broadcast %137 : vector<4x1xf32> to vector<4x256xf32>
    %140 = arith.mulf %139, %138 : vector<4x256xf32>
    %141 = arith.addf %136, %140 : vector<4x256xf32>
    %142 = vector.extract_strided_slice %6 {offsets = [0, 20], sizes = [4, 1], strides = [1, 1]} : vector<4x49xf32> to vector<4x1xf32>
    %c16_i32_37 = arith.constant 16 : i32
    %143 = tpu.dynamic_rotate %37 by %c16_i32_37 dim 1 : vector<4x256xf32>, i32 -> vector<4x256xf32>
    %144 = vector.broadcast %142 : vector<4x1xf32> to vector<4x256xf32>
    %145 = arith.mulf %144, %143 : vector<4x256xf32>
    %146 = arith.addf %141, %145 : vector<4x256xf32>
    %147 = vector.extract_strided_slice %5 {offsets = [25, 0], sizes = [1, 256], strides = [1, 1]} : vector<30x256xf32> to vector<1x256xf32>
    %148 = vector.broadcast %147 : vector<1x256xf32> to vector<4x256xf32>
    %149 = arith.mulf %146, %148 : vector<4x256xf32>
    %150 = arith.addf %112, %149 : vector<4x256xf32>
    %151 = vector.extract_strided_slice %6 {offsets = [0, 21], sizes = [4, 1], strides = [1, 1]} : vector<4x49xf32> to vector<4x1xf32>
    %152 = vector.broadcast %151 : vector<4x1xf32> to vector<4x256xf32>
    %153 = arith.mulf %152, %17 : vector<4x256xf32>
    %154 = vector.extract_strided_slice %6 {offsets = [0, 22], sizes = [4, 1], strides = [1, 1]} : vector<4x49xf32> to vector<4x1xf32>
    %155 = vector.broadcast %154 : vector<4x1xf32> to vector<4x256xf32>
    %156 = arith.mulf %155, %21 : vector<4x256xf32>
    %157 = arith.addf %153, %156 : vector<4x256xf32>
    %158 = vector.extract_strided_slice %6 {offsets = [0, 23], sizes = [4, 1], strides = [1, 1]} : vector<4x49xf32> to vector<4x1xf32>
    %159 = vector.broadcast %158 : vector<4x1xf32> to vector<4x256xf32>
    %160 = arith.mulf %159, %25 : vector<4x256xf32>
    %161 = arith.addf %157, %160 : vector<4x256xf32>
    %162 = vector.extract_strided_slice %6 {offsets = [0, 24], sizes = [4, 1], strides = [1, 1]} : vector<4x49xf32> to vector<4x1xf32>
    %163 = vector.broadcast %162 : vector<4x1xf32> to vector<4x256xf32>
    %164 = arith.mulf %163, %4 : vector<4x256xf32>
    %165 = arith.addf %161, %164 : vector<4x256xf32>
    %166 = vector.extract_strided_slice %6 {offsets = [0, 25], sizes = [4, 1], strides = [1, 1]} : vector<4x49xf32> to vector<4x1xf32>
    %167 = vector.broadcast %166 : vector<4x1xf32> to vector<4x256xf32>
    %168 = arith.mulf %167, %29 : vector<4x256xf32>
    %169 = arith.addf %165, %168 : vector<4x256xf32>
    %170 = vector.extract_strided_slice %6 {offsets = [0, 26], sizes = [4, 1], strides = [1, 1]} : vector<4x49xf32> to vector<4x1xf32>
    %171 = vector.broadcast %170 : vector<4x1xf32> to vector<4x256xf32>
    %172 = arith.mulf %171, %33 : vector<4x256xf32>
    %173 = arith.addf %169, %172 : vector<4x256xf32>
    %174 = vector.extract_strided_slice %6 {offsets = [0, 27], sizes = [4, 1], strides = [1, 1]} : vector<4x49xf32> to vector<4x1xf32>
    %175 = vector.broadcast %174 : vector<4x1xf32> to vector<4x256xf32>
    %176 = arith.mulf %175, %37 : vector<4x256xf32>
    %177 = arith.addf %173, %176 : vector<4x256xf32>
    %178 = arith.addf %150, %177 : vector<4x256xf32>
    %179 = vector.extract_strided_slice %6 {offsets = [0, 28], sizes = [4, 1], strides = [1, 1]} : vector<4x49xf32> to vector<4x1xf32>
    %c240_i32 = arith.constant 240 : i32
    %180 = tpu.dynamic_rotate %17 by %c240_i32 dim 1 : vector<4x256xf32>, i32 -> vector<4x256xf32>
    %181 = vector.broadcast %179 : vector<4x1xf32> to vector<4x256xf32>
    %182 = arith.mulf %181, %180 : vector<4x256xf32>
    %183 = vector.extract_strided_slice %6 {offsets = [0, 29], sizes = [4, 1], strides = [1, 1]} : vector<4x49xf32> to vector<4x1xf32>
    %c240_i32_38 = arith.constant 240 : i32
    %184 = tpu.dynamic_rotate %21 by %c240_i32_38 dim 1 : vector<4x256xf32>, i32 -> vector<4x256xf32>
    %185 = vector.broadcast %183 : vector<4x1xf32> to vector<4x256xf32>
    %186 = arith.mulf %185, %184 : vector<4x256xf32>
    %187 = arith.addf %182, %186 : vector<4x256xf32>
    %188 = vector.extract_strided_slice %6 {offsets = [0, 30], sizes = [4, 1], strides = [1, 1]} : vector<4x49xf32> to vector<4x1xf32>
    %c240_i32_39 = arith.constant 240 : i32
    %189 = tpu.dynamic_rotate %25 by %c240_i32_39 dim 1 : vector<4x256xf32>, i32 -> vector<4x256xf32>
    %190 = vector.broadcast %188 : vector<4x1xf32> to vector<4x256xf32>
    %191 = arith.mulf %190, %189 : vector<4x256xf32>
    %192 = arith.addf %187, %191 : vector<4x256xf32>
    %193 = vector.extract_strided_slice %6 {offsets = [0, 31], sizes = [4, 1], strides = [1, 1]} : vector<4x49xf32> to vector<4x1xf32>
    %c240_i32_40 = arith.constant 240 : i32
    %194 = tpu.dynamic_rotate %4 by %c240_i32_40 dim 1 : vector<4x256xf32>, i32 -> vector<4x256xf32>
    %195 = vector.broadcast %193 : vector<4x1xf32> to vector<4x256xf32>
    %196 = arith.mulf %195, %194 : vector<4x256xf32>
    %197 = arith.addf %192, %196 : vector<4x256xf32>
    %198 = vector.extract_strided_slice %6 {offsets = [0, 32], sizes = [4, 1], strides = [1, 1]} : vector<4x49xf32> to vector<4x1xf32>
    %c240_i32_41 = arith.constant 240 : i32
    %199 = tpu.dynamic_rotate %29 by %c240_i32_41 dim 1 : vector<4x256xf32>, i32 -> vector<4x256xf32>
    %200 = vector.broadcast %198 : vector<4x1xf32> to vector<4x256xf32>
    %201 = arith.mulf %200, %199 : vector<4x256xf32>
    %202 = arith.addf %197, %201 : vector<4x256xf32>
    %203 = vector.extract_strided_slice %6 {offsets = [0, 33], sizes = [4, 1], strides = [1, 1]} : vector<4x49xf32> to vector<4x1xf32>
    %c240_i32_42 = arith.constant 240 : i32
    %204 = tpu.dynamic_rotate %33 by %c240_i32_42 dim 1 : vector<4x256xf32>, i32 -> vector<4x256xf32>
    %205 = vector.broadcast %203 : vector<4x1xf32> to vector<4x256xf32>
    %206 = arith.mulf %205, %204 : vector<4x256xf32>
    %207 = arith.addf %202, %206 : vector<4x256xf32>
    %208 = vector.extract_strided_slice %6 {offsets = [0, 34], sizes = [4, 1], strides = [1, 1]} : vector<4x49xf32> to vector<4x1xf32>
    %c240_i32_43 = arith.constant 240 : i32
    %209 = tpu.dynamic_rotate %37 by %c240_i32_43 dim 1 : vector<4x256xf32>, i32 -> vector<4x256xf32>
    %210 = vector.broadcast %208 : vector<4x1xf32> to vector<4x256xf32>
    %211 = arith.mulf %210, %209 : vector<4x256xf32>
    %212 = arith.addf %207, %211 : vector<4x256xf32>
    %213 = vector.extract_strided_slice %5 {offsets = [27, 0], sizes = [1, 256], strides = [1, 1]} : vector<30x256xf32> to vector<1x256xf32>
    %214 = vector.broadcast %213 : vector<1x256xf32> to vector<4x256xf32>
    %215 = arith.mulf %212, %214 : vector<4x256xf32>
    %216 = arith.addf %178, %215 : vector<4x256xf32>
    %217 = vector.extract_strided_slice %6 {offsets = [0, 35], sizes = [4, 1], strides = [1, 1]} : vector<4x49xf32> to vector<4x1xf32>
    %c224_i32 = arith.constant 224 : i32
    %218 = tpu.dynamic_rotate %17 by %c224_i32 dim 1 : vector<4x256xf32>, i32 -> vector<4x256xf32>
    %219 = vector.broadcast %217 : vector<4x1xf32> to vector<4x256xf32>
    %220 = arith.mulf %219, %218 : vector<4x256xf32>
    %221 = vector.extract_strided_slice %6 {offsets = [0, 36], sizes = [4, 1], strides = [1, 1]} : vector<4x49xf32> to vector<4x1xf32>
    %c224_i32_44 = arith.constant 224 : i32
    %222 = tpu.dynamic_rotate %21 by %c224_i32_44 dim 1 : vector<4x256xf32>, i32 -> vector<4x256xf32>
    %223 = vector.broadcast %221 : vector<4x1xf32> to vector<4x256xf32>
    %224 = arith.mulf %223, %222 : vector<4x256xf32>
    %225 = arith.addf %220, %224 : vector<4x256xf32>
    %226 = vector.extract_strided_slice %6 {offsets = [0, 37], sizes = [4, 1], strides = [1, 1]} : vector<4x49xf32> to vector<4x1xf32>
    %c224_i32_45 = arith.constant 224 : i32
    %227 = tpu.dynamic_rotate %25 by %c224_i32_45 dim 1 : vector<4x256xf32>, i32 -> vector<4x256xf32>
    %228 = vector.broadcast %226 : vector<4x1xf32> to vector<4x256xf32>
    %229 = arith.mulf %228, %227 : vector<4x256xf32>
    %230 = arith.addf %225, %229 : vector<4x256xf32>
    %231 = vector.extract_strided_slice %6 {offsets = [0, 38], sizes = [4, 1], strides = [1, 1]} : vector<4x49xf32> to vector<4x1xf32>
    %c224_i32_46 = arith.constant 224 : i32
    %232 = tpu.dynamic_rotate %4 by %c224_i32_46 dim 1 : vector<4x256xf32>, i32 -> vector<4x256xf32>
    %233 = vector.broadcast %231 : vector<4x1xf32> to vector<4x256xf32>
    %234 = arith.mulf %233, %232 : vector<4x256xf32>
    %235 = arith.addf %230, %234 : vector<4x256xf32>
    %236 = vector.extract_strided_slice %6 {offsets = [0, 39], sizes = [4, 1], strides = [1, 1]} : vector<4x49xf32> to vector<4x1xf32>
    %c224_i32_47 = arith.constant 224 : i32
    %237 = tpu.dynamic_rotate %29 by %c224_i32_47 dim 1 : vector<4x256xf32>, i32 -> vector<4x256xf32>
    %238 = vector.broadcast %236 : vector<4x1xf32> to vector<4x256xf32>
    %239 = arith.mulf %238, %237 : vector<4x256xf32>
    %240 = arith.addf %235, %239 : vector<4x256xf32>
    %241 = vector.extract_strided_slice %6 {offsets = [0, 40], sizes = [4, 1], strides = [1, 1]} : vector<4x49xf32> to vector<4x1xf32>
    %c224_i32_48 = arith.constant 224 : i32
    %242 = tpu.dynamic_rotate %33 by %c224_i32_48 dim 1 : vector<4x256xf32>, i32 -> vector<4x256xf32>
    %243 = vector.broadcast %241 : vector<4x1xf32> to vector<4x256xf32>
    %244 = arith.mulf %243, %242 : vector<4x256xf32>
    %245 = arith.addf %240, %244 : vector<4x256xf32>
    %246 = vector.extract_strided_slice %6 {offsets = [0, 41], sizes = [4, 1], strides = [1, 1]} : vector<4x49xf32> to vector<4x1xf32>
    %c224_i32_49 = arith.constant 224 : i32
    %247 = tpu.dynamic_rotate %37 by %c224_i32_49 dim 1 : vector<4x256xf32>, i32 -> vector<4x256xf32>
    %248 = vector.broadcast %246 : vector<4x1xf32> to vector<4x256xf32>
    %249 = arith.mulf %248, %247 : vector<4x256xf32>
    %250 = arith.addf %245, %249 : vector<4x256xf32>
    %251 = vector.extract_strided_slice %5 {offsets = [28, 0], sizes = [1, 256], strides = [1, 1]} : vector<30x256xf32> to vector<1x256xf32>
    %252 = vector.broadcast %251 : vector<1x256xf32> to vector<4x256xf32>
    %253 = arith.mulf %250, %252 : vector<4x256xf32>
    %254 = arith.addf %216, %253 : vector<4x256xf32>
    %255 = vector.extract_strided_slice %6 {offsets = [0, 42], sizes = [4, 1], strides = [1, 1]} : vector<4x49xf32> to vector<4x1xf32>
    %c208_i32 = arith.constant 208 : i32
    %256 = tpu.dynamic_rotate %17 by %c208_i32 dim 1 : vector<4x256xf32>, i32 -> vector<4x256xf32>
    %257 = vector.broadcast %255 : vector<4x1xf32> to vector<4x256xf32>
    %258 = arith.mulf %257, %256 : vector<4x256xf32>
    %259 = vector.extract_strided_slice %6 {offsets = [0, 43], sizes = [4, 1], strides = [1, 1]} : vector<4x49xf32> to vector<4x1xf32>
    %c208_i32_50 = arith.constant 208 : i32
    %260 = tpu.dynamic_rotate %21 by %c208_i32_50 dim 1 : vector<4x256xf32>, i32 -> vector<4x256xf32>
    %261 = vector.broadcast %259 : vector<4x1xf32> to vector<4x256xf32>
    %262 = arith.mulf %261, %260 : vector<4x256xf32>
    %263 = arith.addf %258, %262 : vector<4x256xf32>
    %264 = vector.extract_strided_slice %6 {offsets = [0, 44], sizes = [4, 1], strides = [1, 1]} : vector<4x49xf32> to vector<4x1xf32>
    %c208_i32_51 = arith.constant 208 : i32
    %265 = tpu.dynamic_rotate %25 by %c208_i32_51 dim 1 : vector<4x256xf32>, i32 -> vector<4x256xf32>
    %266 = vector.broadcast %264 : vector<4x1xf32> to vector<4x256xf32>
    %267 = arith.mulf %266, %265 : vector<4x256xf32>
    %268 = arith.addf %263, %267 : vector<4x256xf32>
    %269 = vector.extract_strided_slice %6 {offsets = [0, 45], sizes = [4, 1], strides = [1, 1]} : vector<4x49xf32> to vector<4x1xf32>
    %c208_i32_52 = arith.constant 208 : i32
    %270 = tpu.dynamic_rotate %4 by %c208_i32_52 dim 1 : vector<4x256xf32>, i32 -> vector<4x256xf32>
    %271 = vector.broadcast %269 : vector<4x1xf32> to vector<4x256xf32>
    %272 = arith.mulf %271, %270 : vector<4x256xf32>
    %273 = arith.addf %268, %272 : vector<4x256xf32>
    %274 = vector.extract_strided_slice %6 {offsets = [0, 46], sizes = [4, 1], strides = [1, 1]} : vector<4x49xf32> to vector<4x1xf32>
    %c208_i32_53 = arith.constant 208 : i32
    %275 = tpu.dynamic_rotate %29 by %c208_i32_53 dim 1 : vector<4x256xf32>, i32 -> vector<4x256xf32>
    %276 = vector.broadcast %274 : vector<4x1xf32> to vector<4x256xf32>
    %277 = arith.mulf %276, %275 : vector<4x256xf32>
    %278 = arith.addf %273, %277 : vector<4x256xf32>
    %279 = vector.extract_strided_slice %6 {offsets = [0, 47], sizes = [4, 1], strides = [1, 1]} : vector<4x49xf32> to vector<4x1xf32>
    %c208_i32_54 = arith.constant 208 : i32
    %280 = tpu.dynamic_rotate %33 by %c208_i32_54 dim 1 : vector<4x256xf32>, i32 -> vector<4x256xf32>
    %281 = vector.broadcast %279 : vector<4x1xf32> to vector<4x256xf32>
    %282 = arith.mulf %281, %280 : vector<4x256xf32>
    %283 = arith.addf %278, %282 : vector<4x256xf32>
    %284 = vector.extract_strided_slice %6 {offsets = [0, 48], sizes = [4, 1], strides = [1, 1]} : vector<4x49xf32> to vector<4x1xf32>
    %c208_i32_55 = arith.constant 208 : i32
    %285 = tpu.dynamic_rotate %37 by %c208_i32_55 dim 1 : vector<4x256xf32>, i32 -> vector<4x256xf32>
    %286 = vector.broadcast %284 : vector<4x1xf32> to vector<4x256xf32>
    %287 = arith.mulf %286, %285 : vector<4x256xf32>
    %288 = arith.addf %283, %287 : vector<4x256xf32>
    %289 = vector.extract_strided_slice %5 {offsets = [29, 0], sizes = [1, 256], strides = [1, 1]} : vector<30x256xf32> to vector<1x256xf32>
    %290 = vector.broadcast %289 : vector<1x256xf32> to vector<4x256xf32>
    %291 = arith.mulf %288, %290 : vector<4x256xf32>
    %292 = arith.addf %254, %291 : vector<4x256xf32>
    %293 = vector.extract_strided_slice %9 {offsets = [0, 0], sizes = [4, 1], strides = [1, 1]} : vector<4x9xf32> to vector<4x1xf32>
    %294 = vector.broadcast %293 : vector<4x1xf32> to vector<4x256xf32>
    %295 = arith.addf %292, %294 : vector<4x256xf32>
    %296 = vector.extract_strided_slice %8 {offsets = [0, 0], sizes = [4, 256], strides = [1, 1]} : vector<8x256xf32> to vector<4x256xf32>
    %297 = arith.addf %2, %296 : vector<4x256xf32>
    %298 = vector.extract_strided_slice %7 {offsets = [0, 0], sizes = [4, 16], strides = [1, 1]} : vector<8x16xf32> to vector<4x16xf32>
    %299 = vector.extract_strided_slice %298 {offsets = [0, 0], sizes = [4, 1], strides = [1, 1]} : vector<4x16xf32> to vector<4x1xf32>
    %300 = vector.broadcast %299 : vector<4x1xf32> to vector<4x256xf32>
    %301 = arith.mulf %300, %297 : vector<4x256xf32>
    %302 = vector.extract_strided_slice %298 {offsets = [0, 1], sizes = [4, 1], strides = [1, 1]} : vector<4x16xf32> to vector<4x1xf32>
    %c240_i32_56 = arith.constant 240 : i32
    %303 = tpu.dynamic_rotate %297 by %c240_i32_56 dim 1 : vector<4x256xf32>, i32 -> vector<4x256xf32>
    %304 = vector.broadcast %302 : vector<4x1xf32> to vector<4x256xf32>
    %305 = arith.mulf %304, %303 : vector<4x256xf32>
    %306 = arith.addf %301, %305 : vector<4x256xf32>
    %307 = vector.extract_strided_slice %298 {offsets = [0, 2], sizes = [4, 1], strides = [1, 1]} : vector<4x16xf32> to vector<4x1xf32>
    %c224_i32_57 = arith.constant 224 : i32
    %308 = tpu.dynamic_rotate %297 by %c224_i32_57 dim 1 : vector<4x256xf32>, i32 -> vector<4x256xf32>
    %309 = vector.broadcast %307 : vector<4x1xf32> to vector<4x256xf32>
    %310 = arith.mulf %309, %308 : vector<4x256xf32>
    %311 = arith.addf %306, %310 : vector<4x256xf32>
    %312 = vector.extract_strided_slice %298 {offsets = [0, 3], sizes = [4, 1], strides = [1, 1]} : vector<4x16xf32> to vector<4x1xf32>
    %c208_i32_58 = arith.constant 208 : i32
    %313 = tpu.dynamic_rotate %297 by %c208_i32_58 dim 1 : vector<4x256xf32>, i32 -> vector<4x256xf32>
    %314 = vector.broadcast %312 : vector<4x1xf32> to vector<4x256xf32>
    %315 = arith.mulf %314, %313 : vector<4x256xf32>
    %316 = arith.addf %311, %315 : vector<4x256xf32>
    %317 = vector.extract_strided_slice %298 {offsets = [0, 4], sizes = [4, 1], strides = [1, 1]} : vector<4x16xf32> to vector<4x1xf32>
    %c192_i32 = arith.constant 192 : i32
    %318 = tpu.dynamic_rotate %297 by %c192_i32 dim 1 : vector<4x256xf32>, i32 -> vector<4x256xf32>
    %319 = vector.broadcast %317 : vector<4x1xf32> to vector<4x256xf32>
    %320 = arith.mulf %319, %318 : vector<4x256xf32>
    %321 = arith.addf %316, %320 : vector<4x256xf32>
    %322 = vector.extract_strided_slice %298 {offsets = [0, 5], sizes = [4, 1], strides = [1, 1]} : vector<4x16xf32> to vector<4x1xf32>
    %c176_i32 = arith.constant 176 : i32
    %323 = tpu.dynamic_rotate %297 by %c176_i32 dim 1 : vector<4x256xf32>, i32 -> vector<4x256xf32>
    %324 = vector.broadcast %322 : vector<4x1xf32> to vector<4x256xf32>
    %325 = arith.mulf %324, %323 : vector<4x256xf32>
    %326 = arith.addf %321, %325 : vector<4x256xf32>
    %327 = vector.extract_strided_slice %298 {offsets = [0, 6], sizes = [4, 1], strides = [1, 1]} : vector<4x16xf32> to vector<4x1xf32>
    %c160_i32 = arith.constant 160 : i32
    %328 = tpu.dynamic_rotate %297 by %c160_i32 dim 1 : vector<4x256xf32>, i32 -> vector<4x256xf32>
    %329 = vector.broadcast %327 : vector<4x1xf32> to vector<4x256xf32>
    %330 = arith.mulf %329, %328 : vector<4x256xf32>
    %331 = arith.addf %326, %330 : vector<4x256xf32>
    %332 = vector.extract_strided_slice %298 {offsets = [0, 7], sizes = [4, 1], strides = [1, 1]} : vector<4x16xf32> to vector<4x1xf32>
    %c144_i32 = arith.constant 144 : i32
    %333 = tpu.dynamic_rotate %297 by %c144_i32 dim 1 : vector<4x256xf32>, i32 -> vector<4x256xf32>
    %334 = vector.broadcast %332 : vector<4x1xf32> to vector<4x256xf32>
    %335 = arith.mulf %334, %333 : vector<4x256xf32>
    %336 = arith.addf %331, %335 : vector<4x256xf32>
    %337 = vector.extract_strided_slice %298 {offsets = [0, 8], sizes = [4, 1], strides = [1, 1]} : vector<4x16xf32> to vector<4x1xf32>
    %c128_i32 = arith.constant 128 : i32
    %338 = tpu.dynamic_rotate %297 by %c128_i32 dim 1 : vector<4x256xf32>, i32 -> vector<4x256xf32>
    %339 = vector.broadcast %337 : vector<4x1xf32> to vector<4x256xf32>
    %340 = arith.mulf %339, %338 : vector<4x256xf32>
    %341 = arith.addf %336, %340 : vector<4x256xf32>
    %342 = vector.extract_strided_slice %298 {offsets = [0, 9], sizes = [4, 1], strides = [1, 1]} : vector<4x16xf32> to vector<4x1xf32>
    %c112_i32 = arith.constant 112 : i32
    %343 = tpu.dynamic_rotate %297 by %c112_i32 dim 1 : vector<4x256xf32>, i32 -> vector<4x256xf32>
    %344 = vector.broadcast %342 : vector<4x1xf32> to vector<4x256xf32>
    %345 = arith.mulf %344, %343 : vector<4x256xf32>
    %346 = arith.addf %341, %345 : vector<4x256xf32>
    %347 = vector.extract_strided_slice %298 {offsets = [0, 10], sizes = [4, 1], strides = [1, 1]} : vector<4x16xf32> to vector<4x1xf32>
    %c96_i32 = arith.constant 96 : i32
    %348 = tpu.dynamic_rotate %297 by %c96_i32 dim 1 : vector<4x256xf32>, i32 -> vector<4x256xf32>
    %349 = vector.broadcast %347 : vector<4x1xf32> to vector<4x256xf32>
    %350 = arith.mulf %349, %348 : vector<4x256xf32>
    %351 = arith.addf %346, %350 : vector<4x256xf32>
    %352 = vector.extract_strided_slice %298 {offsets = [0, 11], sizes = [4, 1], strides = [1, 1]} : vector<4x16xf32> to vector<4x1xf32>
    %c80_i32 = arith.constant 80 : i32
    %353 = tpu.dynamic_rotate %297 by %c80_i32 dim 1 : vector<4x256xf32>, i32 -> vector<4x256xf32>
    %354 = vector.broadcast %352 : vector<4x1xf32> to vector<4x256xf32>
    %355 = arith.mulf %354, %353 : vector<4x256xf32>
    %356 = arith.addf %351, %355 : vector<4x256xf32>
    %357 = vector.extract_strided_slice %298 {offsets = [0, 12], sizes = [4, 1], strides = [1, 1]} : vector<4x16xf32> to vector<4x1xf32>
    %c64_i32 = arith.constant 64 : i32
    %358 = tpu.dynamic_rotate %297 by %c64_i32 dim 1 : vector<4x256xf32>, i32 -> vector<4x256xf32>
    %359 = vector.broadcast %357 : vector<4x1xf32> to vector<4x256xf32>
    %360 = arith.mulf %359, %358 : vector<4x256xf32>
    %361 = arith.addf %356, %360 : vector<4x256xf32>
    %362 = vector.extract_strided_slice %298 {offsets = [0, 13], sizes = [4, 1], strides = [1, 1]} : vector<4x16xf32> to vector<4x1xf32>
    %c48_i32_59 = arith.constant 48 : i32
    %363 = tpu.dynamic_rotate %297 by %c48_i32_59 dim 1 : vector<4x256xf32>, i32 -> vector<4x256xf32>
    %364 = vector.broadcast %362 : vector<4x1xf32> to vector<4x256xf32>
    %365 = arith.mulf %364, %363 : vector<4x256xf32>
    %366 = arith.addf %361, %365 : vector<4x256xf32>
    %367 = vector.extract_strided_slice %298 {offsets = [0, 14], sizes = [4, 1], strides = [1, 1]} : vector<4x16xf32> to vector<4x1xf32>
    %c32_i32_60 = arith.constant 32 : i32
    %368 = tpu.dynamic_rotate %297 by %c32_i32_60 dim 1 : vector<4x256xf32>, i32 -> vector<4x256xf32>
    %369 = vector.broadcast %367 : vector<4x1xf32> to vector<4x256xf32>
    %370 = arith.mulf %369, %368 : vector<4x256xf32>
    %371 = arith.addf %366, %370 : vector<4x256xf32>
    %372 = vector.extract_strided_slice %298 {offsets = [0, 15], sizes = [4, 1], strides = [1, 1]} : vector<4x16xf32> to vector<4x1xf32>
    %c16_i32_61 = arith.constant 16 : i32
    %373 = tpu.dynamic_rotate %297 by %c16_i32_61 dim 1 : vector<4x256xf32>, i32 -> vector<4x256xf32>
    %374 = vector.broadcast %372 : vector<4x1xf32> to vector<4x256xf32>
    %375 = arith.mulf %374, %373 : vector<4x256xf32>
    %376 = arith.addf %371, %375 : vector<4x256xf32>
    %377 = vector.extract_strided_slice %9 {offsets = [0, 1], sizes = [4, 1], strides = [1, 1]} : vector<4x9xf32> to vector<4x1xf32>
    %378 = vector.broadcast %377 : vector<4x1xf32> to vector<4x256xf32>
    %379 = arith.addf %376, %378 : vector<4x256xf32>
    %380 = vector.extract_strided_slice %8 {offsets = [4, 0], sizes = [4, 256], strides = [1, 1]} : vector<8x256xf32> to vector<4x256xf32>
    %381 = arith.addf %3, %380 : vector<4x256xf32>
    %382 = vector.extract_strided_slice %7 {offsets = [4, 0], sizes = [4, 16], strides = [1, 1]} : vector<8x16xf32> to vector<4x16xf32>
    %383 = vector.extract_strided_slice %382 {offsets = [0, 0], sizes = [4, 1], strides = [1, 1]} : vector<4x16xf32> to vector<4x1xf32>
    %384 = vector.broadcast %383 : vector<4x1xf32> to vector<4x256xf32>
    %385 = arith.mulf %384, %381 : vector<4x256xf32>
    %c255_i32_62 = arith.constant 255 : i32
    %386 = tpu.dynamic_rotate %381 by %c255_i32_62 dim 1 : vector<4x256xf32>, i32 -> vector<4x256xf32>
    %c15_i32 = arith.constant 15 : i32
    %387 = tpu.dynamic_rotate %381 by %c15_i32 dim 1 : vector<4x256xf32>, i32 -> vector<4x256xf32>
    %388 = vector.extract_strided_slice %382 {offsets = [0, 1], sizes = [4, 1], strides = [1, 1]} : vector<4x16xf32> to vector<4x1xf32>
    %389 = vector.extract_strided_slice %5 {offsets = [1, 0], sizes = [1, 256], strides = [1, 1]} : vector<30x256xf32> to vector<1x256xf32>
    %cst = arith.constant 0.000000e+00 : f32
    %390 = vector.broadcast %cst : f32 to vector<1x256xf32>
    %391 = arith.cmpf ogt, %389, %390 : vector<1x256xf32>
    %392 = vector.shape_cast %391 : vector<1x256xi1> to vector<1x256xi1>
    %393 = vector.broadcast %392 : vector<1x256xi1> to vector<4x256xi1>
    %394 = arith.select %393, %386, %387 : vector<4x256xi1>, vector<4x256xf32>
    %395 = vector.broadcast %388 : vector<4x1xf32> to vector<4x256xf32>
    %396 = arith.mulf %395, %394 : vector<4x256xf32>
    %397 = arith.addf %385, %396 : vector<4x256xf32>
    %c254_i32_63 = arith.constant 254 : i32
    %398 = tpu.dynamic_rotate %381 by %c254_i32_63 dim 1 : vector<4x256xf32>, i32 -> vector<4x256xf32>
    %c14_i32 = arith.constant 14 : i32
    %399 = tpu.dynamic_rotate %381 by %c14_i32 dim 1 : vector<4x256xf32>, i32 -> vector<4x256xf32>
    %400 = vector.extract_strided_slice %382 {offsets = [0, 2], sizes = [4, 1], strides = [1, 1]} : vector<4x16xf32> to vector<4x1xf32>
    %401 = vector.extract_strided_slice %5 {offsets = [2, 0], sizes = [1, 256], strides = [1, 1]} : vector<30x256xf32> to vector<1x256xf32>
    %cst_64 = arith.constant 0.000000e+00 : f32
    %402 = vector.broadcast %cst_64 : f32 to vector<1x256xf32>
    %403 = arith.cmpf ogt, %401, %402 : vector<1x256xf32>
    %404 = vector.shape_cast %403 : vector<1x256xi1> to vector<1x256xi1>
    %405 = vector.broadcast %404 : vector<1x256xi1> to vector<4x256xi1>
    %406 = arith.select %405, %398, %399 : vector<4x256xi1>, vector<4x256xf32>
    %407 = vector.broadcast %400 : vector<4x1xf32> to vector<4x256xf32>
    %408 = arith.mulf %407, %406 : vector<4x256xf32>
    %409 = arith.addf %397, %408 : vector<4x256xf32>
    %c253_i32_65 = arith.constant 253 : i32
    %410 = tpu.dynamic_rotate %381 by %c253_i32_65 dim 1 : vector<4x256xf32>, i32 -> vector<4x256xf32>
    %c13_i32 = arith.constant 13 : i32
    %411 = tpu.dynamic_rotate %381 by %c13_i32 dim 1 : vector<4x256xf32>, i32 -> vector<4x256xf32>
    %412 = vector.extract_strided_slice %382 {offsets = [0, 3], sizes = [4, 1], strides = [1, 1]} : vector<4x16xf32> to vector<4x1xf32>
    %413 = vector.extract_strided_slice %5 {offsets = [3, 0], sizes = [1, 256], strides = [1, 1]} : vector<30x256xf32> to vector<1x256xf32>
    %cst_66 = arith.constant 0.000000e+00 : f32
    %414 = vector.broadcast %cst_66 : f32 to vector<1x256xf32>
    %415 = arith.cmpf ogt, %413, %414 : vector<1x256xf32>
    %416 = vector.shape_cast %415 : vector<1x256xi1> to vector<1x256xi1>
    %417 = vector.broadcast %416 : vector<1x256xi1> to vector<4x256xi1>
    %418 = arith.select %417, %410, %411 : vector<4x256xi1>, vector<4x256xf32>
    %419 = vector.broadcast %412 : vector<4x1xf32> to vector<4x256xf32>
    %420 = arith.mulf %419, %418 : vector<4x256xf32>
    %421 = arith.addf %409, %420 : vector<4x256xf32>
    %c252_i32 = arith.constant 252 : i32
    %422 = tpu.dynamic_rotate %381 by %c252_i32 dim 1 : vector<4x256xf32>, i32 -> vector<4x256xf32>
    %c12_i32 = arith.constant 12 : i32
    %423 = tpu.dynamic_rotate %381 by %c12_i32 dim 1 : vector<4x256xf32>, i32 -> vector<4x256xf32>
    %424 = vector.extract_strided_slice %382 {offsets = [0, 4], sizes = [4, 1], strides = [1, 1]} : vector<4x16xf32> to vector<4x1xf32>
    %425 = vector.extract_strided_slice %5 {offsets = [4, 0], sizes = [1, 256], strides = [1, 1]} : vector<30x256xf32> to vector<1x256xf32>
    %cst_67 = arith.constant 0.000000e+00 : f32
    %426 = vector.broadcast %cst_67 : f32 to vector<1x256xf32>
    %427 = arith.cmpf ogt, %425, %426 : vector<1x256xf32>
    %428 = vector.shape_cast %427 : vector<1x256xi1> to vector<1x256xi1>
    %429 = vector.broadcast %428 : vector<1x256xi1> to vector<4x256xi1>
    %430 = arith.select %429, %422, %423 : vector<4x256xi1>, vector<4x256xf32>
    %431 = vector.broadcast %424 : vector<4x1xf32> to vector<4x256xf32>
    %432 = arith.mulf %431, %430 : vector<4x256xf32>
    %433 = arith.addf %421, %432 : vector<4x256xf32>
    %c251_i32 = arith.constant 251 : i32
    %434 = tpu.dynamic_rotate %381 by %c251_i32 dim 1 : vector<4x256xf32>, i32 -> vector<4x256xf32>
    %c11_i32 = arith.constant 11 : i32
    %435 = tpu.dynamic_rotate %381 by %c11_i32 dim 1 : vector<4x256xf32>, i32 -> vector<4x256xf32>
    %436 = vector.extract_strided_slice %382 {offsets = [0, 5], sizes = [4, 1], strides = [1, 1]} : vector<4x16xf32> to vector<4x1xf32>
    %437 = vector.extract_strided_slice %5 {offsets = [5, 0], sizes = [1, 256], strides = [1, 1]} : vector<30x256xf32> to vector<1x256xf32>
    %cst_68 = arith.constant 0.000000e+00 : f32
    %438 = vector.broadcast %cst_68 : f32 to vector<1x256xf32>
    %439 = arith.cmpf ogt, %437, %438 : vector<1x256xf32>
    %440 = vector.shape_cast %439 : vector<1x256xi1> to vector<1x256xi1>
    %441 = vector.broadcast %440 : vector<1x256xi1> to vector<4x256xi1>
    %442 = arith.select %441, %434, %435 : vector<4x256xi1>, vector<4x256xf32>
    %443 = vector.broadcast %436 : vector<4x1xf32> to vector<4x256xf32>
    %444 = arith.mulf %443, %442 : vector<4x256xf32>
    %445 = arith.addf %433, %444 : vector<4x256xf32>
    %c250_i32 = arith.constant 250 : i32
    %446 = tpu.dynamic_rotate %381 by %c250_i32 dim 1 : vector<4x256xf32>, i32 -> vector<4x256xf32>
    %c10_i32 = arith.constant 10 : i32
    %447 = tpu.dynamic_rotate %381 by %c10_i32 dim 1 : vector<4x256xf32>, i32 -> vector<4x256xf32>
    %448 = vector.extract_strided_slice %382 {offsets = [0, 6], sizes = [4, 1], strides = [1, 1]} : vector<4x16xf32> to vector<4x1xf32>
    %449 = vector.extract_strided_slice %5 {offsets = [6, 0], sizes = [1, 256], strides = [1, 1]} : vector<30x256xf32> to vector<1x256xf32>
    %cst_69 = arith.constant 0.000000e+00 : f32
    %450 = vector.broadcast %cst_69 : f32 to vector<1x256xf32>
    %451 = arith.cmpf ogt, %449, %450 : vector<1x256xf32>
    %452 = vector.shape_cast %451 : vector<1x256xi1> to vector<1x256xi1>
    %453 = vector.broadcast %452 : vector<1x256xi1> to vector<4x256xi1>
    %454 = arith.select %453, %446, %447 : vector<4x256xi1>, vector<4x256xf32>
    %455 = vector.broadcast %448 : vector<4x1xf32> to vector<4x256xf32>
    %456 = arith.mulf %455, %454 : vector<4x256xf32>
    %457 = arith.addf %445, %456 : vector<4x256xf32>
    %c249_i32 = arith.constant 249 : i32
    %458 = tpu.dynamic_rotate %381 by %c249_i32 dim 1 : vector<4x256xf32>, i32 -> vector<4x256xf32>
    %c9_i32 = arith.constant 9 : i32
    %459 = tpu.dynamic_rotate %381 by %c9_i32 dim 1 : vector<4x256xf32>, i32 -> vector<4x256xf32>
    %460 = vector.extract_strided_slice %382 {offsets = [0, 7], sizes = [4, 1], strides = [1, 1]} : vector<4x16xf32> to vector<4x1xf32>
    %461 = vector.extract_strided_slice %5 {offsets = [7, 0], sizes = [1, 256], strides = [1, 1]} : vector<30x256xf32> to vector<1x256xf32>
    %cst_70 = arith.constant 0.000000e+00 : f32
    %462 = vector.broadcast %cst_70 : f32 to vector<1x256xf32>
    %463 = arith.cmpf ogt, %461, %462 : vector<1x256xf32>
    %464 = vector.shape_cast %463 : vector<1x256xi1> to vector<1x256xi1>
    %465 = vector.broadcast %464 : vector<1x256xi1> to vector<4x256xi1>
    %466 = arith.select %465, %458, %459 : vector<4x256xi1>, vector<4x256xf32>
    %467 = vector.broadcast %460 : vector<4x1xf32> to vector<4x256xf32>
    %468 = arith.mulf %467, %466 : vector<4x256xf32>
    %469 = arith.addf %457, %468 : vector<4x256xf32>
    %c248_i32 = arith.constant 248 : i32
    %470 = tpu.dynamic_rotate %381 by %c248_i32 dim 1 : vector<4x256xf32>, i32 -> vector<4x256xf32>
    %c8_i32 = arith.constant 8 : i32
    %471 = tpu.dynamic_rotate %381 by %c8_i32 dim 1 : vector<4x256xf32>, i32 -> vector<4x256xf32>
    %472 = vector.extract_strided_slice %382 {offsets = [0, 8], sizes = [4, 1], strides = [1, 1]} : vector<4x16xf32> to vector<4x1xf32>
    %473 = vector.extract_strided_slice %5 {offsets = [8, 0], sizes = [1, 256], strides = [1, 1]} : vector<30x256xf32> to vector<1x256xf32>
    %cst_71 = arith.constant 0.000000e+00 : f32
    %474 = vector.broadcast %cst_71 : f32 to vector<1x256xf32>
    %475 = arith.cmpf ogt, %473, %474 : vector<1x256xf32>
    %476 = vector.shape_cast %475 : vector<1x256xi1> to vector<1x256xi1>
    %477 = vector.broadcast %476 : vector<1x256xi1> to vector<4x256xi1>
    %478 = arith.select %477, %470, %471 : vector<4x256xi1>, vector<4x256xf32>
    %479 = vector.broadcast %472 : vector<4x1xf32> to vector<4x256xf32>
    %480 = arith.mulf %479, %478 : vector<4x256xf32>
    %481 = arith.addf %469, %480 : vector<4x256xf32>
    %c247_i32 = arith.constant 247 : i32
    %482 = tpu.dynamic_rotate %381 by %c247_i32 dim 1 : vector<4x256xf32>, i32 -> vector<4x256xf32>
    %c7_i32 = arith.constant 7 : i32
    %483 = tpu.dynamic_rotate %381 by %c7_i32 dim 1 : vector<4x256xf32>, i32 -> vector<4x256xf32>
    %484 = vector.extract_strided_slice %382 {offsets = [0, 9], sizes = [4, 1], strides = [1, 1]} : vector<4x16xf32> to vector<4x1xf32>
    %485 = vector.extract_strided_slice %5 {offsets = [9, 0], sizes = [1, 256], strides = [1, 1]} : vector<30x256xf32> to vector<1x256xf32>
    %cst_72 = arith.constant 0.000000e+00 : f32
    %486 = vector.broadcast %cst_72 : f32 to vector<1x256xf32>
    %487 = arith.cmpf ogt, %485, %486 : vector<1x256xf32>
    %488 = vector.shape_cast %487 : vector<1x256xi1> to vector<1x256xi1>
    %489 = vector.broadcast %488 : vector<1x256xi1> to vector<4x256xi1>
    %490 = arith.select %489, %482, %483 : vector<4x256xi1>, vector<4x256xf32>
    %491 = vector.broadcast %484 : vector<4x1xf32> to vector<4x256xf32>
    %492 = arith.mulf %491, %490 : vector<4x256xf32>
    %493 = arith.addf %481, %492 : vector<4x256xf32>
    %c246_i32 = arith.constant 246 : i32
    %494 = tpu.dynamic_rotate %381 by %c246_i32 dim 1 : vector<4x256xf32>, i32 -> vector<4x256xf32>
    %c6_i32 = arith.constant 6 : i32
    %495 = tpu.dynamic_rotate %381 by %c6_i32 dim 1 : vector<4x256xf32>, i32 -> vector<4x256xf32>
    %496 = vector.extract_strided_slice %382 {offsets = [0, 10], sizes = [4, 1], strides = [1, 1]} : vector<4x16xf32> to vector<4x1xf32>
    %497 = vector.extract_strided_slice %5 {offsets = [10, 0], sizes = [1, 256], strides = [1, 1]} : vector<30x256xf32> to vector<1x256xf32>
    %cst_73 = arith.constant 0.000000e+00 : f32
    %498 = vector.broadcast %cst_73 : f32 to vector<1x256xf32>
    %499 = arith.cmpf ogt, %497, %498 : vector<1x256xf32>
    %500 = vector.shape_cast %499 : vector<1x256xi1> to vector<1x256xi1>
    %501 = vector.broadcast %500 : vector<1x256xi1> to vector<4x256xi1>
    %502 = arith.select %501, %494, %495 : vector<4x256xi1>, vector<4x256xf32>
    %503 = vector.broadcast %496 : vector<4x1xf32> to vector<4x256xf32>
    %504 = arith.mulf %503, %502 : vector<4x256xf32>
    %505 = arith.addf %493, %504 : vector<4x256xf32>
    %c245_i32 = arith.constant 245 : i32
    %506 = tpu.dynamic_rotate %381 by %c245_i32 dim 1 : vector<4x256xf32>, i32 -> vector<4x256xf32>
    %c5_i32 = arith.constant 5 : i32
    %507 = tpu.dynamic_rotate %381 by %c5_i32 dim 1 : vector<4x256xf32>, i32 -> vector<4x256xf32>
    %508 = vector.extract_strided_slice %382 {offsets = [0, 11], sizes = [4, 1], strides = [1, 1]} : vector<4x16xf32> to vector<4x1xf32>
    %509 = vector.extract_strided_slice %5 {offsets = [11, 0], sizes = [1, 256], strides = [1, 1]} : vector<30x256xf32> to vector<1x256xf32>
    %cst_74 = arith.constant 0.000000e+00 : f32
    %510 = vector.broadcast %cst_74 : f32 to vector<1x256xf32>
    %511 = arith.cmpf ogt, %509, %510 : vector<1x256xf32>
    %512 = vector.shape_cast %511 : vector<1x256xi1> to vector<1x256xi1>
    %513 = vector.broadcast %512 : vector<1x256xi1> to vector<4x256xi1>
    %514 = arith.select %513, %506, %507 : vector<4x256xi1>, vector<4x256xf32>
    %515 = vector.broadcast %508 : vector<4x1xf32> to vector<4x256xf32>
    %516 = arith.mulf %515, %514 : vector<4x256xf32>
    %517 = arith.addf %505, %516 : vector<4x256xf32>
    %c244_i32 = arith.constant 244 : i32
    %518 = tpu.dynamic_rotate %381 by %c244_i32 dim 1 : vector<4x256xf32>, i32 -> vector<4x256xf32>
    %c4_i32 = arith.constant 4 : i32
    %519 = tpu.dynamic_rotate %381 by %c4_i32 dim 1 : vector<4x256xf32>, i32 -> vector<4x256xf32>
    %520 = vector.extract_strided_slice %382 {offsets = [0, 12], sizes = [4, 1], strides = [1, 1]} : vector<4x16xf32> to vector<4x1xf32>
    %521 = vector.extract_strided_slice %5 {offsets = [12, 0], sizes = [1, 256], strides = [1, 1]} : vector<30x256xf32> to vector<1x256xf32>
    %cst_75 = arith.constant 0.000000e+00 : f32
    %522 = vector.broadcast %cst_75 : f32 to vector<1x256xf32>
    %523 = arith.cmpf ogt, %521, %522 : vector<1x256xf32>
    %524 = vector.shape_cast %523 : vector<1x256xi1> to vector<1x256xi1>
    %525 = vector.broadcast %524 : vector<1x256xi1> to vector<4x256xi1>
    %526 = arith.select %525, %518, %519 : vector<4x256xi1>, vector<4x256xf32>
    %527 = vector.broadcast %520 : vector<4x1xf32> to vector<4x256xf32>
    %528 = arith.mulf %527, %526 : vector<4x256xf32>
    %529 = arith.addf %517, %528 : vector<4x256xf32>
    %c243_i32 = arith.constant 243 : i32
    %530 = tpu.dynamic_rotate %381 by %c243_i32 dim 1 : vector<4x256xf32>, i32 -> vector<4x256xf32>
    %c3_i32_76 = arith.constant 3 : i32
    %531 = tpu.dynamic_rotate %381 by %c3_i32_76 dim 1 : vector<4x256xf32>, i32 -> vector<4x256xf32>
    %532 = vector.extract_strided_slice %382 {offsets = [0, 13], sizes = [4, 1], strides = [1, 1]} : vector<4x16xf32> to vector<4x1xf32>
    %533 = vector.extract_strided_slice %5 {offsets = [13, 0], sizes = [1, 256], strides = [1, 1]} : vector<30x256xf32> to vector<1x256xf32>
    %cst_77 = arith.constant 0.000000e+00 : f32
    %534 = vector.broadcast %cst_77 : f32 to vector<1x256xf32>
    %535 = arith.cmpf ogt, %533, %534 : vector<1x256xf32>
    %536 = vector.shape_cast %535 : vector<1x256xi1> to vector<1x256xi1>
    %537 = vector.broadcast %536 : vector<1x256xi1> to vector<4x256xi1>
    %538 = arith.select %537, %530, %531 : vector<4x256xi1>, vector<4x256xf32>
    %539 = vector.broadcast %532 : vector<4x1xf32> to vector<4x256xf32>
    %540 = arith.mulf %539, %538 : vector<4x256xf32>
    %541 = arith.addf %529, %540 : vector<4x256xf32>
    %c242_i32 = arith.constant 242 : i32
    %542 = tpu.dynamic_rotate %381 by %c242_i32 dim 1 : vector<4x256xf32>, i32 -> vector<4x256xf32>
    %c2_i32_78 = arith.constant 2 : i32
    %543 = tpu.dynamic_rotate %381 by %c2_i32_78 dim 1 : vector<4x256xf32>, i32 -> vector<4x256xf32>
    %544 = vector.extract_strided_slice %382 {offsets = [0, 14], sizes = [4, 1], strides = [1, 1]} : vector<4x16xf32> to vector<4x1xf32>
    %545 = vector.extract_strided_slice %5 {offsets = [14, 0], sizes = [1, 256], strides = [1, 1]} : vector<30x256xf32> to vector<1x256xf32>
    %cst_79 = arith.constant 0.000000e+00 : f32
    %546 = vector.broadcast %cst_79 : f32 to vector<1x256xf32>
    %547 = arith.cmpf ogt, %545, %546 : vector<1x256xf32>
    %548 = vector.shape_cast %547 : vector<1x256xi1> to vector<1x256xi1>
    %549 = vector.broadcast %548 : vector<1x256xi1> to vector<4x256xi1>
    %550 = arith.select %549, %542, %543 : vector<4x256xi1>, vector<4x256xf32>
    %551 = vector.broadcast %544 : vector<4x1xf32> to vector<4x256xf32>
    %552 = arith.mulf %551, %550 : vector<4x256xf32>
    %553 = arith.addf %541, %552 : vector<4x256xf32>
    %c241_i32 = arith.constant 241 : i32
    %554 = tpu.dynamic_rotate %381 by %c241_i32 dim 1 : vector<4x256xf32>, i32 -> vector<4x256xf32>
    %c1_i32_80 = arith.constant 1 : i32
    %555 = tpu.dynamic_rotate %381 by %c1_i32_80 dim 1 : vector<4x256xf32>, i32 -> vector<4x256xf32>
    %556 = vector.extract_strided_slice %382 {offsets = [0, 15], sizes = [4, 1], strides = [1, 1]} : vector<4x16xf32> to vector<4x1xf32>
    %557 = vector.extract_strided_slice %5 {offsets = [15, 0], sizes = [1, 256], strides = [1, 1]} : vector<30x256xf32> to vector<1x256xf32>
    %cst_81 = arith.constant 0.000000e+00 : f32
    %558 = vector.broadcast %cst_81 : f32 to vector<1x256xf32>
    %559 = arith.cmpf ogt, %557, %558 : vector<1x256xf32>
    %560 = vector.shape_cast %559 : vector<1x256xi1> to vector<1x256xi1>
    %561 = vector.broadcast %560 : vector<1x256xi1> to vector<4x256xi1>
    %562 = arith.select %561, %554, %555 : vector<4x256xi1>, vector<4x256xf32>
    %563 = vector.broadcast %556 : vector<4x1xf32> to vector<4x256xf32>
    %564 = arith.mulf %563, %562 : vector<4x256xf32>
    %565 = arith.addf %553, %564 : vector<4x256xf32>
    %566 = vector.extract_strided_slice %9 {offsets = [0, 2], sizes = [4, 1], strides = [1, 1]} : vector<4x9xf32> to vector<4x1xf32>
    %567 = vector.broadcast %566 : vector<4x1xf32> to vector<4x256xf32>
    %568 = arith.addf %565, %567 : vector<4x256xf32>
    %569 = vector.extract_strided_slice %9 {offsets = [0, 3], sizes = [4, 1], strides = [1, 1]} : vector<4x9xf32> to vector<4x1xf32>
    %570 = vector.extract_strided_slice %9 {offsets = [0, 4], sizes = [4, 1], strides = [1, 1]} : vector<4x9xf32> to vector<4x1xf32>
    %571 = vector.extract_strided_slice %9 {offsets = [0, 5], sizes = [4, 1], strides = [1, 1]} : vector<4x9xf32> to vector<4x1xf32>
    %572 = vector.extract_strided_slice %9 {offsets = [0, 6], sizes = [4, 1], strides = [1, 1]} : vector<4x9xf32> to vector<4x1xf32>
    %573 = vector.extract_strided_slice %9 {offsets = [0, 7], sizes = [4, 1], strides = [1, 1]} : vector<4x9xf32> to vector<4x1xf32>
    %574 = vector.extract_strided_slice %9 {offsets = [0, 8], sizes = [4, 1], strides = [1, 1]} : vector<4x9xf32> to vector<4x1xf32>
    %575 = vector.extract_strided_slice %11 {offsets = [0, 0], sizes = [12, 1], strides = [1, 1]} : vector<12x2xf32> to vector<12x1xf32>
    %576 = vector.extract_strided_slice %11 {offsets = [0, 1], sizes = [12, 1], strides = [1, 1]} : vector<12x2xf32> to vector<12x1xf32>
    %cst_82 = arith.constant dense<0.000000e+00> : vector<256xf32>
    %577 = vector.multi_reduction <add>, %295, %cst_82 [0] : vector<4x256xf32> to vector<256xf32>
    %578 = vector.shape_cast %577 : vector<256xf32> to vector<1x256xf32>
    %cst_83 = arith.constant 2.500000e-01 : f32
    %579 = vector.broadcast %cst_83 : f32 to vector<1x256xf32>
    %580 = arith.mulf %578, %579 : vector<1x256xf32>
    %581 = vector.broadcast %580 : vector<1x256xf32> to vector<4x256xf32>
    %582 = arith.subf %295, %581 : vector<4x256xf32>
    %583 = arith.mulf %582, %582 : vector<4x256xf32>
    %cst_84 = arith.constant dense<0.000000e+00> : vector<256xf32>
    %584 = vector.multi_reduction <add>, %583, %cst_84 [0] : vector<4x256xf32> to vector<256xf32>
    %585 = vector.shape_cast %584 : vector<256xf32> to vector<1x256xf32>
    %cst_85 = arith.constant 2.500000e-01 : f32
    %586 = vector.broadcast %cst_85 : f32 to vector<1x256xf32>
    %587 = arith.mulf %585, %586 : vector<1x256xf32>
    %cst_86 = arith.constant 9.99999997E-7 : f32
    %588 = vector.broadcast %cst_86 : f32 to vector<1x256xf32>
    %589 = arith.addf %587, %588 : vector<1x256xf32>
    %590 = math.rsqrt %589 : vector<1x256xf32>
    %591 = vector.broadcast %590 : vector<1x256xf32> to vector<4x256xf32>
    %592 = arith.mulf %582, %591 : vector<4x256xf32>
    %593 = vector.broadcast %569 : vector<4x1xf32> to vector<4x256xf32>
    %594 = arith.mulf %593, %592 : vector<4x256xf32>
    %595 = vector.broadcast %570 : vector<4x1xf32> to vector<4x256xf32>
    %596 = arith.addf %594, %595 : vector<4x256xf32>
    %cst_87 = arith.constant dense<0.000000e+00> : vector<256xf32>
    %597 = vector.multi_reduction <add>, %379, %cst_87 [0] : vector<4x256xf32> to vector<256xf32>
    %598 = vector.shape_cast %597 : vector<256xf32> to vector<1x256xf32>
    %cst_88 = arith.constant dense<0.000000e+00> : vector<256xf32>
    %599 = vector.multi_reduction <add>, %568, %cst_88 [0] : vector<4x256xf32> to vector<256xf32>
    %600 = vector.shape_cast %599 : vector<256xf32> to vector<1x256xf32>
    %601 = arith.addf %598, %600 : vector<1x256xf32>
    %cst_89 = arith.constant 1.250000e-01 : f32
    %602 = vector.broadcast %cst_89 : f32 to vector<1x256xf32>
    %603 = arith.mulf %601, %602 : vector<1x256xf32>
    %604 = vector.broadcast %603 : vector<1x256xf32> to vector<4x256xf32>
    %605 = arith.subf %379, %604 : vector<4x256xf32>
    %606 = vector.broadcast %603 : vector<1x256xf32> to vector<4x256xf32>
    %607 = arith.subf %568, %606 : vector<4x256xf32>
    %608 = arith.mulf %605, %605 : vector<4x256xf32>
    %cst_90 = arith.constant dense<0.000000e+00> : vector<256xf32>
    %609 = vector.multi_reduction <add>, %608, %cst_90 [0] : vector<4x256xf32> to vector<256xf32>
    %610 = vector.shape_cast %609 : vector<256xf32> to vector<1x256xf32>
    %611 = arith.mulf %607, %607 : vector<4x256xf32>
    %cst_91 = arith.constant dense<0.000000e+00> : vector<256xf32>
    %612 = vector.multi_reduction <add>, %611, %cst_91 [0] : vector<4x256xf32> to vector<256xf32>
    %613 = vector.shape_cast %612 : vector<256xf32> to vector<1x256xf32>
    %614 = arith.addf %610, %613 : vector<1x256xf32>
    %cst_92 = arith.constant 1.250000e-01 : f32
    %615 = vector.broadcast %cst_92 : f32 to vector<1x256xf32>
    %616 = arith.mulf %614, %615 : vector<1x256xf32>
    %cst_93 = arith.constant 9.99999997E-7 : f32
    %617 = vector.broadcast %cst_93 : f32 to vector<1x256xf32>
    %618 = arith.addf %616, %617 : vector<1x256xf32>
    %619 = math.rsqrt %618 : vector<1x256xf32>
    %620 = vector.broadcast %619 : vector<1x256xf32> to vector<4x256xf32>
    %621 = arith.mulf %605, %620 : vector<4x256xf32>
    %622 = vector.broadcast %571 : vector<4x1xf32> to vector<4x256xf32>
    %623 = arith.mulf %622, %621 : vector<4x256xf32>
    %624 = vector.broadcast %572 : vector<4x1xf32> to vector<4x256xf32>
    %625 = arith.addf %623, %624 : vector<4x256xf32>
    %626 = vector.broadcast %619 : vector<1x256xf32> to vector<4x256xf32>
    %627 = arith.mulf %607, %626 : vector<4x256xf32>
    %628 = vector.broadcast %573 : vector<4x1xf32> to vector<4x256xf32>
    %629 = arith.mulf %628, %627 : vector<4x256xf32>
    %630 = vector.broadcast %574 : vector<4x1xf32> to vector<4x256xf32>
    %631 = arith.addf %629, %630 : vector<4x256xf32>
    %632 = tpu.concatenate %625, %631, %596 in 0 : vector<4x256xf32>, vector<4x256xf32>, vector<4x256xf32> -> vector<12x256xf32>
    %633 = arith.truncf %632 : vector<12x256xf32> to vector<12x256xbf16>
    %cst_94 = arith.constant dense<0.000000e+00> : vector<48x256xf32>
    %634 = tpu.matmul %12, %633, %cst_94 {dimension_numbers = #tpu.dot_dimension_numbers<[1], [0], [0], [1], [0, 0, 1, 1], [], []>} : vector<48x12xbf16>, vector<12x256xbf16>, vector<48x256xf32> -> vector<48x256xf32>
    %635 = vector.broadcast %10 : vector<48x1xf32> to vector<48x256xf32>
    %636 = arith.addf %634, %635 : vector<48x256xf32>
    %637 = arith.mulf %636, %636 : vector<48x256xf32>
    %638 = arith.mulf %636, %637 : vector<48x256xf32>
    %cst_95 = arith.constant 4.471500e-02 : f32
    %639 = vector.broadcast %cst_95 : f32 to vector<48x256xf32>
    %640 = arith.mulf %639, %638 : vector<48x256xf32>
    %641 = arith.addf %636, %640 : vector<48x256xf32>
    %cst_96 = arith.constant 0.797884583 : f32
    %642 = vector.broadcast %cst_96 : f32 to vector<48x256xf32>
    %643 = arith.mulf %642, %641 : vector<48x256xf32>
    %644 = math.tanh %643 : vector<48x256xf32>
    %cst_97 = arith.constant 1.000000e+00 : f32
    %645 = vector.broadcast %cst_97 : f32 to vector<48x256xf32>
    %646 = arith.addf %645, %644 : vector<48x256xf32>
    %cst_98 = arith.constant 5.000000e-01 : f32
    %647 = vector.broadcast %cst_98 : f32 to vector<48x256xf32>
    %648 = arith.mulf %647, %646 : vector<48x256xf32>
    %649 = arith.mulf %636, %648 : vector<48x256xf32>
    %650 = arith.truncf %649 : vector<48x256xf32> to vector<48x256xbf16>
    %cst_99 = arith.constant dense<0.000000e+00> : vector<12x256xf32>
    %651 = tpu.matmul %13, %650, %cst_99 {dimension_numbers = #tpu.dot_dimension_numbers<[1], [0], [0], [1], [0, 0, 1, 1], [], []>} : vector<12x48xbf16>, vector<48x256xbf16>, vector<12x256xf32> -> vector<12x256xf32>
    %652 = vector.broadcast %575 : vector<12x1xf32> to vector<12x256xf32>
    %653 = arith.addf %651, %652 : vector<12x256xf32>
    %654 = vector.broadcast %576 : vector<12x1xf32> to vector<12x256xf32>
    %655 = arith.mulf %654, %653 : vector<12x256xf32>
    %656 = arith.addf %1, %655 : vector<12x256xf32>
    %c0_100 = arith.constant 0 : index
    %c0_101 = arith.constant 0 : index
    %c0_102 = arith.constant 0 : index
    %657 = vector.load %arg11[%c0_100, %c0_101, %c0_102] : memref<1x12x256xf32, #tpu.memory_space<vmem>>, vector<1x12x256xf32>
    %658 = vector.shape_cast %657 : vector<1x12x256xf32> to vector<12x256xf32>
    %659 = vector.shape_cast %656 : vector<12x256xf32> to vector<1x12x256xf32>
    tpu.vector_store %arg11[%c0_100, %c0_101, %c0_102], %659 {strides = array<i32>} : memref<1x12x256xf32, #tpu.memory_space<vmem>>, vector<1x12x256xf32>,
    return
  }
  func.func @transform_0(%arg0: i32) -> (i32, i32, i32) {
    %c0_i32 = arith.constant 0 : i32
    %c0_i32_0 = arith.constant 0 : i32
    %c0_i32_1 = arith.constant 0 : i32
    return %arg0, %c0_i32, %c0_i32_0 : i32, i32, i32
  }
  func.func @transform_1(%arg0: i32) -> (i32, i32) {
    %c0_i32 = arith.constant 0 : i32
    %c0_i32_0 = arith.constant 0 : i32
    %c0_i32_1 = arith.constant 0 : i32
    return %c0_i32, %c0_i32_0 : i32, i32
  }
  func.func @transform_2(%arg0: i32) -> (i32, i32) {
    %c0_i32 = arith.constant 0 : i32
    %c0_i32_0 = arith.constant 0 : i32
    %c0_i32_1 = arith.constant 0 : i32
    return %c0_i32, %c0_i32_0 : i32, i32
  }
  func.func @transform_3(%arg0: i32) -> (i32, i32) {
    %c0_i32 = arith.constant 0 : i32
    %c0_i32_0 = arith.constant 0 : i32
    %c0_i32_1 = arith.constant 0 : i32
    return %c0_i32, %c0_i32_0 : i32, i32
  }
  func.func @transform_4(%arg0: i32) -> (i32, i32) {
    %c0_i32 = arith.constant 0 : i32
    %c0_i32_0 = arith.constant 0 : i32
    %c0_i32_1 = arith.constant 0 : i32
    return %c0_i32, %c0_i32_0 : i32, i32
  }
  func.func @transform_5(%arg0: i32) -> (i32, i32) {
    %c0_i32 = arith.constant 0 : i32
    %c0_i32_0 = arith.constant 0 : i32
    %c0_i32_1 = arith.constant 0 : i32
    return %c0_i32, %c0_i32_0 : i32, i32
  }
  func.func @transform_6(%arg0: i32) -> (i32, i32) {
    %c0_i32 = arith.constant 0 : i32
    %c0_i32_0 = arith.constant 0 : i32
    %c0_i32_1 = arith.constant 0 : i32
    return %c0_i32, %c0_i32_0 : i32, i32
  }
  func.func @transform_7(%arg0: i32) -> (i32, i32) {
    %c0_i32 = arith.constant 0 : i32
    %c0_i32_0 = arith.constant 0 : i32
    %c0_i32_1 = arith.constant 0 : i32
    return %c0_i32, %c0_i32_0 : i32, i32
  }
  func.func @transform_8(%arg0: i32) -> (i32, i32) {
    %c0_i32 = arith.constant 0 : i32
    %c0_i32_0 = arith.constant 0 : i32
    %c0_i32_1 = arith.constant 0 : i32
    return %c0_i32, %c0_i32_0 : i32, i32
  }
  func.func @transform_9(%arg0: i32) -> (i32, i32) {
    %c0_i32 = arith.constant 0 : i32
    %c0_i32_0 = arith.constant 0 : i32
    %c0_i32_1 = arith.constant 0 : i32
    return %c0_i32, %c0_i32_0 : i32, i32
  }
  func.func @transform_10(%arg0: i32) -> (i32, i32, i32) {
    %c0_i32 = arith.constant 0 : i32
    %c0_i32_0 = arith.constant 0 : i32
    %c0_i32_1 = arith.constant 0 : i32
    return %arg0, %c0_i32, %c0_i32_0 : i32, i32, i32
  }
}

</mosaic_0001>

<bundles_post_ra>
// kernel: _lambda_.1
= control target key start
LH: loop header
LB: loop body
LE: loop exit
PB: predicated region body
PF: predicated region fallthrough
CT: control target
= control target key end

     0   :  { %s2891_s13 = smov 0   ;;  %s5183_s0 = inlined_call_operand.vmem [shape: f32[2,12,256], index: 0, kind: input, shape index: {}, may-alias: {0,10}]   ;;  %s5184_s1 = inlined_call_operand.vmem [shape: f32[30,256], index: 1, kind: input, shape index: {}]   ;;  %s5185_s2 = inlined_call_operand.vmem [shape: f32[4,49], index: 2, kind: input, shape index: {}]   ;;  %s5186_s3 = inlined_call_operand.vmem [shape: f32[8,16], index: 3, kind: input, shape index: {}]   ;;  %s5187_s4 = inlined_call_operand.vmem [shape: f32[8,256], index: 4, kind: input, shape index: {}]   ;;  %s5188_s5 = inlined_call_operand.vmem [shape: f32[4,9], index: 5, kind: input, shape index: {}]   ;;  %s5189_s6 = inlined_call_operand.vmem [shape: f32[48,1], index: 6, kind: input, shape index: {}]   ;;  %s5190_s7 = inlined_call_operand.vmem [shape: f32[12,2], index: 7, kind: input, shape index: {}]   ;;  %s5191_s8 = inlined_call_operand.vmem [shape: bf16[48,12], index: 8, kind: input, shape index: {}]   ;;  %s5192_s9 = inlined_call_operand.vmem [shape: bf16[12,48], index: 9, kind: input, shape index: {}]   ;;  %s5193_s10 = inlined_call_operand.vmem [shape: f32[2,12,256], index: 10, kind: output, shape index: {}, may-alias: {0,10}]  }
   0x1 LB: > { %s2510_s14 = sadd.s32 4294967295, %s2748_s13   ;;  %p2514_p0 = scmp.ge.s32.totalorder %s2748_s13, 1  ;;  %s2748_s13 = sphi %s2891_s13, %s20_s13  }
   0x2   : > { %p312_p1 = scmp.lt.s32.totalorder %s2748_s13, 3 }
   0x4   : > { %p313_p2 = pnand %p2514_p0, %p312_p1 }
   0x6   : > { %316 = sbr.rel (%p313_p2) target bundleno = 1246 (0x4de), region = 60 }
   0xb   : > { %p350_p3 = scmp.lt.s32.totalorder %s2510_s14, 1  ;;  %v5201_v0 = vmov 0   ;;  %s2751_s19 = smov 2   ;;  %v375_v3 = vld [vmem:[%s5187_s4] sm:$0xff]  ;;  %v376_v6 = vld [vmem:[%s5187_s4 + $0x8] sm:$0xff]  ;;  %v5198_v11 = vmov 1   ;;  %v398_v17 = vlaneseq }
   0xc   : > { %2628 = vset.pattern.permute.xlu1 %v5201_v0  ;;  %2626 = vset.pattern.permute.xlu0 %v5201_v0  ;;  %s2752_s20 = smov 3   ;;  %s2753_s21 = smov 1   ;;  %v2947_v4 = vld [vmem:[%s5186_s3] sm:$0xff]  ;;  %v5200_v14 = vmov 2   ;;  %v5195_v15 = vmov 7   ;;  %v5197_v16 = vmov 8  }
   0xd   : > { %s5678_s14 = smov (!%p350_p3, %s2510_s14), 1  ;;  %2228 = vmatprep.mubr.bf16.mxu0 %v5201_v0  ;;  %2424 = vmatprep.mubr.bf16.mxu1 %v5201_v0  ;;  %s2754_s22 = smov 127   ;;  %v2952_v5 = vld [vmem:[%s5185_s2] sm:$0xf]  ;;  %v3024_v18 = vshrl.u32 %v398_v17, 7  ;;  %v3027_v19 = vand.u32 127, %v398_v17 }
   0xe   : > { %s2530_s15 = sshll.u32 %s5678_s14, 5  ;;  %s2755_s23 = smov 126   ;;  %v3035_v21 = vld [vmem:[%s5184_s1 + $0x20] sm:$0xff]  ;;  %v3040_v22 = vld [vmem:[%s5184_s1 + $0x28] sm:$0xff]  ;;  %v2778_v46 = vmov 9   ;;  %v5203_v53 = vmov 14  }
   0xf   : > { %s2911_s18 = scalar_lea.vmem %s5183_s0, %s2530_s15  ;;  %s2756_s24 = smov 125   ;;  %v3030_v20 = vsub.s32 0, %v3024_v18  ;;  %v3044_v25 = vsub.s32 1, %v3024_v18  ;;  %vm5303_vm0 = vcmp.lt.s32.totalorder %v3027_v19, 3  ;;  %vm5300_vm1 = vcmp.lt.s32.totalorder %v3027_v19, 2  ;;  %v365_v51 = vld [vmem:[%s5184_s1] sm:$0xff] }
  0x10   : > { %v2914_v1 = vld [vmem:[%s2911_s18 + $0x10] sm:$0xf]  ;;  %v2921_v2 = vld [vmem:[%s2911_s18 + $0x18] sm:$0xf]  ;;  %v361_v7 = vld [vmem:[%s2911_s18] sm:$0xff]  ;;  %s2760_s16 = smov 15  }
  0x11   : > { %413 = vrot.lane.b32.xlu1 %v2914_v1, %s2751_s19  ;;  %394 = vrot.lane.b32.xlu0 %v2914_v1, %s2752_s20  ;;  %v2959_v8 = vld [vmem:[%s2911_s18 + $0x8] sm:$0xff]  ;;  %v2963_v9 = vadd.f32 %v375_v3, %v361_v7  ;;  %s2761_s17 = smov 14   ;;  %s2763_s25 = smov 112   ;;  %5356 = vst [vmem:[#allocation5_spill] sm:$0xff] %v3030_v20  ;;  %5357 = vst [vmem:[#allocation6_spill] sm:$0xff] %v3044_v25  ;;  %v406_v26 = vrot.slane %v3035_v21, %v3030_v20  ;;  %vm1411_vm2 = vcmp.gt.f32.partialorder %v365_v51, 0.0 }
  0x12   : > { %5353 = vst [vmem:[#allocation2_spill] sm:$0xff] %v2959_v8  ;;  %v2966_v10 = vadd.f32 %v376_v6, %v2959_v8  ;;  %s2765_s26 = smov 96   ;;  %s2766_s27 = smov 11   ;;  %v410_v27 = vrot.slane %v3040_v22, %v3030_v20  ;;  %v423_v32 = vrot.slane %v3035_v21, %v3044_v25  ;;  %v427_v36 = vrot.slane %v3040_v22, %v3044_v25  ;;  %v366_v52 = vld [vmem:[%s5184_s1 + $0x8] sm:$0xff] }
  0x13   : > { %5354 = vst [vmem:[#allocation3_spill] sm:$0xff] %v2963_v9  ;;  %v2971_v12 = vrot.slane %v2963_v9, 4  ;;  %s2767_s28 = smov 124   ;;  %s2768_s29 = smov 80   ;;  %vm1412_vm3 = vcmp.gt.f32.partialorder %v366_v52, 0.0  ;;  %v3133_v56 = vsel %vm1411_vm2, 1, %v5201_v0 }
  0x14   : > { %5355 = vst [vmem:[#allocation4_spill] sm:$0xff] %v2966_v10  ;;  %v2974_v13 = vrot.slane %v2966_v10, 4  ;;  %s2770_s30 = smov 64   ;;  %s2771_s11 = smov 123   ;;  %v3136_v57 = vsel %vm1412_vm3, 1, %v5201_v0  ;;  %v1418_v60 = vrot.slane %v3133_v56, %v3044_v25  ;;  %vm1408_vm4 = vcmp.lt.s32.totalorder %v3027_v19, 15 }
  0x15   : > { %415 = vrot.lane.b32.xlu1 %v2921_v2, %s2751_s19  ;;  %396 = vrot.lane.b32.xlu0 %v2921_v2, %s2752_s20  ;;  %s2773_s12 = smov 122   ;;  %v1422_v61 = vrot.slane %v3136_v57, %v3044_v25  ;;  %vm451_vm7 = vcmp.lt.s32.totalorder %v3027_v19, 127  ;;  %vm1447_vm8 = vcmp.lt.s32.totalorder %v3027_v19, 14  ;;  %vm468_vm11 = vcmp.lt.s32.totalorder %v3027_v19, 126 }
  0x16   : > { %vm3147_vm5 = vcmp.eq.s32.totalorder %v1418_v60, 1  ;;  %vm5299_vm12 = vcmp.lt.s32.totalorder %v3027_v19, 1  ;;  %vm1482_vm13 = vcmp.lt.s32.totalorder %v3027_v19, 13  ;;  %vm485_vm2 = vcmp.lt.s32.totalorder %v3027_v19, 125 }
  0x17   : > { %vm3151_vm6 = vcmp.eq.s32.totalorder %v1422_v61, 1  ;;  %vm1511_vm3 = vcmp.lt.s32.totalorder %v3027_v19, 124 }
  0x19   : > { %432 = vrot.lane.b32.xlu1 %v2921_v2, %s2753_s21  ;;  %430 = vrot.lane.b32.xlu0 %v2914_v1, %s2753_s21 }
  0x1d   : > { %449 = vrot.lane.b32.xlu1 %v2921_v2, %s2754_s22  ;;  %447 = vrot.lane.b32.xlu0 %v2914_v1, %s2754_s22 }
  0x21   : > { %466 = vrot.lane.b32.xlu1 %v2921_v2, %s2755_s23  ;;  %464 = vrot.lane.b32.xlu0 %v2914_v1, %s2755_s23 }
  0x25   : > { %483 = vrot.lane.b32.xlu1 %v2921_v2, %s2756_s24  ;;  %481 = vrot.lane.b32.xlu0 %v2914_v1, %s2756_s24 }
  0x29   : > { %1218 = vperm.xlu1 %2628, %v2947_v4   ;;  %507 = vperm.xlu0 %2626, %v2952_v5  }
  0x2d   : > { %2629 = vset.pattern.permute.xlu1 %v5198_v11  ;;  %2627 = vset.pattern.permute.xlu0 %v5198_v11 }
  0x2e   : > { %1230 = vperm.xlu1 %2629, %v2947_v4   ;;  %519 = vperm.xlu0 %2627, %v2952_v5  }
  0x32   : > { %1398 = vrot.lane.b32.xlu0 %v2971_v12, %s2754_s22  ;;  %1400 = vrot.lane.b32.xlu1 %v2974_v13, %s2754_s22  ;;  %s2762_s22 = smov 13  }
  0x33   : > { %2630 = vset.pattern.permute.xlu0 %v5200_v14  ;;  %2634 = vset.pattern.permute.xlu1 %v5195_v15 }
  0x36   : > { %1404 = vrot.lane.b32.xlu0 %v2971_v12, %s2760_s16  ;;  %1406 = vrot.lane.b32.xlu1 %v2974_v13, %s2760_s16  ;;  %s2787_s16 = smov 6  }
  0x3a   : > { %1244 = vperm.xlu0 %2630, %v2947_v4   ;;  %1437 = vrot.lane.b32.xlu1 %v2971_v12, %s2755_s23 }
  0x3e   : > { %1439 = vrot.lane.b32.xlu1 %v2974_v13, %s2755_s23  ;;  %1443 = vrot.lane.b32.xlu0 %v2971_v12, %s2761_s17  ;;  %s2764_s23 = smov 12  }
  0x3f   : > { %2631 = vset.pattern.permute.xlu0 %v5195_v15 }
  0x42   : > { %1445 = vrot.lane.b32.xlu1 %v2974_v13, %s2761_s17  ;;  %1478 = vrot.lane.b32.xlu0 %v2971_v12, %s2762_s22  ;;  %s2791_s17 = smov 117  }
  0x46   : > { %1472 = vrot.lane.b32.xlu1 %v2971_v12, %s2756_s24  ;;  %1223 = vrot.lane.b32.xlu0 %v2963_v9, %s2763_s25 }
  0x4a   : > { %1474 = vrot.lane.b32.xlu1 %v2974_v13, %s2756_s24  ;;  %1514 = vrot.lane.b32.xlu0 %v2971_v12, %s2764_s23  ;;  %s2769_s24 = smov 10  }
  0x4e   : > { %1480 = vrot.lane.b32.xlu1 %v2974_v13, %s2762_s22  ;;  %1237 = vrot.lane.b32.xlu0 %v2963_v9, %s2765_s26  ;;  %s2793_s22 = smov 5  }
  0x52   : > { %1225 = vrot.lane.b32.xlu1 %v2966_v10, %s2763_s25  ;;  %1550 = vrot.lane.b32.xlu0 %v2971_v12, %s2766_s27 }
  0x56   : > { %1507 = vrot.lane.b32.xlu1 %v2971_v12, %s2767_s28  ;;  %1251 = vrot.lane.b32.xlu0 %v2963_v9, %s2768_s29 }
  0x5a   : > { %1509 = vrot.lane.b32.xlu1 %v2974_v13, %s2767_s28  ;;  %1586 = vrot.lane.b32.xlu0 %v2971_v12, %s2769_s24  ;;  %s2775_s28 = smov 9  }
  0x5e   : > { %1516 = vrot.lane.b32.xlu1 %v2974_v13, %s2764_s23  ;;  %1265 = vrot.lane.b32.xlu0 %v2963_v9, %s2770_s30  ;;  %s2780_s23 = smov 120  }
  0x62   : > { %1239 = vrot.lane.b32.xlu1 %v2966_v10, %s2765_s26  ;;  %1315 = vperm.xlu0 %2631, %v2947_v4  }
  0x66   : > { %1543 = vrot.lane.b32.xlu1 %v2971_v12, %s2771_s11  ;;  %2632 = vset.pattern.permute.xlu0 %v5197_v16 }
  0x6a   : > { %1545 = vrot.lane.b32.xlu1 %v2974_v13, %s2771_s11  ;;  %s2779_s11 = smov 32  }
  0x6e   : > { %1552 = vrot.lane.b32.xlu1 %v2974_v13, %s2766_s27  ;;  %s2774_s27 = smov 48  }
  0x72   : > { %1253 = vrot.lane.b32.xlu1 %v2966_v10, %s2768_s29 }
  0x76   : > { %1579 = vrot.lane.b32.xlu1 %v2971_v12, %s2773_s12 }
  0x7a   : > { %1581 = vrot.lane.b32.xlu1 %v2974_v13, %s2773_s12  ;;  %s2784_s12 = smov 16  }
  0x7e   : > { %1588 = vrot.lane.b32.xlu1 %v2974_v13, %s2769_s24  ;;  %s2776_s24 = smov 121  }
  0x82   : > { %1267 = vrot.lane.b32.xlu1 %v2966_v10, %s2770_s30  ;;  %s2777_s30 = smov 8  }
  0x83   : > { %v414_v23 = vpop.permute.xlu1 %413  ;;  %v395_v24 = vpop.permute.xlu0 %394 }
  0x87   : > { %v416_v28 = vpop.permute.xlu1 %415  ;;  %v397_v29 = vpop.permute.xlu0 %396 }
  0x88   : > { %v401_v30 = vsel %vm5303_vm0, %v395_v24, %v397_v29  ;;  %v402_v31 = vsel %vm5303_vm0, %v397_v29, %v395_v24  ;;  %v419_v35 = vsel %vm5300_vm1, %v416_v28, %v414_v23  ;;  %v418_v38 = vsel %vm5300_vm1, %v414_v23, %v416_v28 }
  0x89   : > { %v3058_v33 = vmul.f32 %v406_v26, %v402_v31  ;;  %v3060_v34 = vmul.f32 %v410_v27, %v401_v30  ;;  %v3070_v37 = vmul.f32 %v423_v32, %v419_v35  ;;  %v3081_v41 = vmul.f32 %v427_v36, %v418_v38 }
  0x8a   : > { %v3166_v28 = vsub.s32 2, %v3024_v18  ;;  %v5194_v31 = vmov 3  }
  0x8b   : > { %5358 = vst [vmem:[#allocation7_spill] sm:$0xff] %v3058_v33  ;;  %5359 = vst [vmem:[#allocation8_spill] sm:$0xff] %v3060_v34  ;;  %500 = vrot.lane.b32.xlu1 %v3060_v34, %s2774_s27  ;;  %498 = vrot.lane.b32.xlu0 %v3058_v33, %s2774_s27  ;;  %v3074_v39 = vpop.permute.xlu1 %432  ;;  %v3076_v40 = vpop.permute.xlu0 %430 }
  0x8c   : > { %5360 = vst [vmem:[#allocation9_spill] sm:$0xff] %v3070_v37  ;;  %5361 = vst [vmem:[#allocation10_spill] sm:$0xff] %v3081_v41  ;;  %v1453_v32 = vrot.slane %v3133_v56, %v3166_v28  ;;  %v1457_v35 = vrot.slane %v3136_v57, %v3166_v28  ;;  %v444_v8 = vrot.slane %v3040_v22, %v3166_v28 }
  0x8e   : > { %vm1458_vm9 = vcmp.eq.s32.totalorder %v1453_v32, 1  ;;  %vm1459_vm10 = vcmp.eq.s32.totalorder %v1457_v35, 1 }
  0x8f   : > { %512 = vrot.lane.b32.xlu1 %v3070_v37, %s2774_s27  ;;  %1622 = vrot.lane.b32.xlu0 %v2971_v12, %s2775_s28  ;;  %v3087_v42 = vpop.permute.xlu1 %449  ;;  %v3089_v43 = vpop.permute.xlu0 %447 }
  0x93   : > { %514 = vrot.lane.b32.xlu1 %v3081_v41, %s2774_s27  ;;  %1280 = vrot.lane.b32.xlu0 %v2963_v9, %s2774_s27  ;;  %v3093_v44 = vpop.permute.xlu1 %466  ;;  %v3095_v45 = vpop.permute.xlu0 %464 }
  0x97   : > { %1615 = vrot.lane.b32.xlu1 %v2971_v12, %s2776_s24  ;;  %1323 = vperm.xlu0 %2632, %v2947_v4   ;;  %v3104_v47 = vpop.permute.xlu1 %483  ;;  %v3106_v48 = vpop.permute.xlu0 %481 }
  0x9b   : > { %1617 = vrot.lane.b32.xlu1 %v2974_v13, %s2776_s24  ;;  %1658 = vrot.lane.b32.xlu0 %v2971_v12, %s2777_s30  ;;  %s2783_s24 = smov 7  }
  0x9c   : > { %2633 = vset.pattern.permute.xlu0 %v2778_v46 }
  0x9f   : > { %1624 = vrot.lane.b32.xlu1 %v2974_v13, %s2775_s28  ;;  %1294 = vrot.lane.b32.xlu0 %v2963_v9, %s2779_s11  ;;  %s2781_s28 = smov 119  }
  0xa3   : > { %1282 = vrot.lane.b32.xlu1 %v2966_v10, %s2774_s27  ;;  %1331 = vperm.xlu0 %2633, %v2947_v4  }
  0xa4   : > { %v3111_v49 = vpop.permute.xlu1 %1218  ;;  %v3113_v50 = vpop.permute.xlu0 %507 }
  0xa5   : > { %5362 = vst [vmem:[#allocation11_spill] sm:$0xff] %v3113_v50 }
  0xa7   : > { %1651 = vrot.lane.b32.xlu1 %v2971_v12, %s2780_s23  ;;  %1691 = vrot.lane.b32.xlu0 %v2971_v12, %s2781_s28 }
  0xa8   : > { %2638 = vset.pattern.permute.xlu0 %v5203_v53  ;;  %v2796_v53 = vmov 28  }
  0xa9   : > { %v3125_v54 = vpop.permute.xlu1 %1230  ;;  %v3127_v55 = vpop.permute.xlu0 %519 }
  0xaa   : > { %5363 = vst [vmem:[#allocation12_spill] sm:$0xff] %v3125_v54  ;;  %5364 = vst [vmem:[#allocation13_spill] sm:$0xff] %v3127_v55  ;;  %v2806_v55 = vmov 29  }
  0xab   : > { %1653 = vrot.lane.b32.xlu1 %v2974_v13, %s2780_s23  ;;  %1698 = vrot.lane.b32.xlu0 %v2971_v12, %s2783_s24  ;;  %s2799_s23 = smov 116  }
  0xad   : > { %v1401_v58 = vpop.permute.xlu1 %1400  ;;  %v1399_v59 = vpop.permute.xlu0 %1398 }
  0xae   : > { %v1402_v23 = vsel %vm451_vm7, %v1399_v59, %v1401_v58  ;;  %v1403_v24 = vsel %vm451_vm7, %v1401_v58, %v1399_v59 }
  0xaf   : > { %1660 = vrot.lane.b32.xlu1 %v2974_v13, %s2777_s30  ;;  %1308 = vrot.lane.b32.xlu0 %v2963_v9, %s2784_s12  ;;  %s2786_s30 = smov 118  }
  0xb1   : > { %v1407_v62 = vpop.permute.xlu1 %1406  ;;  %v1405_v63 = vpop.permute.xlu0 %1404 }
  0xb2   : > { %v1409_v7 = vsel %vm1408_vm4, %v1405_v63, %v1407_v62  ;;  %v1410_v17 = vsel %vm1408_vm4, %v1407_v62, %v1405_v63  ;;  %vm1518_vm4 = vcmp.lt.s32.totalorder %v3027_v19, 12 }
  0xb3   : > { %1296 = vrot.lane.b32.xlu1 %v2966_v10, %s2779_s11  ;;  %723 = vperm.xlu0 %2638, %v2952_v5   ;;  %v1425_v29 = vsel %vm3147_vm5, %v1402_v23, %v1410_v17  ;;  %v1426_v30 = vsel %vm3151_vm6, %v1403_v24, %v1409_v7  ;;  %v3193_v17 = vmul.f32 %v3111_v49, %v2963_v9 }
  0xb4   : > { %v1429_v36 = vrot.slane %v1425_v29, 4  ;;  %v1430_v38 = vrot.slane %v1426_v30, 4  ;;  %v3197_v23 = vmul.f32 %v3111_v49, %v2966_v10 }
  0xb5   : > { %v1438_v26 = vpop.permute.xlu1 %1437  ;;  %v3163_v27 = vpop.permute.xlu0 %1244  ;;  %5370 = vst [vmem:[#allocation15_spill] sm:$0xff] %v3193_v17 }
  0xb6   : > { %5369 = vst [vmem:[#allocation14_spill] sm:$0xff] %v3163_v27  ;;  %v1433_v58 = vmul.f32 %v1429_v36, %v3125_v54  ;;  %v1434_v59 = vmul.f32 %v1430_v38, %v3125_v54  ;;  %5371 = vst [vmem:[#allocation16_spill] sm:$0xff] %v3197_v23 }
  0xb7   : > { %614 = vperm.xlu1 %2634, %v2952_v5   ;;  %2639 = vset.pattern.permute.xlu0 %v5194_v31 }
  0xb8   : > { %1258 = vperm.xlu0 %2639, %v2947_v4   ;;  %v1435_v30 = vadd.f32 %v1433_v58, %v3193_v17  ;;  %v1436_v32 = vadd.f32 %v1434_v59, %v3197_v23 }
  0xb9   : > { %v1440_v51 = vpop.permute.xlu1 %1439  ;;  %v1444_v52 = vpop.permute.xlu0 %1443 }
  0xba   : > { %v1441_v61 = vsel %vm468_vm11, %v1438_v26, %v1440_v51  ;;  %v1442_v62 = vsel %vm468_vm11, %v1440_v51, %v1438_v26 }
  0xbb   : > { %2635 = vset.pattern.permute.xlu1 %v5197_v16 }
  0xbc   : > { %626 = vperm.xlu1 %2635, %v2952_v5   ;;  %1729 = vrot.lane.b32.xlu0 %v2974_v13, %s2786_s30 }
  0xbd   : > { %v1446_v60 = vpop.permute.xlu1 %1445 }
  0xbe   : > { %v1448_v63 = vsel %vm1447_vm8, %v1444_v52, %v1446_v60  ;;  %v1449_v3 = vsel %vm1447_vm8, %v1446_v60, %v1444_v52  ;;  %v2788_v52 = vmov 10   ;;  %v3229_v60 = vpop.permute.xlu0 %1478 }
  0xbf   : > { %v1460_v6 = vsel %vm1458_vm9, %v1441_v61, %v1449_v3  ;;  %v1461_v7 = vsel %vm1459_vm10, %v1442_v62, %v1448_v63  ;;  %v5204_v62 = vmov 15   ;;  %v5196_v3 = vmov 4  }
  0xc0   : > { %v1464_v24 = vrot.slane %v1460_v6, 4  ;;  %v1465_v29 = vrot.slane %v1461_v7, 4  ;;  %1693 = vrot.lane.b32.xlu1 %v2974_v13, %s2781_s28  ;;  %1736 = vrot.lane.b32.xlu0 %v2974_v13, %s2787_s16  ;;  %s2801_s28 = smov 4   ;;  %vm1547_vm9 = vcmp.lt.s32.totalorder %v3027_v19, 123  ;;  %vm1554_vm10 = vcmp.lt.s32.totalorder %v3027_v19, 11 }
  0xc1   : > { %v3203_v26 = vpop.permute.xlu1 %1472  ;;  %2636 = vset.pattern.permute.xlu1 %v5200_v14 }
  0xc2   : > { %v1468_v49 = vmul.f32 %v1464_v24, %v3163_v27  ;;  %v1469_v35 = vmul.f32 %v1465_v29, %v3163_v27  ;;  %v3240_v6 = vpop.permute.xlu0 %1223  ;;  %v2792_v24 = vmov 11   ;;  %v440_v29 = vrot.slane %v3035_v21, %v3166_v28 }
  0xc3   : > { %5373 = vst [vmem:[#allocation18_spill] sm:$0xff] %v3240_v6 }
  0xc4   : > { %v3210_v36 = vadd.f32 %v1468_v49, %v1435_v30  ;;  %v3212_v38 = vadd.f32 %v1469_v35, %v1436_v32  ;;  %1700 = vrot.lane.b32.xlu1 %v2974_v13, %s2783_s24  ;;  %547 = vperm.xlu0 %2639, %v2952_v5   ;;  %v436_v30 = vsel %vm5299_vm12, %v3074_v39, %v3076_v40  ;;  %s2807_s24 = smov 115  }
  0xc5   : > { %v3217_v51 = vpop.permute.xlu1 %1474  ;;  %v3265_v49 = vmul.f32 %v440_v29, %v436_v30  ;;  %v2794_v29 = vmov 16  }
  0xc6   : > { %v3247_v7 = vpop.permute.xlu0 %1514 }
  0xc7   : > { %5375 = vst [vmem:[#allocation20_spill] sm:$0xff] %v3265_v49 }
  0xc8   : > { %1310 = vrot.lane.b32.xlu1 %v2966_v10, %s2784_s12  ;;  %2642 = vset.pattern.permute.xlu0 %v2788_v52  ;;  %v5211_v10 = vmov 5  }
  0xc9   : > { %v3221_v58 = vpop.permute.xlu1 %1480  ;;  %1339 = vperm.xlu0 %2642, %v2947_v4  }
  0xca   : > { %v3267_v35 = vpop.permute.xlu0 %1237 }
  0xcb   : > { %5376 = vst [vmem:[#allocation21_spill] sm:$0xff] %v3267_v35 }
  0xcc   : > { %533 = vperm.xlu1 %2636, %v2952_v5  }
  0xcd   : > { %v3225_v59 = vpop.permute.xlu1 %1225  ;;  %619 = vrot.lane.b32.xlu0 %v3070_v37, %s2779_s11 }
  0xce   : > { %5372 = vst [vmem:[#allocation17_spill] sm:$0xff] %v3225_v59  ;;  %v3274_v31 = vpop.permute.xlu0 %1550  ;;  %v2804_v59 = vmov 22  }
  0xd0   : > { %2637 = vset.pattern.permute.xlu1 %v2778_v46 }
  0xd1   : > { %640 = vperm.xlu1 %2637, %v2952_v5   ;;  %v3233_v61 = vpop.permute.xlu1 %1507  ;;  %654 = vperm.xlu0 %2642, %v2952_v5  }
  0xd5   : > { %2640 = vset.pattern.permute.xlu1 %v5204_v62  ;;  %v3237_v63 = vpop.permute.xlu1 %1509  ;;  %2643 = vset.pattern.permute.xlu0 %v5196_v3  ;;  %v3285_v3 = vpop.permute.xlu0 %1251  ;;  %v2797_v62 = vmov 12  }
  0xd6   : > { %735 = vperm.xlu1 %2640, %v2952_v5   ;;  %1273 = vperm.xlu0 %2643, %v2947_v4   ;;  %5377 = vst [vmem:[#allocation22_spill] sm:$0xff] %v3285_v3 }
  0xd9   : > { %v3244_v46 = vpop.permute.xlu1 %1516  ;;  %v3294_v11 = vpop.permute.xlu0 %1586 }
  0xda   : > { %1727 = vrot.lane.b32.xlu1 %v2971_v12, %s2786_s30  ;;  %1765 = vrot.lane.b32.xlu0 %v2974_v13, %s2791_s17  ;;  %s2812_s30 = smov 114  }
  0xdb   : > { %2641 = vset.pattern.permute.xlu1 %v2792_v24 }
  0xdd   : > { %v3259_v32 = vpop.permute.xlu1 %1239  ;;  %v3302_v0 = vpop.permute.xlu0 %1265 }
  0xde   : > { %5374 = vst [vmem:[#allocation19_spill] sm:$0xff] %v3259_v32  ;;  %1734 = vrot.lane.b32.xlu1 %v2971_v12, %s2787_s16  ;;  %1772 = vrot.lane.b32.xlu0 %v2974_v13, %s2793_s22  ;;  %5379 = vst [vmem:[#allocation24_spill] sm:$0xff] %v3302_v0  ;;  %v2803_v32 = vmov 35  }
  0xe1   : > { %v3269_v52 = vpop.permute.xlu1 %1543  ;;  %v3313_v9 = vpop.permute.xlu0 %1315 }
  0xe2   : > { %1347 = vperm.xlu1 %2641, %v2947_v4   ;;  %526 = vrot.lane.b32.xlu0 %v3265_v49, %s2774_s27  ;;  %5380 = vst [vmem:[#allocation25_spill] sm:$0xff] %v3313_v9 }
  0xe5   : > { %v3276_v15 = vpop.permute.xlu1 %1545 }
  0xe6   : > { %606 = vrot.lane.b32.xlu1 %v3058_v33, %s2779_s11  ;;  %561 = vperm.xlu0 %2643, %v2952_v5  }
  0xe7   : > { %2644 = vset.pattern.permute.xlu1 %v2794_v29  ;;  %v2795_v29 = vmov 17  }
  0xe9   : > { %v3281_v30 = vpop.permute.xlu1 %1552 }
  0xea   : > { %608 = vrot.lane.b32.xlu1 %v3060_v34, %s2779_s11  ;;  %2646 = vset.pattern.permute.xlu0 %v2792_v24 }
  0xeb   : > { %668 = vperm.xlu0 %2646, %v2952_v5  }
  0xed   : > { %v3288_v16 = vpop.permute.xlu1 %1253 }
  0xee   : > { %5378 = vst [vmem:[#allocation23_spill] sm:$0xff] %v3288_v16  ;;  %621 = vrot.lane.b32.xlu1 %v3081_v41, %s2779_s11 }
  0xef   : > { %728 = vrot.lane.b32.xlu0 %v3070_v37, %s2784_s12 }
  0xf0   : > { %2647 = vset.pattern.permute.xlu0 %v2795_v29 }
  0xf1   : > { %v3296_v14 = vpop.permute.xlu1 %1579 }
  0xf2   : > { %749 = vperm.xlu1 %2644, %v2952_v5  }
  0xf3   : > { %763 = vperm.xlu0 %2647, %v2952_v5  }
  0xf5   : > { %v3300_v24 = vpop.permute.xlu1 %1581 }
  0xf6   : > { %1763 = vrot.lane.b32.xlu1 %v2971_v12, %s2791_s17 }
  0xf7   : > { %2650 = vset.pattern.permute.xlu0 %v2796_v53  ;;  %2645 = vset.pattern.permute.xlu1 %v2797_v62  ;;  %v435_v53 = vsel %vm5299_vm12, %v3076_v40, %v3074_v39  ;;  %v2800_v39 = vmov 21  }
  0xf8   : > { %888 = vperm.xlu0 %2650, %v2952_v5   ;;  %v3324_v23 = vmul.f32 %v444_v8, %v435_v53 }
  0xf9   : > { %v3307_v29 = vpop.permute.xlu1 %1588 }
  0xfa   : > { %1770 = vrot.lane.b32.xlu1 %v2971_v12, %s2793_s22  ;;  %5382 = vst [vmem:[#allocation27_spill] sm:$0xff] %v3324_v23 }
  0xfc   : > { %2651 = vset.pattern.permute.xlu0 %v5211_v10 }
  0xfd   : > { %v3320_v0 = vpop.permute.xlu1 %1267  ;;  %1287 = vperm.xlu0 %2651, %v2947_v4   ;;  %v3330_v10 = vpop.permute.xlu0 %498 }
  0xfe   : > { %5381 = vst [vmem:[#allocation26_spill] sm:$0xff] %v3320_v0  ;;  %1355 = vperm.xlu1 %2645, %v2947_v4   ;;  %5384 = vst [vmem:[#allocation29_spill] sm:$0xff] %v3330_v10  ;;  %v452_v10 = vsel %vm451_vm7, %v3089_v43, %v3087_v42 }
 0x101   : > { %v3326_v17 = vpop.permute.xlu1 %500  ;;  %1801 = vrot.lane.b32.xlu0 %v2974_v13, %s2799_s23  ;;  %v3340_v8 = vpop.permute.xlu0 %1622 }
 0x102   : > { %5383 = vst [vmem:[#allocation28_spill] sm:$0xff] %v3326_v17  ;;  %528 = vrot.lane.b32.xlu1 %v3324_v23, %s2774_s27 }
 0x103   : > { %2648 = vset.pattern.permute.xlu1 %v2800_v39 }
 0x105   : > { %v3334_v40 = vpop.permute.xlu1 %512  ;;  %1808 = vrot.lane.b32.xlu0 %v2974_v13, %s2801_s28  ;;  %v3348_v39 = vpop.permute.xlu0 %1280 }
 0x106   : > { %5385 = vst [vmem:[#allocation30_spill] sm:$0xff] %v3334_v40  ;;  %633 = vrot.lane.b32.xlu1 %v3265_v49, %s2779_s11  ;;  %5387 = vst [vmem:[#allocation32_spill] sm:$0xff] %v3348_v39  ;;  %v2802_v39 = vmov 18  }
 0x109   : > { %v3342_v53 = vpop.permute.xlu1 %514  ;;  %540 = vrot.lane.b32.xlu0 %v2914_v1, %s2774_s27 }
 0x10a   : > { %5386 = vst [vmem:[#allocation31_spill] sm:$0xff] %v3342_v53  ;;  %635 = vrot.lane.b32.xlu1 %v3324_v23, %s2779_s11 }
 0x10d   : > { %v3350_v0 = vpop.permute.xlu1 %1615  ;;  %575 = vperm.xlu0 %2651, %v2952_v5  }
 0x10e   : > { %715 = vrot.lane.b32.xlu1 %v3058_v33, %s2784_s12 }
 0x111   : > { %v3355_v3 = vpop.permute.xlu1 %1617  ;;  %2654 = vset.pattern.permute.xlu0 %v2797_v62 }
 0x112   : > { %717 = vrot.lane.b32.xlu1 %v3060_v34, %s2784_s12  ;;  %682 = vperm.xlu0 %2654, %v2952_v5   ;;  %v3360_v16 = vpop.permute.xlu0 %1323 }
 0x113   : > { %5388 = vst [vmem:[#allocation33_spill] sm:$0xff] %v3360_v16 }
 0x115   : > { %v3362_v27 = vpop.permute.xlu1 %1624 }
 0x116   : > { %730 = vrot.lane.b32.xlu1 %v3081_v41, %s2784_s12  ;;  %2655 = vset.pattern.permute.xlu0 %v2802_v39  ;;  %v3366_v54 = vpop.permute.xlu0 %1658  ;;  %v5228_v39 = vmov 6  }
 0x117   : > { %5389 = vst [vmem:[#allocation34_spill] sm:$0xff] %v3366_v54  ;;  %777 = vperm.xlu0 %2655, %v2952_v5  }
 0x119   : > { %v3369_v35 = vpop.permute.xlu1 %1282 }
 0x11a   : > { %5390 = vst [vmem:[#allocation35_spill] sm:$0xff] %v3369_v35  ;;  %825 = vperm.xlu1 %2648, %v2952_v5   ;;  %v3372_v62 = vpop.permute.xlu0 %1294 }
 0x11b   : > { %5391 = vst [vmem:[#allocation36_spill] sm:$0xff] %v3372_v62  ;;  %2658 = vset.pattern.permute.xlu0 %v2803_v32  ;;  %v3387_v32 = vsub.s32 4, %v3024_v18 }
 0x11c   : > { %997 = vperm.xlu0 %2658, %v2952_v5  }
 0x11d   : > { %v3375_v6 = vpop.permute.xlu1 %1651  ;;  %5395 = vst [vmem:[#allocation40_spill] sm:$0xff] %v3387_v32  ;;  %v457_v17 = vrot.slane %v3035_v21, %v3387_v32 }
 0x11e   : > { %5392 = vst [vmem:[#allocation37_spill] sm:$0xff] %v3375_v6  ;;  %2649 = vset.pattern.permute.xlu1 %v2804_v59  ;;  %v3377_v50 = vpop.permute.xlu0 %1331  ;;  %v3390_v59 = vsub.s32 3, %v3024_v18 }
 0x11f   : > { %5393 = vst [vmem:[#allocation38_spill] sm:$0xff] %v3377_v50  ;;  %831 = vperm.xlu1 %2649, %v2952_v5   ;;  %v2808_v50 = vmov 13   ;;  %v3416_v9 = vmul.f32 %v457_v17, %v452_v10  ;;  %v1476_v10 = vsel %vm485_vm2, %v3203_v26, %v3217_v51  ;;  %v1477_v17 = vsel %vm485_vm2, %v3217_v51, %v3203_v26 }
 0x120   : > { %2659 = vset.pattern.permute.xlu0 %v5228_v39  ;;  %5396 = vst [vmem:[#allocation41_spill] sm:$0xff] %v3390_v59  ;;  %v1492_v53 = vrot.slane %v3136_v57, %v3390_v59  ;;  %v2809_v51 = vmov 23  }
 0x121   : > { %1301 = vperm.xlu0 %2659, %v2947_v4   ;;  %v3382_v35 = vpop.permute.xlu1 %1653  ;;  %5400 = vst [vmem:[#allocation45_spill] sm:$0xff] %v3416_v9 }
 0x122   : > { %v3384_v62 = vpop.permute.xlu0 %1691  ;;  %vm1494_vm15 = vcmp.eq.s32.totalorder %v1492_v53, 1 }
 0x123   : > { %5394 = vst [vmem:[#allocation39_spill] sm:$0xff] %v3384_v62  ;;  %2652 = vset.pattern.permute.xlu1 %v2806_v55  ;;  %v1488_v55 = vrot.slane %v3133_v56, %v3390_v59  ;;  %v1483_v59 = vsel %vm1482_vm13, %v3229_v60, %v3221_v58  ;;  %v1484_v62 = vsel %vm1482_vm13, %v3221_v58, %v3229_v60 }
 0x124   : > { %900 = vperm.xlu1 %2652, %v2952_v5  }
 0x125   : > { %1837 = vrot.lane.b32.xlu0 %v2974_v13, %s2807_s24  ;;  %v3407_v40 = vpop.permute.xlu1 %1660  ;;  %vm1493_vm14 = vcmp.eq.s32.totalorder %v1488_v55, 1  ;;  %v1496_v55 = vsel %vm1494_vm15, %v1477_v17, %v1483_v59  ;;  %vm1590_vm15 = vcmp.lt.s32.totalorder %v3027_v19, 10 }
 0x126   : > { %v3395_v39 = vpop.permute.xlu0 %1698  ;;  %5398 = vst [vmem:[#allocation43_spill] sm:$0xff] %v3407_v40  ;;  %v1495_v60 = vsel %vm1493_vm14, %v1476_v10, %v1484_v62 }
 0x127   : > { %5397 = vst [vmem:[#allocation42_spill] sm:$0xff] %v3395_v39  ;;  %v1500_v39 = vrot.slane %v1496_v55, 4 }
 0x128   : > { %1799 = vrot.lane.b32.xlu1 %v2971_v12, %s2799_s23 }
 0x129   : > { %1844 = vrot.lane.b32.xlu0 %v2974_v13, %s2752_s20  ;;  %2653 = vset.pattern.permute.xlu1 %v2808_v50  ;;  %v3435_v53 = vpop.permute.xlu1 %1296 }
 0x12a   : > { %v3414_v16 = vpop.permute.xlu0 %1308  ;;  %5401 = vst [vmem:[#allocation46_spill] sm:$0xff] %v3435_v53 }
 0x12b   : > { %5399 = vst [vmem:[#allocation44_spill] sm:$0xff] %v3414_v16  ;;  %v1499_v16 = vrot.slane %v1495_v60, 4 }
 0x12c   : > { %1806 = vrot.lane.b32.xlu1 %v2971_v12, %s2801_s28 }
 0x12d   : > { %554 = vrot.lane.b32.xlu0 %v3416_v9, %s2774_s27 }
 0x12e   : > { %v3437_v58 = vpop.permute.xlu0 %723 }
 0x12f   : > { %5402 = vst [vmem:[#allocation47_spill] sm:$0xff] %v3437_v58  ;;  %v3495_v58 = vsub.s32 5, %v3024_v18 }
 0x130   : > { %1363 = vperm.xlu1 %2653, %v2947_v4  }
 0x131   : > { %589 = vperm.xlu0 %2659, %v2952_v5   ;;  %5412 = vst [vmem:[#allocation56_spill] sm:$0xff] %v3495_v58  ;;  %v474_v53 = vrot.slane %v3035_v21, %v3495_v58 }
 0x132   : > { %v3441_v54 = vpop.permute.xlu1 %614 }
 0x133   : > { %5403 = vst [vmem:[#allocation48_spill] sm:$0xff] %v3441_v54  ;;  %v3443_v40 = vpop.permute.xlu0 %1258 }
 0x134   : > { %5404 = vst [vmem:[#allocation49_spill] sm:$0xff] %v3443_v40  ;;  %v1503_v6 = vmul.f32 %v1499_v16, %v3443_v40  ;;  %v1504_v26 = vmul.f32 %v1500_v39, %v3443_v40  ;;  %542 = vrot.lane.b32.xlu1 %v2921_v2, %s2774_s27  ;;  %v2810_v16 = vmov 19   ;;  %v2814_v40 = vmov 36  }
 0x135   : > { %2662 = vset.pattern.permute.xlu0 %v2808_v50  ;;  %2656 = vset.pattern.permute.xlu1 %v2809_v51  ;;  %v2813_v51 = vmov 30  }
 0x136   : > { %v3450_v62 = vadd.f32 %v1503_v6, %v3210_v36  ;;  %v3453_v59 = vadd.f32 %v1504_v26, %v3212_v38  ;;  %696 = vperm.xlu0 %2662, %v2952_v5   ;;  %v2811_v6 = vmov 37  }
 0x137   : > { %v3456_v10 = vpop.permute.xlu1 %626  ;;  %v3458_v17 = vpop.permute.xlu0 %1729 }
 0x138   : > { %5405 = vst [vmem:[#allocation50_spill] sm:$0xff] %v3456_v10  ;;  %647 = vrot.lane.b32.xlu1 %v2914_v1, %s2779_s11 }
 0x13a   : > { %2663 = vset.pattern.permute.xlu0 %v2810_v16 }
 0x13b   : > { %v3462_v50 = vpop.permute.xlu1 %1693  ;;  %791 = vperm.xlu0 %2663, %v2952_v5   ;;  %v3467_v36 = vpop.permute.xlu0 %1736 }
 0x13c   : > { %649 = vrot.lane.b32.xlu1 %v2921_v2, %s2779_s11 }
 0x13f   : > { %v3469_v38 = vpop.permute.xlu1 %1700  ;;  %882 = vrot.lane.b32.xlu0 %v3060_v34, %s2763_s25  ;;  %v3475_v39 = vpop.permute.xlu0 %547 }
 0x140   : > { %742 = vrot.lane.b32.xlu1 %v3265_v49, %s2784_s12  ;;  %2666 = vset.pattern.permute.xlu0 %v2811_v6  ;;  %5406 = vst [vmem:[#allocation51_spill] sm:$0xff] %v3475_v39  ;;  %v5411_v6 = vmov 15  }
 0x143   : > { %v3477_v60 = vpop.permute.xlu1 %1310  ;;  %895 = vrot.lane.b32.xlu0 %v3081_v41, %s2763_s25 }
 0x144   : > { %5407 = vst [vmem:[#allocation52_spill] sm:$0xff] %v3477_v60  ;;  %744 = vrot.lane.b32.xlu1 %v3324_v23, %s2784_s12  ;;  %v3487_v26 = vpop.permute.xlu0 %1339 }
 0x145   : > { %5409 = vst [vmem:[#allocation54_spill] sm:$0xff] %v3487_v26  ;;  %v2816_v26 = vmov 24  }
 0x147   : > { %v3483_v55 = vpop.permute.xlu1 %533  ;;  %1023 = vperm.xlu0 %2666, %v2952_v5  }
 0x148   : > { %5408 = vst [vmem:[#allocation53_spill] sm:$0xff] %v3483_v55  ;;  %839 = vperm.xlu1 %2656, %v2952_v5   ;;  %v3498_v60 = vpop.permute.xlu0 %619 }
 0x149   : > { %5413 = vst [vmem:[#allocation57_spill] sm:$0xff] %v3498_v60 }
 0x14b   : > { %1870 = vrot.lane.b32.xlu0 %v2971_v12, %s2812_s30 }
 0x14c   : > { %2657 = vset.pattern.permute.xlu1 %v2813_v51  ;;  %v3491_v16 = vpop.permute.xlu1 %640  ;;  %2669 = vset.pattern.permute.xlu0 %v5411_v6  ;;  %v469_v6 = vsel %vm468_vm11, %v3095_v45, %v3093_v44 }
 0x14d   : > { %5410 = vst [vmem:[#allocation55_spill] sm:$0xff] %v3491_v16  ;;  %914 = vperm.xlu1 %2657, %v2952_v5   ;;  %v3512_v39 = vmul.f32 %v474_v53, %v469_v6  ;;  %v3514_v16 = vpop.permute.xlu0 %654  ;;  %v461_v6 = vrot.slane %v3040_v22, %v3387_v32 }
 0x14e   : > { %5416 = vst [vmem:[#allocation60_spill] sm:$0xff] %v3514_v16 }
 0x14f   : > { %1877 = vrot.lane.b32.xlu0 %v2971_v12, %s2751_s19  ;;  %5415 = vst [vmem:[#allocation59_spill] sm:$0xff] %v3512_v39 }
 0x151   : > { %2660 = vset.pattern.permute.xlu1 %v2814_v40  ;;  %v3504_v51 = vpop.permute.xlu1 %735  ;;  %v5417_v40 = vmov 14   ;;  %v3527_v53 = vpop.permute.xlu0 %1273 }
 0x152   : > { %5414 = vst [vmem:[#allocation58_spill] sm:$0xff] %v3504_v51  ;;  %1009 = vperm.xlu1 %2660, %v2952_v5   ;;  %v2815_v51 = vmov 20  }
 0x153   : > { %1379 = vperm.xlu0 %2669, %v2947_v4  }
 0x155   : > { %v3516_v55 = vpop.permute.xlu1 %1727  ;;  %v3543_v54 = vpop.permute.xlu0 %1765 }
 0x156   : > { %1835 = vrot.lane.b32.xlu1 %v2971_v12, %s2807_s24  ;;  %5419 = vst [vmem:[#allocation62_spill] sm:$0xff] %v3543_v54 }
 0x157   : > { %675 = vrot.lane.b32.xlu0 %v3512_v39, %s2779_s11  ;;  %2661 = vset.pattern.permute.xlu1 %v5417_v40  ;;  %v453_v40 = vsel %vm451_vm7, %v3087_v42, %v3089_v43  ;;  %v2817_v42 = vmov 38  }
 0x158   : > { %2670 = vset.pattern.permute.xlu0 %v2815_v51  ;;  %v3541_v51 = vmul.f32 %v461_v6, %v453_v40 }
 0x159   : > { %v3523_v10 = vpop.permute.xlu1 %1734 }
 0x15a   : > { %1842 = vrot.lane.b32.xlu1 %v2971_v12, %s2752_s20  ;;  %s2818_s20 = smov 113  }
 0x15b   : > { %770 = vrot.lane.b32.xlu0 %v3416_v9, %s2784_s12 }
 0x15d   : > { %v3537_v16 = vpop.permute.xlu1 %1347 }
 0x15e   : > { %5418 = vst [vmem:[#allocation61_spill] sm:$0xff] %v3537_v16  ;;  %1371 = vperm.xlu1 %2661, %v2947_v4   ;;  %v3555_v4 = vpop.permute.xlu0 %1772 }
 0x15f   : > { %805 = vperm.xlu0 %2670, %v2952_v5  }
 0x161   : > { %v3545_v60 = vpop.permute.xlu1 %606 }
 0x162   : > { %5420 = vst [vmem:[#allocation63_spill] sm:$0xff] %v3545_v60  ;;  %556 = vrot.lane.b32.xlu1 %v3541_v51, %s2774_s27  ;;  %v486_v60 = vsel %vm485_vm2, %v3106_v48, %v3104_v47 }
 0x163   : > { %909 = vrot.lane.b32.xlu0 %v3324_v23, %s2763_s25  ;;  %2664 = vset.pattern.permute.xlu1 %v2816_v26  ;;  %v3565_v26 = vpop.permute.xlu0 %526 }
 0x164   : > { %2673 = vset.pattern.permute.xlu0 %v2817_v42  ;;  %5423 = vst [vmem:[#allocation66_spill] sm:$0xff] %v3565_v26  ;;  %v3573_v42 = vsub.s32 6, %v3024_v18 }
 0x165   : > { %v3551_v43 = vpop.permute.xlu1 %608 }
 0x166   : > { %5421 = vst [vmem:[#allocation64_spill] sm:$0xff] %v3551_v43  ;;  %661 = vrot.lane.b32.xlu1 %v3416_v9, %s2779_s11  ;;  %5425 = vst [vmem:[#allocation68_spill] sm:$0xff] %v3573_v42  ;;  %v1600_v54 = vrot.slane %v3136_v57, %v3573_v42 }
 0x167   : > { %989 = vrot.lane.b32.xlu0 %v3058_v33, %s2765_s26 }
 0x168   : > { %vm3760_vm1 = vcmp.eq.s32.totalorder %v1600_v54, 1  ;;  %v1520_v54 = vsel %vm1518_vm4, %v3244_v46, %v3247_v7 }
 0x169   : > { %v3559_v6 = vpop.permute.xlu1 %621 }
 0x16a   : > { %5422 = vst [vmem:[#allocation65_spill] sm:$0xff] %v3559_v6  ;;  %663 = vrot.lane.b32.xlu1 %v3541_v51, %s2779_s11  ;;  %v3579_v6 = vpop.permute.xlu0 %561 }
 0x16b   : > { %1002 = vrot.lane.b32.xlu0 %v3070_v37, %s2765_s26  ;;  %5427 = vst [vmem:[#allocation70_spill] sm:$0xff] %v3579_v6 }
 0x16d   : > { %v3567_v40 = vpop.permute.xlu1 %749 }
 0x16e   : > { %5424 = vst [vmem:[#allocation67_spill] sm:$0xff] %v3567_v40  ;;  %756 = vrot.lane.b32.xlu1 %v2914_v1, %s2784_s12  ;;  %v2819_v40 = vmov 26   ;;  %v491_v1 = vrot.slane %v3035_v21, %v3573_v42  ;;  %v3596_v6 = vpop.permute.xlu0 %668  ;;  %v2820_v21 = vmov 31  }
 0x16f   : > { %1037 = vperm.xlu0 %2673, %v2952_v5   ;;  %5429 = vst [vmem:[#allocation72_spill] sm:$0xff] %v3596_v6  ;;  %v2821_v6 = vmov 42  }
 0x171   : > { %v3575_v43 = vpop.permute.xlu1 %1763 }
 0x172   : > { %5426 = vst [vmem:[#allocation69_spill] sm:$0xff] %v3575_v43  ;;  %758 = vrot.lane.b32.xlu1 %v2921_v2, %s2784_s12  ;;  %v3594_v2 = vmul.f32 %v491_v1, %v486_v60  ;;  %v3608_v16 = vpop.permute.xlu0 %728  ;;  %v1596_v43 = vrot.slane %v3133_v56, %v3573_v42 }
 0x173   : > { %1907 = vrot.lane.b32.xlu0 %v2974_v13, %s2818_s20  ;;  %5432 = vst [vmem:[#allocation75_spill] sm:$0xff] %v3608_v16 }
 0x174   : > { %2676 = vset.pattern.permute.xlu0 %v2819_v40  ;;  %5428 = vst [vmem:[#allocation71_spill] sm:$0xff] %v3594_v2  ;;  %vm3756_vm12 = vcmp.eq.s32.totalorder %v1596_v43, 1 }
 0x175   : > { %v3585_v26 = vpop.permute.xlu1 %1770 }
 0x176   : > { %847 = vperm.xlu1 %2664, %v2952_v5   ;;  %v3615_v1 = vpop.permute.xlu0 %763 }
 0x177   : > { %1914 = vrot.lane.b32.xlu0 %v2974_v13, %s2753_s21  ;;  %5434 = vst [vmem:[#allocation77_spill] sm:$0xff] %v3615_v1 }
 0x179   : > { %v3598_v40 = vpop.permute.xlu1 %1355 }
 0x17a   : > { %5430 = vst [vmem:[#allocation73_spill] sm:$0xff] %v3598_v40  ;;  %880 = vrot.lane.b32.xlu1 %v3058_v33, %s2763_s25  ;;  %v3623_v16 = vpop.permute.xlu0 %888  ;;  %v2823_v33 = vmov 33   ;;  %v367_v40 = vld [vmem:[%s5184_s1 + $0x10] sm:$0xff] }
 0x17b   : > { %582 = vrot.lane.b32.xlu0 %v3594_v2, %s2774_s27  ;;  %2665 = vset.pattern.permute.xlu1 %v2820_v21  ;;  %5436 = vst [vmem:[#allocation79_spill] sm:$0xff] %v3623_v16  ;;  %vm1665_vm5 = vcmp.gt.f32.partialorder %v367_v40, 0.0 }
 0x17d   : > { %v3604_v23 = vpop.permute.xlu1 %528 }
 0x17e   : > { %5431 = vst [vmem:[#allocation74_spill] sm:$0xff] %v3604_v23  ;;  %893 = vrot.lane.b32.xlu1 %v3070_v37, %s2763_s25 }
 0x17f   : > { %689 = vrot.lane.b32.xlu0 %v3594_v2, %s2779_s11  ;;  %v1564_v2 = vrot.slane %v3136_v57, %v3495_v58 }
 0x181   : > { %v3612_v60 = vpop.permute.xlu1 %633  ;;  %vm3735_vm13 = vcmp.eq.s32.totalorder %v1564_v2, 1  ;;  %v487_v2 = vsel %vm485_vm2, %v3104_v47, %v3106_v48  ;;  %vm1655_vm2 = vcmp.lt.s32.totalorder %v3027_v19, 120 }
 0x182   : > { %5433 = vst [vmem:[#allocation76_spill] sm:$0xff] %v3612_v60  ;;  %928 = vperm.xlu1 %2665, %v2952_v5   ;;  %v2822_v60 = vmov 43  }
 0x183   : > { %784 = vrot.lane.b32.xlu0 %v3512_v39, %s2784_s12 }
 0x185   : > { %v3619_v21 = vpop.permute.xlu1 %635 }
 0x186   : > { %5435 = vst [vmem:[#allocation78_spill] sm:$0xff] %v3619_v21  ;;  %2667 = vset.pattern.permute.xlu1 %v2821_v6  ;;  %v3631_v21 = vpop.permute.xlu0 %1287  ;;  %v2824_v6 = vmov 39  }
 0x187   : > { %1106 = vperm.xlu1 %2667, %v2952_v5   ;;  %863 = vperm.xlu0 %2676, %v2952_v5   ;;  %5439 = vst [vmem:[#allocation82_spill] sm:$0xff] %v3631_v21 }
 0x189   : > { %v3625_v23 = vpop.permute.xlu1 %715 }
 0x18a   : > { %5437 = vst [vmem:[#allocation80_spill] sm:$0xff] %v3625_v23 }
 0x18b   : > { %2668 = vset.pattern.permute.xlu1 %v2822_v60  ;;  %2677 = vset.pattern.permute.xlu0 %v2823_v33  ;;  %v2825_v60 = vmov 25   ;;  %v3638_v33 = vpop.permute.xlu0 %1801 }
 0x18c   : > { %1118 = vperm.xlu1 %2668, %v2952_v5   ;;  %956 = vperm.xlu0 %2677, %v2952_v5   ;;  %5441 = vst [vmem:[#allocation84_spill] sm:$0xff] %v3638_v33 }
 0x18d   : > { %v3629_v1 = vpop.permute.xlu1 %717 }
 0x18e   : > { %5438 = vst [vmem:[#allocation81_spill] sm:$0xff] %v3629_v1  ;;  %v478_v1 = vrot.slane %v3040_v22, %v3495_v58 }
 0x190   : > { %1872 = vrot.lane.b32.xlu1 %v2974_v13, %s2812_s30  ;;  %2678 = vset.pattern.permute.xlu0 %v2824_v6  ;;  %v2826_v6 = vmov 45  }
 0x191   : > { %v3635_v16 = vpop.permute.xlu1 %730  ;;  %1051 = vperm.xlu0 %2678, %v2952_v5   ;;  %2671 = vset.pattern.permute.xlu1 %v2825_v60  ;;  %v470_v5 = vsel %vm468_vm11, %v3093_v44, %v3095_v45  ;;  %v3654_v60 = vpop.permute.xlu0 %1808  ;;  %v2827_v44 = vmov 27  }
 0x192   : > { %5440 = vst [vmem:[#allocation83_spill] sm:$0xff] %v3635_v16  ;;  %v2828_v16 = vmov 34  }
 0x194   : > { %1879 = vrot.lane.b32.xlu1 %v2974_v13, %s2751_s19  ;;  %v3659_v13 = vld [vmem:[%s5185_s2] sm:$0xf] }
 0x195   : > { %v3642_v23 = vpop.permute.xlu1 %825  ;;  %1111 = vrot.lane.b32.xlu0 %v3070_v37, %s2768_s29  ;;  %v3669_v45 = vpop.permute.xlu0 %540 }
 0x196   : > { %5442 = vst [vmem:[#allocation85_spill] sm:$0xff] %v3642_v23  ;;  %2679 = vset.pattern.permute.xlu0 %v2826_v6  ;;  %v3662_v23 = vmul.f32 %v478_v1, %v470_v5  ;;  %5444 = vst [vmem:[#allocation87_spill] sm:$0xff] %v3669_v45  ;;  %v1524_v45 = vrot.slane %v3133_v56, %v3387_v32 }
 0x198   : > { %568 = vrot.lane.b32.xlu1 %v3512_v39, %s2774_s27  ;;  %vm3717_vm7 = vcmp.eq.s32.totalorder %v1524_v45, 1 }
 0x199   : > { %1146 = vperm.xlu0 %2679, %v3659_v13   ;;  %v3680_v5 = vpop.permute.xlu0 %575 }
 0x19a   : > { %v3664_v6 = vpop.permute.xlu1 %831  ;;  %5447 = vst [vmem:[#allocation90_spill] sm:$0xff] %v3680_v5  ;;  %v368_v5 = vld [vmem:[%s5184_s1 + $0x18] sm:$0xff] }
 0x19b   : > { %5443 = vst [vmem:[#allocation86_spill] sm:$0xff] %v3664_v6  ;;  %v2829_v6 = vmov 40   ;;  %vm1666_vm6 = vcmp.gt.f32.partialorder %v368_v5, 0.0  ;;  %v1519_v5 = vsel %vm1518_vm4, %v3247_v7, %v3244_v46  ;;  %v1513_v7 = vsel %vm1511_vm3, %v3237_v63, %v3233_v61 }
 0x19c   : > { %570 = vrot.lane.b32.xlu1 %v3662_v23, %s2774_s27 }
 0x19d   : > { %2680 = vset.pattern.permute.xlu0 %v2827_v44 }
 0x19e   : > { %871 = vperm.xlu0 %2680, %v3659_v13  }
 0x19f   : > { %v3671_v37 = vpop.permute.xlu1 %900 }
 0x1a0   : > { %5445 = vst [vmem:[#allocation88_spill] sm:$0xff] %v3671_v37  ;;  %677 = vrot.lane.b32.xlu1 %v3662_v23, %s2779_s11  ;;  %v3690_v37 = vsub.s32 7, %v3024_v18  ;;  %v495_v18 = vrot.slane %v3040_v22, %v3573_v42  ;;  %v2830_v42 = vmov 46   ;;  %v1591_v22 = vsel %vm1590_vm15, %v3294_v11, %v3307_v29 }
 0x1a2   : > { %2681 = vset.pattern.permute.xlu0 %v2828_v16  ;;  %v1528_v16 = vrot.slane %v3136_v57, %v3387_v32  ;;  %5449 = vst [vmem:[#allocation92_spill] sm:$0xff] %v3690_v37 }
 0x1a3   : > { %v3675_v1 = vpop.permute.xlu1 %1799  ;;  %970 = vperm.xlu0 %2681, %v3659_v13  }
 0x1a4   : > { %5446 = vst [vmem:[#allocation89_spill] sm:$0xff] %v3675_v1  ;;  %772 = vrot.lane.b32.xlu1 %v3541_v51, %s2784_s12  ;;  %v3707_v1 = vpop.permute.xlu0 %682  ;;  %vm3721_vm8 = vcmp.eq.s32.totalorder %v1528_v16, 1 }
 0x1a5   : > { %5450 = vst [vmem:[#allocation93_spill] sm:$0xff] %v3707_v1  ;;  %v1632_v1 = vrot.slane %v3133_v56, %v3690_v37 }
 0x1a7   : > { %v3682_v44 = vpop.permute.xlu1 %1806  ;;  %2682 = vset.pattern.permute.xlu0 %v2829_v6  ;;  %v1560_v6 = vrot.slane %v3133_v56, %v3495_v58  ;;  %v5460_v56 = vmov 0   ;;  %vm3767_vm0 = vcmp.eq.s32.totalorder %v1632_v1, 1  ;;  %v1549_v58 = vsel %vm1547_vm9, %v3276_v15, %v3269_v52 }
 0x1a8   : > { %5448 = vst [vmem:[#allocation91_spill] sm:$0xff] %v3682_v44  ;;  %855 = vperm.xlu1 %2671, %v3659_v13   ;;  %1065 = vperm.xlu0 %2682, %v3659_v13   ;;  %v2831_v44 = vmov 32   ;;  %v3775_v48 = vpop.permute.xlu0 %777 }
 0x1a9   : > { %vm3731_vm11 = vcmp.eq.s32.totalorder %v1560_v6, 1  ;;  %5470 = vst [vmem:[#allocation96_spill] sm:$0xff] %v3775_v48  ;;  %v3900_v6 = vld [vmem:[%s2911_s18 + $0x10] sm:$0xf] }
 0x1ab   : > { %v3709_v33 = vpop.permute.xlu1 %1363 }
 0x1ac   : > { %5451 = vst [vmem:[#allocation94_spill] sm:$0xff] %v3709_v33  ;;  %907 = vrot.lane.b32.xlu1 %v3265_v49, %s2763_s25  ;;  %v1636_v33 = vrot.slane %v3136_v57, %v3690_v37  ;;  %2683 = vset.pattern.permute.xlu0 %v2830_v42  ;;  %v3744_v57 = vsel %vm1665_vm5, 1, %v5460_v56  ;;  %v3748_v42 = vsel %vm1666_vm6, 1, %v5460_v56  ;;  %vm1662_vm5 = vcmp.lt.s32.totalorder %v3027_v19, 8 }
 0x1ad   : > { %2672 = vset.pattern.permute.xlu1 %v2831_v44  ;;  %1160 = vperm.xlu0 %2683, %v3659_v13   ;;  %v1672_v43 = vrot.slane %v3744_v57, %v3030_v20  ;;  %v1676_v1 = vrot.slane %v3748_v42, %v3030_v20  ;;  %v1512_v20 = vsel %vm1511_vm3, %v3233_v61, %v3237_v63  ;;  %vm1702_vm6 = vcmp.lt.s32.totalorder %v3027_v19, 7 }
 0x1ae   : > { %vm3771_vm14 = vcmp.eq.s32.totalorder %v1636_v33, 1  ;;  %v3787_v33 = vmul.f32 %v495_v18, %v487_v2  ;;  %v1708_v18 = vrot.slane %v3744_v57, %v3044_v25  ;;  %v1712_v46 = vrot.slane %v3748_v42, %v3044_v25 }
 0x1af   : > { %v3750_v44 = vpop.permute.xlu1 %542  ;;  %v1555_v2 = vsel %vm1554_vm10, %v3274_v31, %v3281_v30  ;;  %v1556_v25 = vsel %vm1554_vm10, %v3281_v30, %v3274_v31  ;;  %v1592_v61 = vsel %vm1590_vm15, %v3307_v29, %v3294_v11  ;;  %vm3832_vm3 = vcmp.eq.s32.totalorder %v1672_v43, 1  ;;  %v3861_v43 = vpop.permute.xlu0 %997 }
 0x1b0   : > { %5461 = vst [vmem:[#allocation95_spill] sm:$0xff] %v3750_v44  ;;  %942 = vperm.xlu1 %2672, %v3659_v13   ;;  %v2832_v44 = vmov 47   ;;  %vm3836_vm4 = vcmp.eq.s32.totalorder %v1676_v1, 1  ;;  %v1744_v30 = vrot.slane %v3744_v57, %v3166_v28  ;;  %vm1695_vm10 = vcmp.lt.s32.totalorder %v3027_v19, 119 }
 0x1b1   : > { %951 = vrot.lane.b32.xlu0 %v3662_v23, %s2763_s25  ;;  %v1568_v29 = vsel %vm3735_vm13, %v1549_v58, %v1555_v2  ;;  %vm3873_vm15 = vcmp.eq.s32.totalorder %v1708_v18, 1 }
 0x1b2   : > { %2686 = vset.pattern.permute.xlu0 %v2832_v44  ;;  %v1531_v44 = vsel %vm3717_vm7, %v1512_v20, %v1520_v54  ;;  %v1548_v20 = vsel %vm1547_vm9, %v3269_v52, %v3276_v15  ;;  %vm5476_vm7 = vcmp.lt.s32.totalorder %v3027_v19, 9  ;;  %vm5478_vm9 = vcmp.lt.s32.totalorder %v3027_v19, 122 }
 0x1b3   : > { %v3795_v48 = vpop.permute.xlu1 %647  ;;  %v1535_v52 = vrot.slane %v1531_v44, 4  ;;  %v1567_v11 = vsel %vm3731_vm11, %v1548_v20, %v1556_v25  ;;  %v1584_v1 = vsel %vm5478_vm9, %v3296_v14, %v3300_v24  ;;  %vm5482_vm11 = vcmp.lt.s32.totalorder %v3027_v19, 121 }
 0x1b4   : > { %5471 = vst [vmem:[#allocation97_spill] sm:$0xff] %v3795_v48  ;;  %991 = vrot.lane.b32.xlu1 %v3060_v34, %s2765_s26  ;;  %v2833_v48 = vmov 44   ;;  %v1532_v34 = vsel %vm3721_vm8, %v1513_v7, %v1519_v5  ;;  %vm5477_vm8 = vmmov %vm5476_vm7  ;;  %v1620_v45 = vsel %vm5482_vm11, %v3350_v0, %v3355_v3  ;;  %v1571_v7 = vrot.slane %v1567_v11, 4 }
 0x1b5   : > { %2674 = vset.pattern.permute.xlu1 %v2833_v48  ;;  %1046 = vrot.lane.b32.xlu0 %v3541_v51, %s2765_s26  ;;  %v1627_v48 = vsel %vm5476_vm7, %v3340_v8, %v3362_v27  ;;  %v1628_v54 = vsel %vm5477_vm8, %v3362_v27, %v3340_v8  ;;  %vm5481_vm7 = vmmov %vm5478_vm9  ;;  %v1603_v8 = vsel %vm3756_vm12, %v1584_v1, %v1592_v61  ;;  %v1536_v5 = vrot.slane %v1532_v34, 4  ;;  %v5487_v61 = vld [vmem:[#allocation37_spill] sm:$0xff] }
 0x1b6   : > { %v1585_v25 = vsel %vm5481_vm7, %v3300_v24, %v3296_v14  ;;  %vm5483_vm13 = vmmov %vm5482_vm11  ;;  %v1639_v14 = vsel %vm3767_vm0, %v1620_v45, %v1628_v54  ;;  %vm3904_vm12 = vcmp.eq.s32.totalorder %v1712_v46, 1  ;;  %vm1738_vm8 = vcmp.lt.s32.totalorder %v3027_v19, 6 }
 0x1b7   : > { %v3863_v15 = vpop.permute.xlu1 %649  ;;  %v1621_v16 = vsel %vm5483_vm13, %v3355_v3, %v3350_v0  ;;  %v1604_v18 = vsel %vm3760_vm1, %v1585_v25, %v1591_v22  ;;  %v1748_v0 = vrot.slane %v3748_v42, %v3166_v28  ;;  %v1572_v37 = vrot.slane %v1568_v29, 4  ;;  %v3921_v28 = vpop.permute.xlu0 %1301  ;;  %v5489_v22 = vld [vmem:[#allocation43_spill] sm:$0xff] }
 0x1b8   : > { %1004 = vrot.lane.b32.xlu1 %v3081_v41, %s2765_s26  ;;  %v1640_v24 = vsel %vm3771_vm14, %v1621_v16, %v1627_v48  ;;  %v1607_v3 = vrot.slane %v1603_v8, 4  ;;  %v1539_v40 = vmul.f32 %v1535_v52, %v3527_v53  ;;  %v1540_v47 = vmul.f32 %v1536_v5, %v3527_v53  ;;  %5488 = vst [vmem:[#allocation37_spill] sm:$0xff] %v3921_v28  ;;  %v5490_v48 = vld [vmem:[#allocation34_spill] sm:$0xff] }
 0x1b9   : > { %1139 = vrot.lane.b32.xlu0 %v3900_v6, %s2768_s29  ;;  %v1608_v2 = vrot.slane %v1604_v18, 4  ;;  %v1643_v46 = vrot.slane %v1639_v14, 4  ;;  %v1644_v20 = vrot.slane %v1640_v24, 4  ;;  %v1656_v58 = vsel %vm1655_vm2, %v5487_v61, %v3382_v35  ;;  %v5493_v8 = vld [vmem:[#allocation42_spill] sm:$0xff] }
 0x1ba   : > { %vm1731_vm0 = vcmp.lt.s32.totalorder %v3027_v19, 118  ;;  %v1663_v54 = vsel %vm1662_vm5, %v5490_v48, %v5489_v22  ;;  %v1664_v52 = vsel %vm1662_vm5, %v5489_v22, %v5490_v48  ;;  %vm3931_vm1 = vcmp.eq.s32.totalorder %v1744_v30, 1  ;;  %v5501_v22 = vld [vmem:[#allocation25_spill] sm:$0xff] }
 0x1bb   : > { %v3911_v34 = vpop.permute.xlu1 %742  ;;  %v1575_v29 = vmul.f32 %v1571_v7, %v3631_v21  ;;  %v1576_v1 = vmul.f32 %v1572_v37, %v3631_v21  ;;  %v1657_v25 = vsel %vm1655_vm2, %v3382_v35, %v5487_v61  ;;  %v1703_v45 = vsel %vm1702_vm6, %v5493_v8, %v3469_v38  ;;  %v5577_v21 = vld [vmem:[#allocation95_spill] sm:$0xff] }
 0x1bc   : > { %5486 = vst [vmem:[#allocation98_spill] sm:$0xff] %v3911_v34  ;;  %1132 = vperm.xlu1 %2674, %v3659_v13   ;;  %v1704_v30 = vsel %vm1702_vm6, %v3469_v38, %v5493_v8  ;;  %v1541_v5 = vadd.f32 %v1539_v40, %v3450_v62  ;;  %v1542_v18 = vadd.f32 %v1540_v47, %v3453_v59  ;;  %vm3962_vm14 = vcmp.eq.s32.totalorder %v1748_v0, 1  ;;  %v5498_v59 = vld [vmem:[#allocation39_spill] sm:$0xff]  ;;  %v5499_v47 = vld [vmem:[#allocation41_spill] sm:$0xff]  ;;  %v4000_v8 = vld [vmem:[%s5188_s5] sm:$0xf] }
 0x1bd   : > { %1174 = vperm.xlu0 %2686, %v3659_v13   ;;  %v1611_v14 = vmul.f32 %v1607_v3, %v3921_v28  ;;  %v1612_v35 = vmul.f32 %v1608_v2, %v3921_v28  ;;  %v1679_v24 = vsel %vm3832_vm3, %v1656_v58, %v1664_v52  ;;  %v1680_v7 = vsel %vm3836_vm4, %v1657_v25, %v1663_v54 }
 0x1be   : > { %vm1774_vm5 = vcmp.lt.s32.totalorder %v3027_v19, 5  ;;  %v5497_v62 = vmov 2   ;;  %v1696_v37 = vsel %vm1695_vm10, %v5498_v59, %v3462_v50  ;;  %v1697_v63 = vsel %vm1695_vm10, %v3462_v50, %v5498_v59 }
 0x1bf   : > { %v3950_v16 = vpop.permute.xlu1 %744  ;;  %vm1767_vm6 = vcmp.lt.s32.totalorder %v3027_v19, 117  ;;  %v1577_v31 = vadd.f32 %v1575_v29, %v1541_v5  ;;  %v1578_v0 = vadd.f32 %v1576_v1, %v1542_v18  ;;  %v1715_v3 = vsel %vm3873_vm15, %v1696_v37, %v1704_v30  ;;  %v5518_v30 = vld [vmem:[#allocation56_spill] sm:$0xff] }
 0x1c0   : > { %5494 = vst [vmem:[#allocation43_spill] sm:$0xff] %v3950_v16  ;;  %1905 = vrot.lane.b32.xlu1 %v2971_v12, %s2818_s20  ;;  %v1716_v40 = vsel %vm3904_vm12, %v1697_v63, %v1703_v45  ;;  %v1780_v2 = vrot.slane %v3744_v57, %v5499_v47  ;;  %v1784_v61 = vrot.slane %v3748_v42, %v5499_v47  ;;  %v2834_v58 = vmov 48  }
 0x1c1   : > { %2675 = vset.pattern.permute.xlu1 %v5497_v62  ;;  %1058 = vrot.lane.b32.xlu0 %v3512_v39, %s2765_s26  ;;  %v1647_v48 = vmul.f32 %v1643_v46, %v5501_v22  ;;  %v1648_v54 = vmul.f32 %v1644_v20, %v5501_v22  ;;  %v1613_v52 = vadd.f32 %v1611_v14, %v1577_v31  ;;  %v1683_v44 = vrot.slane %v1679_v24, 4  ;;  %v1838_v62 = vpop.permute.xlu0 %1837  ;;  %v5511_v31 = vld [vmem:[#allocation38_spill] sm:$0xff]  ;;  %v5562_v22 = vld [vmem:[#allocation48_spill] sm:$0xff] }
 0x1c2   : > { %2687 = vset.pattern.permute.xlu0 %v2834_v58  ;;  %v1614_v27 = vadd.f32 %v1612_v35, %v1578_v0  ;;  %v1684_v29 = vrot.slane %v1680_v7, 4  ;;  %v1816_v1 = vrot.slane %v3744_v57, %v3387_v32  ;;  %v1820_v25 = vrot.slane %v3748_v42, %v3387_v32  ;;  %v5542_v32 = vld [vmem:[#allocation88_spill] sm:$0xff] }
 0x1c3   : > { %v3987_v50 = vpop.permute.xlu1 %839  ;;  %v1719_v46 = vrot.slane %v1715_v3, 4  ;;  %v1720_v20 = vrot.slane %v1716_v40, 4  ;;  %v1740_v45 = vsel %vm1738_vm8, %v3467_v36, %v3523_v10  ;;  %vm4012_vm2 = vcmp.eq.s32.totalorder %v1780_v2, 1  ;;  %v5512_v40 = vld [vmem:[#allocation91_spill] sm:$0xff] }
 0x1c4   : > { %5500 = vst [vmem:[#allocation34_spill] sm:$0xff] %v3987_v50  ;;  %1912 = vrot.lane.b32.xlu1 %v2971_v12, %s2753_s21  ;;  %v1739_v12 = vsel %vm1738_vm8, %v3523_v10, %v3467_v36  ;;  %vm4016_vm3 = vcmp.eq.s32.totalorder %v1784_v61, 1  ;;  %vm1803_vm4 = vcmp.lt.s32.totalorder %v3027_v19, 116  ;;  %vm1810_vm10 = vcmp.lt.s32.totalorder %v3027_v19, 4 }
 0x1c5   : > { %1153 = vrot.lane.b32.xlu0 %v3416_v9, %s2768_s29  ;;  %v1732_v10 = vsel %vm1731_vm0, %v3516_v55, %v3458_v17  ;;  %v1733_v36 = vsel %vm1731_vm0, %v3458_v17, %v3516_v55  ;;  %v1649_v18 = vadd.f32 %v1647_v48, %v1613_v52  ;;  %v1650_v14 = vadd.f32 %v1648_v54, %v1614_v27  ;;  %v5510_v17 = vld [vmem:[#allocation33_spill] sm:$0xff]  ;;  %v5513_v27 = vld [vmem:[#allocation62_spill] sm:$0xff] }
 0x1c6   : > { %v1751_v24 = vsel %vm3931_vm1, %v1732_v10, %v1740_v45  ;;  %v1752_v7 = vsel %vm3962_vm14, %v1733_v36, %v1739_v12  ;;  %vm4037_vm9 = vcmp.eq.s32.totalorder %v1816_v1, 1  ;;  %vm4041_vm15 = vcmp.eq.s32.totalorder %v1820_v25, 1  ;;  %v5516_v1 = vld [vmem:[#allocation89_spill] sm:$0xff] }
 0x1c7   : > { %v1687_v55 = vmul.f32 %v1683_v44, %v5510_v17  ;;  %v1688_v63 = vmul.f32 %v1684_v29, %v5510_v17  ;;  %v1723_v0 = vmul.f32 %v1719_v46, %v5511_v31  ;;  %v1724_v11 = vmul.f32 %v1720_v20, %v5511_v31  ;;  %v5514_v44 = vld [vmem:[#allocation69_spill] sm:$0xff]  ;;  %v5515_v29 = vld [vmem:[#allocation84_spill] sm:$0xff] }
 0x1c8   : > { %1941 = vperm.xlu1 %2675, %v4000_v8   ;;  %v4031_v35 = vpop.permute.xlu1 %914  ;;  %v1775_v38 = vsel %vm1774_vm5, %v3585_v26, %v3555_v4  ;;  %v1776_v3 = vsel %vm1774_vm5, %v3555_v4, %v3585_v26  ;;  %v1811_v2 = vsel %vm1810_vm10, %v5512_v40, %v3654_v60  ;;  %v1812_v61 = vsel %vm1810_vm10, %v3654_v60, %v5512_v40  ;;  %v5560_v17 = vld [vmem:[#allocation65_spill] sm:$0xff] }
 0x1c9   : > { %1188 = vperm.xlu0 %2687, %v3659_v13   ;;  %v1755_v58 = vrot.slane %v1751_v24, 4  ;;  %v1756_v48 = vrot.slane %v1752_v7, 4  ;;  %v1689_v54 = vadd.f32 %v1687_v55, %v1649_v18  ;;  %v1690_v52 = vadd.f32 %v1688_v63, %v1650_v14  ;;  %v1845_v18 = vpop.permute.xlu0 %1844 }
 0x1ca   : > { %v1768_v4 = vsel %vm1767_vm6, %v5514_v44, %v5513_v27  ;;  %v1769_v26 = vsel %vm1767_vm6, %v5513_v27, %v5514_v44  ;;  %v1804_v60 = vsel %vm1803_vm4, %v5516_v1, %v5515_v29  ;;  %v1805_v25 = vsel %vm1803_vm4, %v5515_v29, %v5516_v1  ;;  %v5526_v44 = vld [vmem:[#allocation73_spill] sm:$0xff] }
 0x1cb   : > { %v5517_v20 = vmov 1   ;;  %v1787_v12 = vsel %vm4012_vm2, %v1768_v4, %v1776_v3  ;;  %v1788_v45 = vsel %vm4016_vm3, %v1769_v26, %v1775_v38  ;;  %v1823_v10 = vsel %vm4037_vm9, %v1804_v60, %v1812_v61  ;;  %v5519_v3 = vld [vmem:[#allocation54_spill] sm:$0xff] }
 0x1cc   : > { %584 = vrot.lane.b32.xlu1 %v3787_v33, %s2774_s27  ;;  %v1824_v36 = vsel %vm4041_vm15, %v1805_v25, %v1811_v2  ;;  %v1725_v14 = vadd.f32 %v1723_v0, %v1689_v54  ;;  %v1726_v24 = vadd.f32 %v1724_v11, %v1690_v52  ;;  %v1851_v5 = vrot.slane %v3744_v57, %v5518_v30  ;;  %v5520_v0 = vld [vmem:[#allocation71_spill] sm:$0xff] }
 0x1cd   : > { %v4084_v46 = vpop.permute.xlu1 %1009  ;;  %2684 = vset.pattern.permute.xlu1 %v5517_v20  ;;  %1167 = vrot.lane.b32.xlu0 %v3512_v39, %s2768_s29  ;;  %v1855_v7 = vrot.slane %v3748_v42, %v5518_v30  ;;  %v1791_v59 = vrot.slane %v1787_v12, 4  ;;  %v1792_v37 = vrot.slane %v1788_v45, 4  ;;  %v1827_v55 = vrot.slane %v1823_v10, 4  ;;  %v4123_v29 = vpop.permute.xlu0 %554 }
 0x1ce   : > { %2688 = vset.pattern.permute.xlu0 %v5460_v56  ;;  %v1828_v63 = vrot.slane %v1824_v36, 4  ;;  %v1759_v40 = vmul.f32 %v1755_v58, %v5519_v3  ;;  %v1760_v2 = vmul.f32 %v1756_v48, %v5519_v3  ;;  %vm1839_vm7 = vcmp.lt.s32.totalorder %v3027_v19, 115  ;;  %v5525_v58 = vld [vmem:[#allocation61_spill] sm:$0xff] }
 0x1cf   : > { %vm4111_vm11 = vcmp.eq.s32.totalorder %v1851_v5, 1  ;;  %vm4115_vm13 = vcmp.eq.s32.totalorder %v1855_v7, 1  ;;  %v1795_v48 = vmul.f32 %v1791_v59, %v5525_v58  ;;  %v1796_v27 = vmul.f32 %v1792_v37, %v5525_v58  ;;  %v5553_v58 = vld [vmem:[#allocation28_spill] sm:$0xff] }
 0x1d0   : > { %691 = vrot.lane.b32.xlu1 %v3787_v33, %s2779_s11  ;;  %v1761_v11 = vadd.f32 %v1759_v40, %v1725_v14  ;;  %v1762_v61 = vadd.f32 %v1760_v2, %v1726_v24  ;;  %v1831_v4 = vmul.f32 %v1827_v55, %v5526_v44  ;;  %v1832_v26 = vmul.f32 %v1828_v63, %v5526_v44  ;;  %v5529_v55 = vld [vmem:[#allocation94_spill] sm:$0xff]  ;;  %v4145_v2 = vld [vmem:[%s2911_s18 + $0x18] sm:$0xf] }
 0x1d1   : > { %v1836_v38 = vpop.permute.xlu1 %1835  ;;  %1181 = vrot.lane.b32.xlu0 %v5520_v0, %s2768_s29  ;;  %vm5527_vm12 = vcmp.lt.s32.totalorder %v3027_v19, 3  ;;  %v5530_v40 = vmov 8   ;;  %5531 = vst [vmem:[#allocation42_spill] sm:$0xff] %v4145_v2  ;;  %vm884_vm0 = vcmp.lt.s32.totalorder %v3027_v19, 112  ;;  %vm502_vm1 = vcmp.lt.s32.totalorder %v3027_v19, 48  ;;  %v5552_v44 = vld [vmem:[#allocation29_spill] sm:$0xff] }
 0x1d2   : > { %v1840_v60 = vsel %vm1839_vm7, %v1836_v38, %v1838_v62  ;;  %v1841_v25 = vsel %vm1839_vm7, %v1838_v62, %v1836_v38  ;;  %vm5528_vm8 = vmmov %vm5527_vm12  ;;  %v1797_v14 = vadd.f32 %v1795_v48, %v1761_v11  ;;  %v1798_v24 = vadd.f32 %v1796_v27, %v1762_v61  ;;  %v4136_v62 = vpop.permute.xlu0 %589 }
 0x1d3   : > { %v5532_v48 = vmov 4   ;;  %v504_v3 = vsel %vm502_vm1, %v5553_v58, %v5552_v44  ;;  %vm610_vm14 = vcmp.lt.s32.totalorder %v3027_v19, 32  ;;  %vm993_vm5 = vcmp.lt.s32.totalorder %v3027_v19, 96 }
 0x1d4   : > { %786 = vrot.lane.b32.xlu1 %v3662_v23, %s2784_s12  ;;  %v1834_v37 = vadd.f32 %v1832_v26, %v1798_v24  ;;  %vm1874_vm6 = vcmp.lt.s32.totalorder %v3027_v19, 114  ;;  %vm5573_vm4 = vcmp.lt.s32.totalorder %v3027_v19, 2  ;;  %vm1909_vm9 = vcmp.lt.s32.totalorder %v3027_v19, 113 }
 0x1d5   : > { %v1843_v1 = vpop.permute.xlu1 %1842  ;;  %1209 = vperm.xlu0 %2688, %v4000_v8   ;;  %vm5574_vm10 = vmmov %vm5573_vm4 }
 0x1d6   : > { %v1846_v12 = vsel %vm5527_vm12, %v1843_v1, %v1845_v18  ;;  %v1847_v45 = vsel %vm5528_vm8, %v1845_v18, %v1843_v1  ;;  %v1833_v18 = vadd.f32 %v1831_v4, %v1797_v14  ;;  %v4155_v52 = vpop.permute.xlu0 %696  ;;  %v5533_v4 = vld [vmem:[#allocation27_spill] sm:$0xff]  ;;  %vm1102_vm12 = vcmp.lt.s32.totalorder %v3027_v19, 80 }
 0x1d7   : > { %v1858_v10 = vsel %vm4111_vm11, %v1840_v60, %v1847_v45  ;;  %v1859_v36 = vsel %vm4115_vm13, %v1841_v25, %v1846_v12  ;;  %v5535_v60 = vld [vmem:[#allocation7_spill] sm:$0xff]  ;;  %v5537_v45 = vld [vmem:[#allocation8_spill] sm:$0xff]  ;;  %vm5586_vm11 = vcmp.lt.s32.totalorder %v3027_v19, 1  ;;  %vm1269_vm8 = vcmp.lt.s32.totalorder %v3027_v19, 64 }
 0x1d8   : > { %v1862_v5 = vrot.slane %v1858_v10, 4  ;;  %v1863_v7 = vrot.slane %v1859_v36, 4  ;;  %921 = vrot.lane.b32.xlu1 %v3900_v6, %s2763_s25  ;;  %vm5587_vm13 = vmmov %vm5586_vm11 }
 0x1d9   : > { %v4138_v59 = vpop.permute.xlu1 %1371  ;;  %2691 = vset.pattern.permute.xlu0 %v5530_v40  ;;  %v5541_v40 = vld [vmem:[#allocation79_spill] sm:$0xff] }
 0x1da   : > { %v1866_v63 = vmul.f32 %v1862_v5, %v5529_v55  ;;  %v1867_v38 = vmul.f32 %v1863_v7, %v5529_v55  ;;  %2119 = vperm.xlu0 %2691, %v4000_v8   ;;  %v4166_v26 = vpop.permute.xlu0 %791 }
 0x1db   : > { %5534 = vst [vmem:[#allocation39_spill] sm:$0xff] %v4166_v26 }
 0x1dc   : > { %923 = vrot.lane.b32.xlu1 %v4145_v2, %s2763_s25  ;;  %v4149_v11 = vadd.f32 %v1866_v63, %v1833_v18  ;;  %v4151_v61 = vadd.f32 %v1867_v38, %v1834_v37 }
 0x1dd   : > { %v4153_v54 = vpop.permute.xlu1 %556 }
 0x1de   : > { %2694 = vset.pattern.permute.xlu0 %v5532_v48  ;;  %v883_v12 = vpop.permute.xlu0 %882 }
 0x1df   : > { %1997 = vperm.xlu0 %2694, %v4000_v8  }
 0x1e0   : > { %1016 = vrot.lane.b32.xlu1 %v3265_v49, %s2765_s26 }
 0x1e1   : > { %v4161_v27 = vpop.permute.xlu1 %661 }
 0x1e2   : > { %v896_v36 = vpop.permute.xlu0 %895 }
 0x1e3   : > { %2696 = vset.pattern.permute.xlu0 %v5460_v56 }
 0x1e4   : > { %1018 = vrot.lane.b32.xlu1 %v5533_v4, %s2765_s26 }
 0x1e5   : > { %v4168_v1 = vpop.permute.xlu1 %663 }
 0x1e6   : > { %v4185_v5 = vpop.permute.xlu0 %1023 }
 0x1e7   : > { %5540 = vst [vmem:[#allocation84_spill] sm:$0xff] %v4185_v5 }
 0x1e8   : > { %1098 = vrot.lane.b32.xlu1 %v5535_v60, %s2768_s29 }
 0x1e9   : > { %v4172_v25 = vpop.permute.xlu1 %756 }
 0x1ea   : > { %5536 = vst [vmem:[#allocation91_spill] sm:$0xff] %v4172_v25 }
 0x1ec   : > { %1100 = vrot.lane.b32.xlu1 %v5537_v45, %s2768_s29 }
 0x1ed   : > { %v4176_v10 = vpop.permute.xlu1 %758 }
 0x1ee   : > { %5538 = vst [vmem:[#allocation62_spill] sm:$0xff] %v4176_v10  ;;  %v5563_v10 = vld [vmem:[#allocation50_spill] sm:$0xff] }
 0x1f0   : > { %1113 = vrot.lane.b32.xlu1 %v3081_v41, %s2768_s29 }
 0x1f1   : > { %v4180_v14 = vpop.permute.xlu1 %847 }
 0x1f2   : > { %5539 = vst [vmem:[#allocation69_spill] sm:$0xff] %v4180_v14 }
 0x1f4   : > { %798 = vrot.lane.b32.xlu1 %v5520_v0, %s2784_s12 }
 0x1f5   : > { %v881_v24 = vpop.permute.xlu1 %880 }
 0x1f6   : > { %v885_v7 = vsel %vm884_vm0, %v881_v24, %v883_v12  ;;  %v886_v18 = vsel %vm884_vm0, %v883_v12, %v881_v24  ;;  %v4203_v12 = vpop.permute.xlu0 %1870 }
 0x1f7   : > { %v891_v48 = vmul.f32 %v5541_v40, %v885_v7  ;;  %v892_v30 = vmul.f32 %v5541_v40, %v886_v18 }
 0x1f8   : > { %800 = vrot.lane.b32.xlu1 %v3787_v33, %s2784_s12 }
 0x1f9   : > { %v894_v37 = vpop.permute.xlu1 %893 }
 0x1fa   : > { %v897_v63 = vsel %vm884_vm0, %v894_v37, %v896_v36  ;;  %v898_v38 = vsel %vm884_vm0, %v896_v36, %v894_v37  ;;  %v4211_v7 = vpop.permute.xlu0 %1877 }
 0x1fb   : > { %v903_v20 = vmul.f32 %v5542_v32, %v897_v63  ;;  %v904_v47 = vmul.f32 %v5542_v32, %v898_v38  ;;  %v2835_v38 = vmov 41  }
 0x1fc   : > { %935 = vrot.lane.b32.xlu1 %v3416_v9, %s2763_s25 }
 0x1fd   : > { %v905_v24 = vadd.f32 %v903_v20, %v891_v48  ;;  %v906_v14 = vadd.f32 %v904_v47, %v892_v30  ;;  %v4205_v50 = vpop.permute.xlu1 %928 }
 0x1fe   : > { %v4219_v18 = vpop.permute.xlu0 %1379 }
 0x200   : > { %937 = vrot.lane.b32.xlu1 %v3541_v51, %s2763_s25 }
 0x202   : > { %v4209_v36 = vpop.permute.xlu1 %1106  ;;  %v4225_v20 = vpop.permute.xlu0 %675 }
 0x203   : > { %5543 = vst [vmem:[#allocation89_spill] sm:$0xff] %v4209_v36 }
 0x204   : > { %1030 = vrot.lane.b32.xlu1 %v3900_v6, %s2765_s26 }
 0x206   : > { %v4234_v37 = vpop.permute.xlu0 %770 }
 0x207   : > { %v4215_v32 = vpop.permute.xlu1 %1118  ;;  %5545 = vst [vmem:[#allocation79_spill] sm:$0xff] %v4234_v37 }
 0x208   : > { %5544 = vst [vmem:[#allocation71_spill] sm:$0xff] %v4215_v32  ;;  %1032 = vrot.lane.b32.xlu1 %v4145_v2, %s2765_s26 }
 0x20a   : > { %v4240_v40 = vpop.permute.xlu0 %805 }
 0x20b   : > { %v4221_v47 = vpop.permute.xlu1 %1872  ;;  %5546 = vst [vmem:[#allocation88_spill] sm:$0xff] %v4240_v40  ;;  %v5555_v40 = vld [vmem:[#allocation13_spill] sm:$0xff] }
 0x20c   : > { %1125 = vrot.lane.b32.xlu1 %v3265_v49, %s2768_s29 }
 0x20e   : > { %v910_v49 = vpop.permute.xlu0 %909 }
 0x20f   : > { %v4227_v30 = vpop.permute.xlu1 %1879 }
 0x210   : > { %1127 = vrot.lane.b32.xlu1 %v5533_v4, %s2768_s29 }
 0x213   : > { %v4231_v6 = vpop.permute.xlu1 %568 }
 0x214   : > { %1387 = vperm.xlu1 %2684, %v4000_v8  }
 0x217   : > { %v4236_v63 = vpop.permute.xlu1 %570 }
 0x218   : > { %949 = vrot.lane.b32.xlu1 %v3512_v39, %s2763_s25  ;;  %v5549_v39 = vmov 7  }
 0x219   : > { %2685 = vset.pattern.permute.xlu1 %v2835_v38  ;;  %v990_v38 = vpop.permute.xlu0 %989 }
 0x21b   : > { %v4242_v48 = vpop.permute.xlu1 %677 }
 0x21c   : > { %1044 = vrot.lane.b32.xlu1 %v3416_v9, %s2765_s26 }
 0x21f   : > { %v4246_v4 = vpop.permute.xlu1 %772 }
 0x220   : > { %5547 = vst [vmem:[#allocation99_spill] sm:$0xff] %v4246_v4  ;;  %1079 = vperm.xlu1 %2685, %v3659_v13   ;;  %v5550_v13 = vld [vmem:[#allocation30_spill] sm:$0xff] }
 0x223   : > { %v4249_v45 = vpop.permute.xlu1 %855 }
 0x224   : > { %5548 = vst [vmem:[#allocation100_spill] sm:$0xff] %v4249_v45  ;;  %1141 = vrot.lane.b32.xlu1 %v4145_v2, %s2768_s29  ;;  %v5551_v45 = vld [vmem:[#allocation31_spill] sm:$0xff] }
 0x225   : > { %2689 = vset.pattern.permute.xlu1 %v5549_v39  ;;  %v517_v2 = vsel %vm502_vm1, %v5551_v45, %v5550_v13 }
 0x226   : > { %v522_v26 = vmul.f32 %v5555_v40, %v517_v2  ;;  %v5558_v2 = vld [vmem:[#allocation64_spill] sm:$0xff] }
 0x227   : > { %v908_v60 = vpop.permute.xlu1 %907 }
 0x228   : > { %v911_v41 = vsel %vm884_vm0, %v908_v60, %v910_v49  ;;  %v912_v9 = vsel %vm884_vm0, %v910_v49, %v908_v60  ;;  %963 = vrot.lane.b32.xlu1 %v5520_v0, %s2763_s25 }
 0x229   : > { %v917_v39 = vmul.f32 %v4031_v35, %v911_v41  ;;  %v918_v55 = vmul.f32 %v4031_v35, %v912_v9  ;;  %v503_v9 = vsel %vm502_vm1, %v5552_v44, %v5553_v58  ;;  %v516_v41 = vsel %vm502_vm1, %v5550_v13, %v5551_v45  ;;  %v1003_v35 = vpop.permute.xlu0 %1002  ;;  %v5561_v44 = vld [vmem:[#allocation68_spill] sm:$0xff] }
 0x22a   : > { %v1886_v32 = vrot.slane %v3744_v57, %v5561_v44  ;;  %v1890_v45 = vrot.slane %v3748_v42, %v5561_v44  ;;  %v523_v36 = vmul.f32 %v5555_v40, %v516_v41  ;;  %v5565_v40 = vld [vmem:[#allocation66_spill] sm:$0xff] }
 0x22b   : > { %v4271_v31 = vadd.f32 %v917_v39, %v905_v24  ;;  %v4273_v49 = vadd.f32 %v918_v55, %v906_v14  ;;  %v4275_v60 = vpop.permute.xlu1 %942  ;;  %v5556_v55 = vld [vmem:[#allocation11_spill] sm:$0xff] }
 0x22c   : > { %5554 = vst [vmem:[#allocation30_spill] sm:$0xff] %v4275_v60  ;;  %965 = vrot.lane.b32.xlu1 %v3787_v33, %s2763_s25  ;;  %v510_v14 = vmul.f32 %v5556_v55, %v504_v3  ;;  %v5557_v24 = vld [vmem:[#allocation63_spill] sm:$0xff]  ;;  %v5559_v60 = vld [vmem:[#allocation57_spill] sm:$0xff]  ;;  %v511_v3 = vmul.f32 %v5556_v55, %v503_v9  ;;  %v5564_v55 = vld [vmem:[#allocation74_spill] sm:$0xff]  ;;  %vm4336_vm2 = vcmp.eq.s32.totalorder %v1886_v32, 1  ;;  %vm4340_vm3 = vcmp.eq.s32.totalorder %v1890_v45, 1 }
 0x22d   : > { %v612_v39 = vsel %vm610_vm14, %v5558_v2, %v5557_v24  ;;  %v624_v58 = vsel %vm610_vm14, %v5560_v17, %v5559_v60  ;;  %v611_v4 = vsel %vm610_vm14, %v5557_v24, %v5558_v2  ;;  %v623_v44 = vsel %vm610_vm14, %v5559_v60, %v5560_v17  ;;  %v5566_v2 = vld [vmem:[#allocation76_spill] sm:$0xff]  ;;  %v5567_v17 = vld [vmem:[#allocation78_spill] sm:$0xff] }
 0x22e   : > { %v524_v37 = vadd.f32 %v522_v26, %v510_v14  ;;  %v617_v25 = vmul.f32 %v5562_v22, %v612_v39  ;;  %v629_v9 = vmul.f32 %v5563_v10, %v624_v58  ;;  %v530_v26 = vsel %vm502_vm1, %v5565_v40, %v5564_v55  ;;  %v4333_v39 = vpop.permute.xlu0 %1037  ;;  %v5580_v58 = vld [vmem:[#allocation92_spill] sm:$0xff] }
 0x22f   : > { %v992_v13 = vpop.permute.xlu1 %991  ;;  %v531_v41 = vsel %vm502_vm1, %v5564_v55, %v5565_v40  ;;  %v638_v60 = vsel %vm610_vm14, %v5567_v17, %v5566_v2  ;;  %5568 = vst [vmem:[#allocation31_spill] sm:$0xff] %v4333_v39  ;;  %v630_v5 = vmul.f32 %v5563_v10, %v623_v44  ;;  %v1921_v55 = vrot.slane %v3744_v57, %v5580_v58 }
 0x230   : > { %1060 = vrot.lane.b32.xlu1 %v3662_v23, %s2765_s26  ;;  %v994_v14 = vsel %vm993_vm5, %v990_v38, %v992_v13  ;;  %v995_v24 = vsel %vm993_vm5, %v992_v13, %v990_v38  ;;  %v1881_v38 = vsel %vm5573_vm4, %v4211_v7, %v4227_v30  ;;  %v1882_v13 = vsel %vm5574_vm10, %v4227_v30, %v4211_v7  ;;  %v5575_v7 = vld [vmem:[#allocation53_spill] sm:$0xff] }
 0x231   : > { %v1000_v39 = vmul.f32 %v3861_v43, %v994_v14  ;;  %v1001_v34 = vmul.f32 %v3861_v43, %v995_v24  ;;  %v536_v30 = vmul.f32 %v5575_v7, %v531_v41  ;;  %v1875_v43 = vsel %vm1874_vm6, %v4203_v12, %v4221_v47 }
 0x232   : > { %v537_v24 = vmul.f32 %v5575_v7, %v530_v26  ;;  %v631_v26 = vadd.f32 %v629_v9, %v617_v25  ;;  %v558_v57 = vsel %vm502_vm1, %v4123_v29, %v4153_v54  ;;  %vm4417_vm15 = vcmp.eq.s32.totalorder %v1921_v55, 1  ;;  %v5589_v55 = vld [vmem:[#allocation60_spill] sm:$0xff] }
 0x233   : > { %v1005_v40 = vpop.permute.xlu1 %1004 }
 0x234   : > { %v1006_v32 = vsel %vm993_vm5, %v1003_v35, %v1005_v40  ;;  %v1007_v45 = vsel %vm993_vm5, %v1005_v40, %v1003_v35  ;;  %1155 = vrot.lane.b32.xlu1 %v3541_v51, %s2768_s29  ;;  %v637_v35 = vsel %vm610_vm14, %v5566_v2, %v5567_v17  ;;  %v5576_v40 = vld [vmem:[#allocation87_spill] sm:$0xff] }
 0x235   : > { %v1012_v16 = vmul.f32 %v4084_v46, %v1006_v32  ;;  %v1013_v28 = vmul.f32 %v4084_v46, %v1007_v45  ;;  %v545_v14 = vsel %vm502_vm1, %v5577_v21, %v5576_v40  ;;  %v1876_v46 = vsel %vm1874_vm6, %v4221_v47, %v4203_v12  ;;  %v5578_v2 = vld [vmem:[#allocation55_spill] sm:$0xff] }
 0x236   : > { %v643_v17 = vmul.f32 %v5578_v2, %v638_v60  ;;  %v1893_v32 = vsel %vm4336_vm2, %v1875_v43, %v1882_v13  ;;  %v1894_v45 = vsel %vm4340_vm3, %v1876_v46, %v1881_v38  ;;  %v525_v12 = vadd.f32 %v523_v36, %v511_v3 }
 0x237   : > { %v4380_v10 = vadd.f32 %v1012_v16, %v1000_v39  ;;  %v4382_v44 = vadd.f32 %v1013_v28, %v1001_v34  ;;  %v4384_v41 = vpop.permute.xlu1 %1132  ;;  %v618_v16 = vmul.f32 %v5562_v22, %v611_v4  ;;  %v644_v34 = vmul.f32 %v5578_v2, %v637_v35  ;;  %v5579_v28 = vld [vmem:[#allocation51_spill] sm:$0xff]  ;;  %v1908_v39 = vpop.permute.xlu0 %1907 }
 0x238   : > { %1072 = vrot.lane.b32.xlu1 %v5520_v0, %s2765_s26  ;;  %v550_v47 = vmul.f32 %v5579_v28, %v545_v14  ;;  %v544_v60 = vsel %vm502_vm1, %v5576_v40, %v5577_v21  ;;  %v1925_v38 = vrot.slane %v3748_v42, %v5580_v58  ;;  %v538_v3 = vadd.f32 %v536_v30, %v524_v37  ;;  %v5585_v30 = vld [vmem:[#allocation97_spill] sm:$0xff] }
 0x239   : > { %v632_v36 = vadd.f32 %v630_v5, %v618_v16  ;;  %v1897_v22 = vrot.slane %v1893_v32, 4  ;;  %v1898_v4 = vrot.slane %v1894_v45, 4  ;;  %v539_v7 = vadd.f32 %v537_v24, %v525_v12  ;;  %v5588_v45 = vld [vmem:[#allocation70_spill] sm:$0xff] }
 0x23a   : > { %v645_v35 = vadd.f32 %v643_v17, %v631_v26  ;;  %v551_v9 = vmul.f32 %v5579_v28, %v544_v60  ;;  %v552_v21 = vadd.f32 %v550_v47, %v538_v3  ;;  %v559_v42 = vsel %vm502_vm1, %v4153_v54, %v4123_v29 }
 0x23b   : > { %v1906_v13 = vpop.permute.xlu1 %1905  ;;  %v646_v25 = vadd.f32 %v644_v34, %v632_v36  ;;  %vm4421_vm7 = vcmp.eq.s32.totalorder %v1925_v38, 1  ;;  %v651_v40 = vsel %vm610_vm14, %v5585_v30, %v3863_v15  ;;  %v652_v14 = vsel %vm610_vm14, %v3863_v15, %v5585_v30  ;;  %v1915_v43 = vpop.permute.xlu0 %1914 }
 0x23c   : > { %1074 = vrot.lane.b32.xlu1 %v3787_v33, %s2765_s26  ;;  %v1901_v29 = vmul.f32 %v1897_v22, %v4138_v59  ;;  %v1902_v54 = vmul.f32 %v1898_v4, %v4138_v59  ;;  %v1910_v24 = vsel %vm1909_vm9, %v1906_v13, %v1908_v39  ;;  %v1911_v2 = vsel %vm1909_vm9, %v1908_v39, %v1906_v13  ;;  %s359_s26 = scalar_lea.vmem %s5193_s10, %s2530_s15 }
 0x23d   : > { %v564_v12 = vmul.f32 %v5588_v45, %v559_v42  ;;  %v565_v15 = vmul.f32 %v5588_v45, %v558_v57  ;;  %v572_v28 = vsel %vm502_vm1, %v4231_v6, %v4236_v63  ;;  %v573_v47 = vsel %vm502_vm1, %v4236_v63, %v4231_v6  ;;  %v5590_v42 = vld [vmem:[#allocation90_spill] sm:$0xff] }
 0x23e   : > { %v553_v60 = vadd.f32 %v551_v9, %v539_v7  ;;  %v657_v38 = vmul.f32 %v5589_v55, %v652_v14  ;;  %v665_v36 = vsel %vm610_vm14, %v4161_v27, %v4168_v1  ;;  %v666_v3 = vsel %vm610_vm14, %v4168_v1, %v4161_v27 }
 0x23f   : > { %v1913_v46 = vpop.permute.xlu1 %1912  ;;  %v1903_v63 = vadd.f32 %v1901_v29, %v4149_v11  ;;  %v1904_v13 = vadd.f32 %v1902_v54, %v4151_v61  ;;  %v658_v7 = vmul.f32 %v5589_v55, %v651_v40  ;;  %v566_v9 = vadd.f32 %v564_v12, %v552_v21  ;;  %v583_v57 = vpop.permute.xlu0 %582 }
 0x240   : > { %v1916_v17 = vsel %vm5586_vm11, %v1913_v46, %v1915_v43  ;;  %v1917_v32 = vsel %vm5587_vm13, %v1915_v43, %v1913_v46  ;;  %1169 = vrot.lane.b32.xlu1 %v3662_v23, %s2768_s29  ;;  %v578_v5 = vmul.f32 %v5590_v42, %v573_v47  ;;  %v579_v27 = vmul.f32 %v5590_v42, %v572_v28  ;;  %v5591_v43 = vld [vmem:[#allocation72_spill] sm:$0xff]  ;;  %v4504_v47 = vld [vmem:[%s5184_s1 + $0x38] sm:$0x3f] }
 0x241   : > { %v1928_v16 = vsel %vm4417_vm15, %v1910_v24, %v1917_v32  ;;  %v1929_v34 = vsel %vm4421_vm7, %v1911_v2, %v1916_v17  ;;  %v567_v1 = vadd.f32 %v565_v15, %v553_v60  ;;  %v671_v46 = vmul.f32 %v5591_v43, %v666_v3  ;;  %v5592_v15 = vld [vmem:[#allocation93_spill] sm:$0xff]  ;;  %v4499_v28 = vld [vmem:[%s5184_s1 + $0x30] sm:$0x3f]  ;;  %v2738_v3 = vld [vmem:[%s5184_s1 + $0x20] sm:$0xff] }
 0x242   : > { %v1932_v39 = vrot.slane %v1928_v16, 4  ;;  %v1933_v26 = vrot.slane %v1929_v34, 4  ;;  %v672_v11 = vmul.f32 %v5591_v43, %v665_v36  ;;  %v679_v61 = vsel %vm610_vm14, %v4225_v20, %v4242_v48 }
 0x243   : > { %v1942_v22 = vpop.permute.xlu1 %1941  ;;  %v680_v21 = vsel %vm610_vm14, %v4242_v48, %v4225_v20  ;;  %v580_v17 = vadd.f32 %v578_v5, %v566_v9  ;;  %v581_v32 = vadd.f32 %v579_v27, %v567_v1  ;;  %v659_v20 = vadd.f32 %v657_v38, %v645_v35 }
 0x244   : > { %v1936_v4 = vmul.f32 %v1932_v39, %v4219_v18  ;;  %v1937_v6 = vmul.f32 %v1933_v26, %v4219_v18  ;;  %1183 = vrot.lane.b32.xlu1 %v3787_v33, %s2768_s29  ;;  %v1943_v14 = vrot.slane %v1942_v22, 4  ;;  %v660_v48 = vadd.f32 %v658_v7, %v646_v25  ;;  %v690_v39 = vpop.permute.xlu0 %689 }
 0x245   : > { %v685_v16 = vmul.f32 %v5592_v15, %v680_v21  ;;  %v686_v34 = vmul.f32 %v5592_v15, %v679_v61  ;;  %v673_v35 = vadd.f32 %v671_v46, %v659_v20  ;;  %v5593_v36 = vmov 5   ;;  %v5597_v61 = vld [vmem:[#allocation18_spill] sm:$0xff] }
 0x246   : > { %v1938_v37 = vadd.f32 %v1936_v4, %v1903_v63  ;;  %v1939_v30 = vadd.f32 %v1937_v6, %v1904_v13  ;;  %v674_v25 = vadd.f32 %v672_v11, %v660_v48  ;;  %v599_v22 = vrot.slane %v2738_v3, %v5580_v58  ;;  %v2739_v4 = vld [vmem:[%s5184_s1 + $0x28] sm:$0xff]  ;;  %v5594_v63 = vld [vmem:[#allocation5_spill] sm:$0xff]  ;;  %v5600_v48 = vld [vmem:[#allocation12_spill] sm:$0xff] }
 0x247   : > { %v585_v40 = vpop.permute.xlu1 %584  ;;  %v603_v6 = vrot.slane %v2739_v4, %v5580_v58  ;;  %v706_v13 = vrot.slane %v4499_v28, %v5594_v63  ;;  %v710_v7 = vrot.slane %v4504_v47, %v5594_v63  ;;  %v687_v9 = vadd.f32 %v685_v16, %v673_v35  ;;  %v5596_v11 = vld [vmem:[#allocation17_spill] sm:$0xff]  ;;  %v5605_v4 = vld [vmem:[#allocation15_spill] sm:$0xff]  ;;  %v5606_v63 = vld [vmem:[#allocation16_spill] sm:$0xff] }
 0x248   : > { %v4483_v29 = vadd.f32 %v1943_v14, %v1938_v37  ;;  %v4485_v54 = vadd.f32 %v1943_v14, %v1939_v30  ;;  %v586_v24 = vsel %vm502_vm1, %v583_v57, %v585_v40  ;;  %v587_v2 = vsel %vm502_vm1, %v585_v40, %v583_v57  ;;  %2107 = vperm.xlu1 %2689, %v4000_v8   ;;  %v4558_v20 = vpop.permute.xlu0 %784 }
 0x249   : > { %v592_v45 = vmul.f32 %v4136_v62, %v587_v2  ;;  %v593_v12 = vmul.f32 %v4136_v62, %v586_v24  ;;  %v688_v57 = vadd.f32 %v686_v34, %v674_v25  ;;  %v5595_v30 = vmov 3  }
 0x24a   : > { %v4534_v21 = vsel %vm884_vm0, %v5597_v61, %v5596_v11  ;;  %v5601_v34 = vmov 6   ;;  %vm719_vm6 = vcmp.lt.s32.totalorder %v3027_v19, 16 }
 0x24b   : > { %v594_v26 = vadd.f32 %v592_v45, %v580_v17  ;;  %v595_v60 = vadd.f32 %v593_v12, %v581_v32  ;;  %v692_v62 = vpop.permute.xlu1 %691  ;;  %v5598_v17 = vld [vmem:[#allocation19_spill] sm:$0xff]  ;;  %v5599_v32 = vld [vmem:[#allocation21_spill] sm:$0xff]  ;;  %v1233_v15 = vmul.f32 %v5600_v48, %v4534_v21 }
 0x24c   : > { %v693_v55 = vsel %vm610_vm14, %v690_v39, %v692_v62  ;;  %v694_v38 = vsel %vm610_vm14, %v692_v62, %v690_v39  ;;  %2690 = vset.pattern.permute.xlu1 %v5593_v36  ;;  %v4550_v45 = vsel %vm993_vm5, %v5599_v32, %v5598_v17  ;;  %v4556_v12 = vsel %vm993_vm5, %v5598_v17, %v5599_v32  ;;  %v5611_v32 = vld [vmem:[#allocation32_spill] sm:$0xff] }
 0x24d   : > { %2093 = vperm.xlu1 %2690, %v4000_v8   ;;  %v699_v42 = vmul.f32 %v4155_v52, %v694_v38  ;;  %v700_v5 = vmul.f32 %v4155_v52, %v693_v55  ;;  %v604_v58 = vmul.f32 %v599_v22, %v594_v26  ;;  %v605_v14 = vmul.f32 %v603_v6, %v595_v60  ;;  %v5602_v26 = vld [vmem:[#allocation14_spill] sm:$0xff]  ;;  %v5603_v55 = vld [vmem:[#allocation23_spill] sm:$0xff] }
 0x24e   : > { %v4540_v52 = vsel %vm884_vm0, %v5596_v11, %v5597_v61  ;;  %v1247_v60 = vmul.f32 %v5602_v26, %v4550_v45  ;;  %v1248_v62 = vmul.f32 %v5602_v26, %v4556_v12  ;;  %v5604_v38 = vld [vmem:[#allocation22_spill] sm:$0xff]  ;;  %v1235_v6 = vadd.f32 %v1233_v15, %v5605_v4 }
 0x24f   : > { %v4526_v27 = vpop.permute.xlu1 %786  ;;  %v701_v1 = vadd.f32 %v699_v42, %v687_v9  ;;  %v702_v37 = vadd.f32 %v700_v5, %v688_v57  ;;  %v1234_v16 = vmul.f32 %v5600_v48, %v4540_v52  ;;  %v4580_v36 = vsel %vm1102_vm12, %v5604_v38, %v5603_v55  ;;  %v5608_v42 = vld [vmem:[#allocation26_spill] sm:$0xff]  ;;  %v5609_v5 = vld [vmem:[#allocation24_spill] sm:$0xff] }
 0x250   : > { %v5612_v15 = vld [vmem:[#allocation46_spill] sm:$0xff] }
 0x251   : > { %2692 = vset.pattern.permute.xlu1 %v5595_v30  ;;  %v711_v43 = vmul.f32 %v706_v13, %v701_v1  ;;  %v712_v46 = vmul.f32 %v710_v7, %v702_v37  ;;  %v1236_v13 = vadd.f32 %v1234_v16, %v5606_v63  ;;  %v5607_v7 = vld [vmem:[#allocation49_spill] sm:$0xff]  ;;  %v4600_v1 = vsel %vm1269_vm8, %v5609_v5, %v5608_v42  ;;  %v4608_v37 = vpop.permute.xlu0 %863  ;;  %v5613_v16 = vld [vmem:[#allocation36_spill] sm:$0xff] }
 0x252   : > { %1991 = vperm.xlu1 %2692, %v4000_v8   ;;  %v1261_v9 = vmul.f32 %v5607_v7, %v4580_v36  ;;  %v1276_v11 = vmul.f32 %v3527_v53, %v4600_v1  ;;  %v5616_v63 = vld [vmem:[#allocation81_spill] sm:$0xff] }
 0x253   : > { %v922_v40 = vpop.permute.xlu1 %921  ;;  %v4542_v24 = vadd.f32 %v711_v43, %v604_v58  ;;  %v4544_v2 = vadd.f32 %v712_v46, %v605_v14  ;;  %v1249_v43 = vadd.f32 %v1247_v60, %v1235_v6  ;;  %v1250_v46 = vadd.f32 %v1248_v62, %v1236_v13  ;;  %v5617_v13 = vld [vmem:[#allocation80_spill] sm:$0xff] }
 0x256   : > { %2693 = vset.pattern.permute.xlu1 %v5601_v34  ;;  %v4644_v34 = vsel %vm610_vm14, %v5612_v15, %v5613_v16 }
 0x257   : > { %2099 = vperm.xlu1 %2693, %v4000_v8   ;;  %v924_v39 = vpop.permute.xlu1 %923  ;;  %v4586_v8 = vsel %vm1102_vm12, %v5603_v55, %v5604_v38  ;;  %v5614_v55 = vld [vmem:[#allocation82_spill] sm:$0xff] }
 0x258   : > { %v925_v35 = vsel %vm884_vm0, %v922_v40, %v924_v39  ;;  %v926_v25 = vsel %vm884_vm0, %v924_v39, %v922_v40  ;;  %v1262_v57 = vmul.f32 %v5607_v7, %v4586_v8  ;;  %v1263_v40 = vadd.f32 %v1261_v9, %v1249_v43  ;;  %v4646_v39 = vpop.permute.xlu0 %956  ;;  %v5620_v43 = vld [vmem:[#allocation37_spill] sm:$0xff] }
 0x259   : > { %v931_v3 = vmul.f32 %v4205_v50, %v925_v35  ;;  %v932_v22 = vmul.f32 %v4205_v50, %v926_v25  ;;  %v4606_v50 = vsel %vm1269_vm8, %v5608_v42, %v5609_v5  ;;  %v720_v7 = vsel %vm719_vm6, %v5617_v13, %v5616_v63  ;;  %v5619_v42 = vld [vmem:[#allocation75_spill] sm:$0xff] }
 0x25a   : > { %v1277_v61 = vmul.f32 %v3527_v53, %v4606_v50  ;;  %v1264_v17 = vadd.f32 %v1262_v57, %v1250_v46  ;;  %v4638_v53 = vsel %vm610_vm14, %v5613_v16, %v5612_v15  ;;  %v1278_v60 = vadd.f32 %v1276_v11, %v1263_v40  ;;  %v5618_v57 = vld [vmem:[#allocation83_spill] sm:$0xff] }
 0x25b   : > { %v4611_v30 = vadd.f32 %v931_v3, %v4271_v31  ;;  %v4614_v58 = vadd.f32 %v932_v22, %v4273_v49  ;;  %v1017_v14 = vpop.permute.xlu1 %1016  ;;  %2695 = vset.pattern.permute.xlu1 %v5460_v56  ;;  %v5610_v31 = vld [vmem:[#allocation35_spill] sm:$0xff]  ;;  %v5615_v22 = vld [vmem:[#allocation84_spill] sm:$0xff]  ;;  %v721_v9 = vsel %vm719_vm6, %v5616_v63, %v5617_v13  ;;  %v732_v5 = vsel %vm719_vm6, %v5619_v42, %v5618_v57 }
 0x25c   : > { %v4626_v49 = vsel %vm502_vm1, %v5611_v32, %v5610_v31  ;;  %v4632_v48 = vsel %vm502_vm1, %v5610_v31, %v5611_v32  ;;  %v1279_v62 = vadd.f32 %v1277_v61, %v1264_v17  ;;  %v1304_v46 = vmul.f32 %v5620_v43, %v4638_v53  ;;  %v5623_v31 = vld [vmem:[#allocation52_spill] sm:$0xff] }
 0x25d   : > { %v1290_v38 = vmul.f32 %v5614_v55, %v4626_v49  ;;  %v1291_v3 = vmul.f32 %v5614_v55, %v4632_v48  ;;  %v1305_v11 = vmul.f32 %v5620_v43, %v4644_v34  ;;  %v5624_v32 = vld [vmem:[#allocation44_spill] sm:$0xff]  ;;  %vm1947_vm1 = vcmask 1043456  }
 0x25e   : > { %v4688_v15 = vsel %vm719_vm6, %v5624_v32, %v5623_v31  ;;  %v4694_v16 = vsel %vm719_vm6, %v5623_v31, %v5624_v32  ;;  %vm2179_vm14 = vcmask 97280  }
 0x25f   : > { %v1019_v26 = vpop.permute.xlu1 %1018 }
 0x260   : > { %v1020_v35 = vsel %vm993_vm5, %v1017_v14, %v1019_v26  ;;  %v1021_v25 = vsel %vm993_vm5, %v1019_v26, %v1017_v14  ;;  %v733_v14 = vsel %vm719_vm6, %v5618_v57, %v5619_v42  ;;  %v1292_v26 = vadd.f32 %v1290_v38, %v1278_v60  ;;  %v5628_v57 = vld [vmem:[#allocation43_spill] sm:$0xff]  ;;  %v5629_v42 = vld [vmem:[#allocation98_spill] sm:$0xff] }
 0x261   : > { %v1026_v4 = vmul.f32 %v5615_v22, %v1020_v35  ;;  %v1027_v6 = vmul.f32 %v5615_v22, %v1021_v25  ;;  %v1293_v35 = vadd.f32 %v1291_v3, %v1279_v62  ;;  %v5626_v25 = vld [vmem:[#allocation47_spill] sm:$0xff]  ;;  %v5627_v22 = vld [vmem:[#allocation58_spill] sm:$0xff]  ;;  %v746_v43 = vsel %vm719_vm6, %v5629_v42, %v5628_v57 }
 0x262   : > { %v727_v55 = vmul.f32 %v5626_v25, %v720_v7  ;;  %v1306_v63 = vadd.f32 %v1304_v46, %v1292_v26  ;;  %v747_v60 = vsel %vm719_vm6, %v5628_v57, %v5629_v42  ;;  %v5630_v38 = vld [vmem:[#allocation62_spill] sm:$0xff]  ;;  %v5631_v3 = vld [vmem:[#allocation91_spill] sm:$0xff]  ;;  %v5632_v46 = vld [vmem:[#allocation25_spill] sm:$0xff] }
 0x263   : > { %v4679_v61 = vadd.f32 %v1026_v4, %v4380_v10  ;;  %v4682_v40 = vadd.f32 %v1027_v6, %v4382_v44  ;;  %v1099_v17 = vpop.permute.xlu1 %1098  ;;  %v4696_v10 = vpop.permute.xlu0 %1051  ;;  %v726_v44 = vmul.f32 %v5626_v25, %v721_v9  ;;  %v738_v4 = vmul.f32 %v5627_v22, %v733_v14 }
 0x264   : > { %5625 = vst [vmem:[#allocation13_spill] sm:$0xff] %v4696_v10  ;;  %v739_v6 = vmul.f32 %v5627_v22, %v732_v5  ;;  %v1307_v13 = vadd.f32 %v1305_v11, %v1293_v35  ;;  %v760_v7 = vsel %vm719_vm6, %v5631_v3, %v5630_v38  ;;  %v761_v9 = vsel %vm719_vm6, %v5630_v38, %v5631_v3  ;;  %v5633_v35 = vld [vmem:[#allocation67_spill] sm:$0xff]  ;;  %v5634_v38 = vld [vmem:[#allocation77_spill] sm:$0xff] }
 0x265   : > { %5621 = vst [vmem:[#allocation29_spill] sm:$0xff] %v4679_v61  ;;  %5622 = vst [vmem:[#allocation28_spill] sm:$0xff] %v4682_v40  ;;  %v1318_v11 = vmul.f32 %v5632_v46, %v4688_v15  ;;  %v1319_v31 = vmul.f32 %v5632_v46, %v4694_v16  ;;  %v740_v32 = vadd.f32 %v738_v4, %v726_v44  ;;  %v5636_v61 = vld [vmem:[#allocation79_spill] sm:$0xff] }
 0x266   : > { %v741_v26 = vadd.f32 %v739_v6, %v727_v55  ;;  %v752_v25 = vmul.f32 %v5633_v35, %v747_v60  ;;  %v753_v22 = vmul.f32 %v5633_v35, %v746_v43  ;;  %v766_v3 = vmul.f32 %v5634_v38, %v761_v9  ;;  %v5637_v6 = vld [vmem:[#allocation89_spill] sm:$0xff]  ;;  %v5638_v43 = vld [vmem:[#allocation71_spill] sm:$0xff] }
 0x267   : > { %v1101_v62 = vpop.permute.xlu1 %1100  ;;  %v1320_v57 = vadd.f32 %v1318_v11, %v1306_v63  ;;  %v1321_v42 = vadd.f32 %v1319_v31, %v1307_v13  ;;  %v767_v56 = vmul.f32 %v5634_v38, %v760_v7  ;;  %v1112_v40 = vpop.permute.xlu0 %1111  ;;  %v5639_v11 = vld [vmem:[#allocation96_spill] sm:$0xff]  ;;  %v5642_v38 = vld [vmem:[#allocation3_spill] sm:$0xff] }
 0x268   : > { %v1103_v5 = vsel %vm1102_vm12, %v1099_v17, %v1101_v62  ;;  %v1104_v14 = vsel %vm1102_vm12, %v1101_v62, %v1099_v17  ;;  %v5635_v62 = vld [vmem:[#allocation99_spill] sm:$0xff]  ;;  %v754_v9 = vadd.f32 %v752_v25, %v740_v32  ;;  %v755_v46 = vadd.f32 %v753_v22, %v741_v26  ;;  %v5640_v26 = vld [vmem:[#allocation4_spill] sm:$0xff]  ;;  %v5641_v25 = vld [vmem:[#allocation33_spill] sm:$0xff] }
 0x269   : > { %v774_v10 = vsel %vm719_vm6, %v5636_v61, %v5635_v62  ;;  %v775_v44 = vsel %vm719_vm6, %v5635_v62, %v5636_v61  ;;  %v1109_v63 = vmul.f32 %v5637_v6, %v1103_v5  ;;  %v1110_v13 = vmul.f32 %v5637_v6, %v1104_v14 }
 0x26a   : > { %v788_v61 = vsel %vm719_vm6, %v4558_v20, %v4526_v27  ;;  %v780_v5 = vmul.f32 %v5639_v11, %v775_v44  ;;  %v781_v14 = vmul.f32 %v5639_v11, %v774_v10  ;;  %v1326_v22 = vmul.f32 %v5641_v25, %v5640_v26 }
 0x26b   : > { %v1114_v17 = vpop.permute.xlu1 %1113  ;;  %v768_v62 = vadd.f32 %v766_v3, %v754_v9  ;;  %v4766_v10 = vpop.permute.xlu0 %1146 }
 0x26c   : > { %v1115_v55 = vsel %vm1102_vm12, %v1112_v40, %v1114_v17  ;;  %v1116_v4 = vsel %vm1102_vm12, %v1114_v17, %v1112_v40  ;;  %v789_v40 = vsel %vm719_vm6, %v4526_v27, %v4558_v20  ;;  %v1327_v17 = vmul.f32 %v5641_v25, %v5642_v38 }
 0x26d   : > { %v1121_v60 = vmul.f32 %v5638_v43, %v1115_v55  ;;  %v1122_v7 = vmul.f32 %v5638_v43, %v1116_v4  ;;  %v769_v55 = vadd.f32 %v767_v56, %v755_v46  ;;  %v5643_v4 = vld [vmem:[#allocation39_spill] sm:$0xff]  ;;  %v1328_v20 = vadd.f32 %v1326_v22, %v1320_v57 }
 0x26e   : > { %v794_v6 = vmul.f32 %v5643_v4, %v789_v40  ;;  %v795_v27 = vmul.f32 %v5643_v4, %v788_v61  ;;  %v1329_v44 = vadd.f32 %v1327_v17, %v1321_v42  ;;  %v5645_v42 = vld [vmem:[#allocation88_spill] sm:$0xff]  ;;  %v5646_v40 = vld [vmem:[#allocation38_spill] sm:$0xff] }
 0x26f   : > { %v4756_v31 = vadd.f32 %v1121_v60, %v1109_v63  ;;  %v4758_v35 = vadd.f32 %v1122_v7, %v1110_v13  ;;  %v799_v32 = vpop.permute.xlu1 %798  ;;  %v782_v63 = vadd.f32 %v780_v5, %v768_v62  ;;  %v783_v13 = vadd.f32 %v781_v14, %v769_v55  ;;  %v5644_v60 = vld [vmem:[#allocation6_spill] sm:$0xff]  ;;  %v4782_v62 = vpop.permute.xlu0 %871 }
 0x270   : > { %v815_v7 = vrot.slane %v4499_v28, %v5644_v60  ;;  %v819_v11 = vrot.slane %v4504_v47, %v5644_v60  ;;  %v1334_v5 = vmul.f32 %v5646_v40, %v4540_v52  ;;  %v1335_v14 = vmul.f32 %v5646_v40, %v4534_v21  ;;  %v5647_v4 = vld [vmem:[#allocation54_spill] sm:$0xff] }
 0x271   : > { %v796_v9 = vadd.f32 %v794_v6, %v782_v63  ;;  %v797_v57 = vadd.f32 %v795_v27, %v783_v13  ;;  %v1342_v6 = vmul.f32 %v5647_v4, %v4556_v12  ;;  %v1343_v27 = vmul.f32 %v5647_v4, %v4550_v45  ;;  %v5648_v12 = vld [vmem:[#allocation30_spill] sm:$0xff] }
 0x272   : > { %v1336_v38 = vadd.f32 %v1334_v5, %v1328_v20  ;;  %v1337_v17 = vadd.f32 %v1335_v14, %v1329_v44 }
 0x273   : > { %v801_v43 = vpop.permute.xlu1 %800  ;;  %v4798_v60 = vpop.permute.xlu0 %970 }
 0x274   : > { %v802_v56 = vsel %vm719_vm6, %v799_v32, %v801_v43  ;;  %v803_v3 = vsel %vm719_vm6, %v801_v43, %v799_v32  ;;  %v1344_v13 = vadd.f32 %v1342_v6, %v1336_v38  ;;  %v1345_v43 = vadd.f32 %v1343_v27, %v1337_v17 }
 0x275   : > { %v808_v46 = vmul.f32 %v5645_v42, %v803_v3  ;;  %v809_v61 = vmul.f32 %v5645_v42, %v802_v56 }
 0x277   : > { %v810_v26 = vadd.f32 %v808_v46, %v796_v9  ;;  %v811_v25 = vadd.f32 %v809_v61, %v797_v57  ;;  %v936_v22 = vpop.permute.xlu1 %935  ;;  %v5650_v46 = vld [vmem:[#allocation73_spill] sm:$0xff] }
 0x278   : > { %v1358_v61 = vmul.f32 %v5650_v46, %v4606_v50  ;;  %v1359_v40 = vmul.f32 %v5650_v46, %v4600_v1  ;;  %v1374_v50 = vmul.f32 %v4138_v59, %v4644_v34  ;;  %v1375_v1 = vmul.f32 %v4138_v59, %v4638_v53 }
 0x279   : > { %v820_v32 = vmul.f32 %v815_v7, %v810_v26  ;;  %v821_v55 = vmul.f32 %v819_v11, %v811_v25  ;;  %v2018_v25 = vrot.slane %v4483_v29, 4  ;;  %v1382_v34 = vmul.f32 %v4219_v18, %v4694_v16 }
 0x27a   : > { %v1383_v59 = vmul.f32 %v4219_v18, %v4688_v15 }
 0x27b   : > { %v4789_v52 = vadd.f32 %v820_v32, %v4542_v24  ;;  %v4792_v21 = vadd.f32 %v821_v55, %v4544_v2  ;;  %v938_v63 = vpop.permute.xlu1 %937  ;;  %v5649_v24 = vld [vmem:[#allocation61_spill] sm:$0xff] }
 0x27c   : > { %v939_v20 = vsel %vm884_vm0, %v936_v22, %v938_v63  ;;  %v940_v44 = vsel %vm884_vm0, %v938_v63, %v936_v22  ;;  %v1350_v11 = vmul.f32 %v5649_v24, %v4586_v8  ;;  %v1351_v2 = vmul.f32 %v5649_v24, %v4580_v36  ;;  %v4818_v8 = vpop.permute.xlu0 %1065  ;;  %v5651_v36 = vld [vmem:[#allocation94_spill] sm:$0xff] }
 0x27d   : > { %v945_v7 = vmul.f32 %v5648_v12, %v939_v20  ;;  %v946_v45 = vmul.f32 %v5648_v12, %v940_v44  ;;  %v2019_v22 = vrot.slane %v4485_v54, 4 }
 0x27e   : > { %v1352_v57 = vadd.f32 %v1350_v11, %v1344_v13  ;;  %v1353_v42 = vadd.f32 %v1351_v2, %v1345_v43 }
 0x27f   : > { %v4807_v56 = vadd.f32 %v945_v7, %v4611_v30  ;;  %v4810_v3 = vadd.f32 %v946_v45, %v4614_v58  ;;  %v4812_v9 = vpop.permute.xlu1 %1030  ;;  %v1366_v30 = vmul.f32 %v5651_v36, %v4632_v48  ;;  %v1367_v58 = vmul.f32 %v5651_v36, %v4626_v49 }
 0x280   : > { %v1360_v14 = vadd.f32 %v1358_v61, %v1352_v57  ;;  %v1361_v26 = vadd.f32 %v1359_v40, %v1353_v42  ;;  %v4834_v32 = vpop.permute.xlu0 %1160  ;;  %v2022_v49 = vsel %vm1947_vm1, %v2018_v25, 0.0  ;;  %v2029_v55 = vsel %vm1947_vm1, %v2019_v22, 0.0  ;;  %v5654_v22 = vld [vmem:[#allocation10_spill] sm:$0xff] }
 0x281   : > { %v2023_v53 = vrot.slane %v2022_v49, 4  ;;  %v2030_v63 = vrot.slane %v2029_v55, 4 }
 0x282   : > { %v1368_v17 = vadd.f32 %v1366_v30, %v1360_v14  ;;  %v1369_v48 = vadd.f32 %v1367_v58, %v1361_v26  ;;  %v5652_v14 = vld [vmem:[#allocation9_spill] sm:$0xff]  ;;  %v5653_v26 = vld [vmem:[#allocation86_spill] sm:$0xff] }
 0x283   : > { %v4820_v5 = vpop.permute.xlu1 %1032  ;;  %v2024_v45 = vadd.f32 %v2023_v53, %v2022_v49  ;;  %v2031_v24 = vadd.f32 %v2030_v63, %v2029_v55  ;;  %v834_v25 = vmul.f32 %v5653_v26, %v5652_v14  ;;  %v5655_v55 = vld [vmem:[#allocation7_spill] sm:$0xff]  ;;  %v5658_v53 = vld [vmem:[#allocation20_spill] sm:$0xff]  ;;  %v5659_v63 = vld [vmem:[#allocation34_spill] sm:$0xff] }
 0x284   : > { %v1376_v4 = vadd.f32 %v1374_v50, %v1368_v17  ;;  %v1377_v6 = vadd.f32 %v1375_v1, %v1369_v48  ;;  %v4844_v13 = vpop.permute.xlu0 %951  ;;  %v835_v50 = vmul.f32 %v5653_v26, %v5654_v22  ;;  %v383_v26 = vld [vmem:[%s5189_s6 + $0x28] sm:$0xff] }
 0x285   : > { %v2025_v42 = vrot.slane %v2024_v45, 2  ;;  %v2032_v46 = vrot.slane %v2031_v24, 2 }
 0x286   : > { %v1384_v20 = vadd.f32 %v1382_v34, %v1376_v4  ;;  %v1385_v44 = vadd.f32 %v1383_v59, %v1377_v6  ;;  %v5656_v4 = vld [vmem:[#allocation85_spill] sm:$0xff]  ;;  %v5657_v34 = vld [vmem:[#allocation8_spill] sm:$0xff] }
 0x287   : > { %v4832_v38 = vpop.permute.xlu1 %1125  ;;  %v2026_v1 = vadd.f32 %v2025_v42, %v2024_v45  ;;  %v2033_v17 = vadd.f32 %v2032_v46, %v2031_v24  ;;  %v828_v6 = vmul.f32 %v5656_v4, %v5655_v55  ;;  %v829_v59 = vmul.f32 %v5656_v4, %v5657_v34  ;;  %v382_v45 = vld [vmem:[%s5189_s6 + $0x20] sm:$0xff]  ;;  %v5664_v34 = vld [vmem:[#allocation100_spill] sm:$0xff] }
 0x288   : > { %v4854_v57 = vpop.permute.xlu0 %1046  ;;  %2156 = vperm.xlu1 %2695, %v382_v45  }
 0x289   : > { %v836_v42 = vadd.f32 %v834_v25, %v828_v6  ;;  %v837_v46 = vadd.f32 %v835_v50, %v829_v59  ;;  %v2027_v22 = vrot.slane %v2026_v1, 1  ;;  %v2034_v55 = vrot.slane %v2033_v17, 1  ;;  %v379_v25 = vld [vmem:[%s5189_s6 + $0x8] sm:$0xff]  ;;  %v5663_v6 = vld [vmem:[#allocation45_spill] sm:$0xff] }
 0x28a   : > { %v858_v59 = vmul.f32 %v5664_v34, %v5663_v6 }
 0x28b   : > { %v4838_v27 = vpop.permute.xlu1 %1127 }
 0x28c   : > { %v4873_v24 = vpop.permute.xlu0 %1139  ;;  %2161 = vperm.xlu1 %2695, %v383_v26   ;;  %v867_v26 = vmul.f32 %v4608_v37, %v3662_v23 }
 0x28f   : > { %v1388_v43 = vpop.permute.xlu1 %1387 }
 0x290   : > { %v4846_v12 = vadd.f32 %v1388_v43, %v1384_v20  ;;  %v4848_v7 = vadd.f32 %v1388_v43, %v1385_v44  ;;  %v842_v20 = vmul.f32 %v5659_v63, %v5658_v53  ;;  %v5660_v44 = vld [vmem:[#allocation27_spill] sm:$0xff]  ;;  %v859_v53 = vmul.f32 %v5664_v34, %v3541_v51  ;;  %v5666_v34 = vld [vmem:[#allocation41_spill] sm:$0xff] }
 0x291   : > { %v843_v43 = vmul.f32 %v5659_v63, %v5660_v44  ;;  %v385_v51 = vld [vmem:[%s5190_s7 + $0x8] sm:$0xf] }
 0x292   : > { %v2002_v11 = vsel %vm1947_vm1, %v4846_v12, 0.0  ;;  %v2009_v16 = vsel %vm1947_vm1, %v4848_v7, 0.0  ;;  %v844_v50 = vadd.f32 %v842_v20, %v836_v42  ;;  %v4902_v20 = vpop.permute.xlu0 %1174  ;;  %v2035_v42 = vadd.f32 %v2034_v55, %v2033_v17 }
 0x293   : > { %v2003_v18 = vrot.slane %v2002_v11, 4  ;;  %v2010_v15 = vrot.slane %v2009_v16, 4  ;;  %v950_v2 = vpop.permute.xlu1 %949  ;;  %v845_v4 = vadd.f32 %v843_v43, %v837_v46  ;;  %v2028_v43 = vadd.f32 %v2027_v22, %v2026_v1  ;;  %v5665_v1 = vld [vmem:[#allocation59_spill] sm:$0xff]  ;;  %v378_v22 = vld [vmem:[%s5189_s6] sm:$0xff] }
 0x294   : > { %v866_v17 = vmul.f32 %v4608_v37, %v5665_v1 }
 0x295   : > { %v2004_v61 = vadd.f32 %v2003_v18, %v2002_v11  ;;  %v2011_v40 = vadd.f32 %v2010_v15, %v2009_v16  ;;  %v380_v15 = vld [vmem:[%s5189_s6 + $0x10] sm:$0xff] }
 0x296   : > { %2146 = vperm.xlu0 %2696, %v380_v15  }
 0x297   : > { %v2005_v36 = vrot.slane %v2004_v61, 2  ;;  %v2012_v30 = vrot.slane %v2011_v40, 2  ;;  %v4856_v58 = vpop.permute.xlu1 %1044 }
 0x299   : > { %v2006_v48 = vadd.f32 %v2005_v36, %v2004_v61  ;;  %v2013_v49 = vadd.f32 %v2012_v30, %v2011_v40  ;;  %v4881_v61 = vld [vmem:[%s2911_s18 + $0x10] sm:$0xf]  ;;  %v5661_v40 = vld [vmem:[#allocation69_spill] sm:$0xff]  ;;  %v5662_v30 = vld [vmem:[#allocation42_spill] sm:$0xff] }
 0x29a   : > { %v850_v36 = vmul.f32 %v4881_v61, %v5661_v40  ;;  %v851_v14 = vmul.f32 %v5662_v30, %v5661_v40  ;;  %v381_v30 = vld [vmem:[%s5189_s6 + $0x18] sm:$0xff]  ;;  %2141 = vperm.xlu0 %2696, %v379_v25  }
 0x29b   : > { %v2007_v11 = vrot.slane %v2006_v48, 1  ;;  %v2014_v16 = vrot.slane %v2013_v49, 1  ;;  %v4875_v18 = vpop.permute.xlu1 %1079  ;;  %2151 = vperm.xlu1 %2695, %v381_v30   ;;  %v874_v30 = vmul.f32 %v4782_v62, %v5520_v0 }
 0x29c   : > { %v852_v15 = vadd.f32 %v850_v36, %v844_v50  ;;  %v853_v40 = vadd.f32 %v851_v14, %v845_v4  ;;  %v875_v50 = vmul.f32 %v4782_v62, %v3787_v33  ;;  %v1059_v4 = vpop.permute.xlu0 %1058  ;;  %v384_v33 = vld [vmem:[%s5190_s7] sm:$0xff]  ;;  %v5667_v62 = vmov 1  }
 0x29d   : > { %v2008_v63 = vadd.f32 %v2007_v11, %v2006_v48  ;;  %v2015_v44 = vadd.f32 %v2014_v16, %v2013_v49  ;;  %v953_v11 = vsel %vm884_vm0, %v950_v2, %v4844_v13  ;;  %v954_v16 = vsel %vm884_vm0, %v4844_v13, %v950_v2 }
 0x29e   : > { %v860_v48 = vadd.f32 %v858_v59, %v852_v15  ;;  %v861_v49 = vadd.f32 %v859_v53, %v853_v40  ;;  %2380 = vperm.xlu0 %2696, %v385_v51   ;;  %v959_v55 = vmul.f32 %v4646_v39, %v953_v11  ;;  %v960_v25 = vmul.f32 %v4646_v39, %v954_v16 }
 0x29f   : > { %v4897_v45 = vpop.permute.xlu1 %1141  ;;  %v2036_v46 = vadd.f32 %v2028_v43, %v2008_v63  ;;  %v2037_v36 = vadd.f32 %v2035_v42, %v2015_v44  ;;  %2136 = vperm.xlu1 %2695, %v378_v22   ;;  %v980_v59 = vrot.slane %v4499_v28, %v5666_v34  ;;  %v984_v53 = vrot.slane %v4504_v47, %v5666_v34 }
 0x2a0   : > { %v868_v13 = vadd.f32 %v866_v17, %v860_v48  ;;  %v869_v2 = vadd.f32 %v867_v26, %v861_v49  ;;  %v961_v63 = vadd.f32 %v959_v55, %v4807_v56  ;;  %v962_v44 = vadd.f32 %v960_v25, %v4810_v3  ;;  %v5668_v26 = vld [vmem:[#allocation31_spill] sm:$0xff]  ;;  %v5669_v25 = vld [vmem:[#allocation13_spill] sm:$0xff] }
 0x2a1   : > { %v2038_v6 = vmul.f32 0.125, %v2036_v46  ;;  %v2039_v23 = vmul.f32 0.125, %v2037_v36  ;;  %v1034_v56 = vsel %vm993_vm5, %v4812_v9, %v4820_v5  ;;  %v1130_v36 = vsel %vm1102_vm12, %v4838_v27, %v4832_v38 }
 0x2a2   : > { %2698 = vset.pattern.permute.xlu0 %v5667_v62  ;;  %v876_v43 = vadd.f32 %v874_v30, %v868_v13  ;;  %v877_v42 = vadd.f32 %v875_v50, %v869_v2  ;;  %v1040_v22 = vmul.f32 %v5668_v26, %v1034_v56  ;;  %v1143_v30 = vsel %vm1102_vm12, %v4873_v24, %v4897_v45 }
 0x2a3   : > { %v964_v14 = vpop.permute.xlu1 %963  ;;  %2440 = vperm.xlu0 %2698, %v385_v51   ;;  %v4943_v16 = vsub.f32 %v4483_v29, %v2038_v6  ;;  %v4946_v46 = vsub.f32 %v4485_v54, %v2039_v23  ;;  %2375 = vperm.xlu1 %2695, %v384_v33   ;;  %v1154_v29 = vpop.permute.xlu0 %1153  ;;  %v1129_v54 = vsel %vm1102_vm12, %v4832_v38, %v4838_v27 }
 0x2a4   : > { %v878_v3 = vadd.f32 %v876_v43, %v4789_v52  ;;  %v879_v51 = vadd.f32 %v877_v42, %v4792_v21  ;;  %v4967_v17 = vsub.f32 %v4846_v12, %v2038_v6  ;;  %v4970_v52 = vsub.f32 %v4848_v7, %v2039_v23 }
 0x2a5   : > { %v1048_v21 = vsel %vm993_vm5, %v4856_v58, %v4854_v57  ;;  %v2060_v38 = vmul.f32 %v4943_v16, %v4943_v16  ;;  %v2061_v27 = vmul.f32 %v4946_v46, %v4946_v46  ;;  %v1144_v50 = vsel %vm1102_vm12, %v4897_v45, %v4873_v24  ;;  %v5671_v24 = vld [vmem:[#allocation28_spill] sm:$0xff] }
 0x2a6   : > { %v1054_v13 = vmul.f32 %v5669_v25, %v1048_v21  ;;  %v2045_v34 = vmul.f32 %v4970_v52, %v4970_v52 }
 0x2a7   : > { %v966_v37 = vpop.permute.xlu1 %965  ;;  %2697 = vset.pattern.permute.xlu1 %v5667_v62  ;;  %v5007_v23 = vpop.permute.xlu0 %1188  ;;  %v5672_v62 = vld [vmem:[#allocation40_spill] sm:$0xff] }
 0x2a8   : > { %v967_v39 = vsel %vm884_vm0, %v964_v14, %v966_v37  ;;  %v968_v0 = vsel %vm884_vm0, %v966_v37, %v964_v14  ;;  %2436 = vperm.xlu1 %2697, %v384_v33   ;;  %v2044_v37 = vmul.f32 %v4967_v17, %v4967_v17  ;;  %vm2189_vm0 = vcmask 1045504  }
 0x2a9   : > { %v973_v15 = vmul.f32 %v4798_v60, %v967_v39  ;;  %v974_v40 = vmul.f32 %v4798_v60, %v968_v0  ;;  %v1035_v60 = vsel %vm993_vm5, %v4820_v5, %v4812_v9  ;;  %v1049_v9 = vsel %vm993_vm5, %v4854_v57, %v4856_v58  ;;  %v5670_v0 = vld [vmem:[#allocation29_spill] sm:$0xff] }
 0x2aa   : > { %v1041_v55 = vmul.f32 %v5668_v26, %v1035_v60  ;;  %v1135_v57 = vmul.f32 %v4384_v41, %v1129_v54  ;;  %v1136_v58 = vmul.f32 %v4384_v41, %v1130_v36  ;;  %v1055_v2 = vmul.f32 %v5669_v25, %v1049_v9 }
 0x2ab   : > { %v975_v48 = vadd.f32 %v973_v15, %v961_v63  ;;  %v976_v49 = vadd.f32 %v974_v40, %v962_v44  ;;  %v1061_v11 = vpop.permute.xlu1 %1060  ;;  %v2065_v39 = vrot.slane %v2061_v27, 4  ;;  %v1042_v33 = vadd.f32 %v1040_v22, %v5670_v0  ;;  %v1168_v36 = vpop.permute.xlu0 %1167 }
 0x2ac   : > { %v1062_v6 = vsel %vm993_vm5, %v1059_v4, %v1061_v11  ;;  %v1063_v41 = vsel %vm993_vm5, %v1061_v11, %v1059_v4  ;;  %v1043_v45 = vadd.f32 %v1041_v55, %v5671_v24  ;;  %v1089_v63 = vrot.slane %v4499_v28, %v5672_v62 }
 0x2ad   : > { %v985_v14 = vmul.f32 %v980_v59, %v975_v48  ;;  %v986_v1 = vmul.f32 %v984_v53, %v976_v49  ;;  %v2064_v53 = vrot.slane %v2060_v38, 4  ;;  %v1093_v4 = vrot.slane %v4504_v47, %v5672_v62 }
 0x2ae   : > { %v1137_v44 = vadd.f32 %v1135_v57, %v4756_v31  ;;  %v1138_v15 = vadd.f32 %v1136_v58, %v4758_v35  ;;  %v1068_v40 = vmul.f32 %v4818_v8, %v1062_v6  ;;  %v1069_v43 = vmul.f32 %v4818_v8, %v1063_v41 }
 0x2af   : > { %v1156_v5 = vpop.permute.xlu1 %1155  ;;  %v4984_v12 = vadd.f32 %v985_v14, %v878_v3  ;;  %v4986_v7 = vadd.f32 %v986_v1, %v879_v51  ;;  %v1056_v42 = vadd.f32 %v1054_v13, %v1042_v33  ;;  %v1057_v48 = vadd.f32 %v1055_v2, %v1043_v45 }
 0x2b0   : > { %v1149_v49 = vmul.f32 %v4766_v10, %v1143_v30  ;;  %v1150_v11 = vmul.f32 %v4766_v10, %v1144_v50  ;;  %v2046_v56 = vsel %vm1947_vm1, %v2044_v37, 0.0  ;;  %v2053_v60 = vsel %vm1947_vm1, %v2045_v34, 0.0 }
 0x2b1   : > { %v2068_v51 = vsel %vm1947_vm1, %v2064_v53, 0.0  ;;  %v2075_v31 = vsel %vm1947_vm1, %v2065_v39, 0.0  ;;  %v1157_v35 = vsel %vm1102_vm12, %v1154_v29, %v1156_v5  ;;  %v1158_v8 = vsel %vm1102_vm12, %v1156_v5, %v1154_v29  ;;  %v1182_v39 = vpop.permute.xlu0 %1181 }
 0x2b2   : > { %v1070_v14 = vadd.f32 %v1068_v40, %v1056_v42  ;;  %v1071_v1 = vadd.f32 %v1069_v43, %v1057_v48  ;;  %v1151_v38 = vadd.f32 %v1149_v49, %v1137_v44  ;;  %v1152_v27 = vadd.f32 %v1150_v11, %v1138_v15 }
 0x2b3   : > { %v1073_v59 = vpop.permute.xlu1 %1072  ;;  %v2069_v26 = vrot.slane %v2068_v51, 4  ;;  %v2076_v22 = vrot.slane %v2075_v31, 4  ;;  %v1163_v55 = vmul.f32 %v4834_v32, %v1157_v35  ;;  %v1164_v29 = vmul.f32 %v4834_v32, %v1158_v8  ;;  %v5673_v32 = vld [vmem:[#allocation56_spill] sm:$0xff] }
 0x2b4   : > { %v2047_v25 = vrot.slane %v2046_v56, 4  ;;  %v2054_v13 = vrot.slane %v2053_v60, 4  ;;  %v1202_v53 = vrot.slane %v4504_v47, %v5673_v32 }
 0x2b5   : > { %v2070_v37 = vadd.f32 %v2069_v26, %v2068_v51  ;;  %v2077_v34 = vadd.f32 %v2076_v22, %v2075_v31  ;;  %v1165_v0 = vadd.f32 %v1163_v55, %v1151_v38  ;;  %v1166_v33 = vadd.f32 %v1164_v29, %v1152_v27 }
 0x2b7   : > { %v1075_v3 = vpop.permute.xlu1 %1074  ;;  %v2071_v43 = vrot.slane %v2070_v37, 2 }
 0x2b8   : > { %v1076_v54 = vsel %vm993_vm5, %v1073_v59, %v1075_v3  ;;  %v1077_v10 = vsel %vm993_vm5, %v1075_v3, %v1073_v59  ;;  %v1198_v59 = vrot.slane %v4499_v28, %v5673_v32  ;;  %v1210_v3 = vpop.permute.xlu0 %1209  ;;  %vm2388_vm5 = vcmask 392192  }
 0x2b9   : > { %v1082_v21 = vmul.f32 %v4875_v18, %v1076_v54  ;;  %v1083_v9 = vmul.f32 %v4875_v18, %v1077_v10 }
 0x2bb   : > { %v1084_v5 = vadd.f32 %v1082_v21, %v1070_v14  ;;  %v1085_v57 = vadd.f32 %v1083_v9, %v1071_v1  ;;  %v1170_v58 = vpop.permute.xlu1 %1169 }
 0x2bc   : > { %v1171_v2 = vsel %vm1102_vm12, %v1168_v36, %v1170_v58  ;;  %v1172_v30 = vsel %vm1102_vm12, %v1170_v58, %v1168_v36 }
 0x2bd   : > { %v1094_v18 = vmul.f32 %v1089_v63, %v1084_v5  ;;  %v1095_v50 = vmul.f32 %v1093_v4, %v1085_v57  ;;  %v1177_v6 = vmul.f32 %v4902_v20, %v1171_v2  ;;  %v1178_v41 = vmul.f32 %v4902_v20, %v1172_v30 }
 0x2be   : > { %v2048_v63 = vadd.f32 %v2047_v25, %v2046_v56  ;;  %v2055_v4 = vadd.f32 %v2054_v13, %v2053_v60  ;;  %v2072_v60 = vadd.f32 %v2071_v43, %v2070_v37 }
 0x2bf   : > { %v1184_v24 = vpop.permute.xlu1 %1183  ;;  %v1096_v45 = vadd.f32 %v1094_v18, %v4984_v12  ;;  %v1097_v62 = vadd.f32 %v1095_v50, %v4986_v7  ;;  %v1179_v28 = vadd.f32 %v1177_v6, %v1165_v0  ;;  %v1180_v15 = vadd.f32 %v1178_v41, %v1166_v33 }
 0x2c0   : > { %v1185_v20 = vsel %vm1102_vm12, %v1182_v39, %v1184_v24  ;;  %v1186_v44 = vsel %vm1102_vm12, %v1184_v24, %v1182_v39  ;;  %v2078_v12 = vrot.slane %v2077_v34, 2  ;;  %v2049_v49 = vrot.slane %v2048_v63, 2 }
 0x2c1   : > { %v1191_v47 = vmul.f32 %v5007_v23, %v1185_v20  ;;  %v1192_v40 = vmul.f32 %v5007_v23, %v1186_v44  ;;  %v2056_v7 = vrot.slane %v2055_v4, 2  ;;  %v2073_v36 = vrot.slane %v2072_v60, 1 }
 0x2c2   : > { %v2079_v51 = vadd.f32 %v2078_v12, %v2077_v34  ;;  %v2050_v35 = vadd.f32 %v2049_v49, %v2048_v63 }
 0x2c3   : > { %v1193_v42 = vadd.f32 %v1191_v47, %v1179_v28  ;;  %v1194_v48 = vadd.f32 %v1192_v40, %v1180_v15  ;;  %v2057_v8 = vadd.f32 %v2056_v7, %v2055_v4  ;;  %v2074_v26 = vadd.f32 %v2073_v36, %v2072_v60  ;;  %v2108_v49 = vpop.permute.xlu1 %2107 }
 0x2c4   : > { %v2080_v14 = vrot.slane %v2079_v51, 1  ;;  %v2051_v21 = vrot.slane %v2050_v35, 1 }
 0x2c5   : > { %v1203_v11 = vmul.f32 %v1198_v59, %v1193_v42  ;;  %v1204_v56 = vmul.f32 %v1202_v53, %v1194_v48  ;;  %v2058_v27 = vrot.slane %v2057_v8, 1 }
 0x2c6   : > { %v2081_v29 = vadd.f32 %v2080_v14, %v2079_v51  ;;  %v2052_v5 = vadd.f32 %v2051_v21, %v2050_v35  ;;  %v2120_v21 = vpop.permute.xlu0 %2119 }
 0x2c7   : > { %v1205_v31 = vadd.f32 %v1203_v11, %v1096_v45  ;;  %v1206_v19 = vadd.f32 %v1204_v56, %v1097_v62  ;;  %v2059_v25 = vadd.f32 %v2058_v27, %v2057_v8 }
 0x2c8   : > { %v2082_v13 = vadd.f32 %v2074_v26, %v2052_v5 }
 0x2c9   : > { %v1212_v54 = vadd.f32 %v1210_v3, %v1205_v31  ;;  %v1213_v10 = vadd.f32 %v1210_v3, %v1206_v19  ;;  %v2083_v18 = vadd.f32 %v2081_v29, %v2059_v25 }
 0x2ca   : > { %v2084_v41 = vmul.f32 0.125, %v2082_v13  ;;  %v1998_v13 = vpop.permute.xlu0 %1997 }
 0x2cb   : > { %v1948_v23 = vsel %vm1947_vm1, %v1212_v54, 0.0  ;;  %v1955_v1 = vsel %vm1947_vm1, %v1213_v10, 0.0  ;;  %v2085_v32 = vmul.f32 0.125, %v2083_v18 }
 0x2cc   : > { %v1949_v9 = vrot.slane %v1948_v23, 4  ;;  %v1956_v38 = vrot.slane %v1955_v1, 4  ;;  %v2086_v39 = vadd.f32 1e-06, %v2084_v41 }
 0x2cd   : > { %v2087_v24 = vadd.f32 1e-06, %v2085_v32 }
 0x2ce   : > { %v1950_v22 = vadd.f32 %v1949_v9, %v1948_v23  ;;  %v1957_v55 = vadd.f32 %v1956_v38, %v1955_v1  ;;  %2703 = vrsqrt.f32 %v2086_v39  ;;  %v2700_v39 = vld [vmem:[%s5191_s8 + $0x8] sm:$0xff]  }
 0x2cf   : > { %2705 = vrsqrt.f32 %v2087_v24 }
 0x2d0   : > { %v1951_v57 = vrot.slane %v1950_v22, 2  ;;  %v1958_v58 = vrot.slane %v1957_v55, 2 }
 0x2d2   : > { %v1952_v2 = vadd.f32 %v1951_v57, %v1950_v22  ;;  %v1959_v30 = vadd.f32 %v1958_v58, %v1957_v55 }
 0x2d4   : > { %v1953_v50 = vrot.slane %v1952_v2, 1  ;;  %v1960_v6 = vrot.slane %v1959_v30, 1 }
 0x2d6   : > { %v1954_v37 = vadd.f32 %v1953_v50, %v1952_v2  ;;  %v1961_v34 = vadd.f32 %v1960_v6, %v1959_v30 }
 0x2d8   : > { %v1962_v59 = vmul.f32 0.25, %v1954_v37  ;;  %v1963_v53 = vmul.f32 0.25, %v1961_v34 }
 0x2da   : > { %v1964_v0 = vsub.f32 %v1212_v54, %v1962_v59  ;;  %v1965_v33 = vsub.f32 %v1213_v10, %v1963_v53  ;;  %v2094_v54 = vpop.permute.xlu1 %2093  ;;  %v2699_v59 = vld [vmem:[%s5191_s8] sm:$0xff]   ;;  %v5674_v53 = vmov 0  }
 0x2db   : > { %v2704_v56 = vpop.eup %2703 }
 0x2dc   : > { %v1966_v45 = vmul.f32 %v1964_v0, %v1964_v0  ;;  %v1967_v62 = vmul.f32 %v1965_v33, %v1965_v33  ;;  %v2706_v51 = vpop.eup %2705  ;;  %v2104_v35 = vmul.f32 %v2704_v56, %v4943_v16  ;;  %v2090_v9 = vmul.f32 %v2704_v56, %v4967_v17 }
 0x2dd   : > { %v2105_v8 = vmul.f32 %v2706_v51, %v4946_v46  ;;  %v2091_v38 = vmul.f32 %v2706_v51, %v4970_v52 }
 0x2de   : > { %v1968_v63 = vsel %vm1947_vm1, %v1966_v45, 0.0  ;;  %v1975_v4 = vsel %vm1947_vm1, %v1967_v62, 0.0  ;;  %v2112_v10 = vrot.slane %v2104_v35, 4  ;;  %v1992_v14 = vpop.permute.xlu1 %1991  ;;  %v2096_v16 = vmul.f32 %v2094_v54, %v2090_v9 }
 0x2df   : > { %v1969_v20 = vrot.slane %v1968_v63, 4  ;;  %v1976_v44 = vrot.slane %v1975_v4, 4  ;;  %v2113_v36 = vrot.slane %v2105_v8, 4  ;;  %v2097_v46 = vmul.f32 %v2094_v54, %v2091_v38 }
 0x2e0   : > { %v2116_v23 = vmul.f32 %v2112_v10, %v2108_v49 }
 0x2e1   : > { %v1970_v28 = vadd.f32 %v1969_v20, %v1968_v63  ;;  %v1977_v15 = vadd.f32 %v1976_v44, %v1975_v4  ;;  %v2117_v1 = vmul.f32 %v2113_v36, %v2108_v49 }
 0x2e2   : > { %v2122_v27 = vadd.f32 %v2120_v21, %v2116_v23  ;;  %v2100_v22 = vpop.permute.xlu1 %2099 }
 0x2e3   : > { %v1971_v47 = vrot.slane %v1970_v28, 2  ;;  %v1978_v40 = vrot.slane %v1977_v15, 2  ;;  %v2123_v26 = vadd.f32 %v2120_v21, %v2117_v1  ;;  %v2102_v25 = vadd.f32 %v2100_v22, %v2096_v16 }
 0x2e4   : > { %v2126_v58 = vrot.slane %v2122_v27, 4  ;;  %v2103_v18 = vadd.f32 %v2100_v22, %v2097_v46 }
 0x2e5   : > { %v1972_v43 = vadd.f32 %v1971_v47, %v1970_v28  ;;  %v1979_v42 = vadd.f32 %v1978_v40, %v1977_v15  ;;  %v2127_v30 = vrot.slane %v2123_v26, 4 }
 0x2e6   : > { %v2130_v52 = vsel %vm1947_vm1, %v2102_v25, %v2126_v58 }
 0x2e7   : > { %v1973_v48 = vrot.slane %v1972_v43, 1  ;;  %v1980_v12 = vrot.slane %v1979_v42, 1  ;;  %v2131_v41 = vsel %vm1947_vm1, %v2103_v18, %v2127_v30 }
 0x2e9   : > { %v1974_v7 = vadd.f32 %v1973_v48, %v1972_v43  ;;  %v1981_v11 = vadd.f32 %v1980_v12, %v1979_v42 }
 0x2eb   : > { %v1982_v60 = vmul.f32 0.25, %v1974_v7  ;;  %v1983_v3 = vmul.f32 0.25, %v1981_v11 }
 0x2ed   : > { %v1984_v31 = vadd.f32 1e-06, %v1982_v60  ;;  %v1985_v19 = vadd.f32 1e-06, %v1983_v3 }
 0x2ef   : > { %2707 = vrsqrt.f32 %v1984_v31 }
 0x2f0   : > { %2709 = vrsqrt.f32 %v1985_v19 }
 0x2fc   : > { %v2708_v55 = vpop.eup %2707 }
 0x2fd   : > { %v2710_v29 = vpop.eup %2709  ;;  %v1988_v5 = vmul.f32 %v2708_v55, %v1964_v0  ;;  %v2701_v0 = vld [vmem:[%s5191_s8 + $0x10] sm:$0xff]  }
 0x2fe   : > { %v1989_v57 = vmul.f32 %v2710_v29, %v1965_v33 }
 0x2ff   : > { %v1994_v2 = vmul.f32 %v1992_v14, %v1988_v5 }
 0x300   : > { %v1995_v50 = vmul.f32 %v1992_v14, %v1989_v57 }
 0x301   : > { %v2000_v6 = vadd.f32 %v1998_v13, %v1994_v2 }
 0x302   : > { %v2001_v17 = vadd.f32 %v1998_v13, %v1995_v50 }
 0x303   : > { %v2132_v37 = vpack.c.bf16 %v2000_v6, %v2130_v52  ;;  %v2157_v33 = vpop.permute.xlu1 %2156 }
 0x304   : > { %v2133_v34 = vpack.c.bf16 %v2001_v17, %v2131_v41 }
 0x305   : > { %v2191_v32 = vsel %vm2189_vm0, %v2132_v37, 0 }
 0x306   : > { %2522 = vmatprep.subr.msk.bf16.mxu0 %vm2189_vm0, %v2133_v34 }
 0x307   : > { %2211 = vmatpush1.bf16.msra.mxu0 %v2191_v32  ;;  %v5080_v24 = vpop.permute.xlu1 %2161 }
 0x30a   : > { %2523 = vmatmul.mubr.msk.bf16.vlgmr.msra.gmra.mxu0 %vm2179_vm14, %v2699_v59 }
 0x30b   : > { %2238 = vmatprep.mubr.bf16.mxu0 %v5674_v53 }
 0x311   : > { %v2147_v20 = vpop.permute.xlu0 %2146 }
 0x312   : > { %2524 = vmatmul.mubr.msk.bf16.gmra.mxu0 %vm2179_vm14, %v2700_v39 }
 0x313   : > { %2248 = vmatprep.mubr.bf16.mxu0 %v5674_v53 }
 0x315   : > { %v2142_v42 = vpop.permute.xlu0 %2141 }
 0x316   : > { %v2152_v45 = vpop.permute.xlu1 %2151 }
 0x31a   : > { %2525 = vmatmul.mubr.msk.bf16.gmra.mxu0 %vm2179_vm14, %v2701_v0  ;;  %v2137_v63 = vpop.permute.xlu1 %2136 }
 0x3ca   : > { %v2230_v62 = vpop.f32.mrf.mxu0 }
 0x3cb   : > { %v5095_v60 = vadd.f32 %v2230_v62, %v2137_v63 }
 0x3cc   : > { %v2232_v4 = vpop.f32.mrf.mxu0 }
 0x3cd   : > { %v5082_v44 = vadd.f32 %v2232_v4, %v2137_v63  ;;  %v2259_v1 = vmul.f32 %v5095_v60, %v5095_v60 }
 0x3ce   : > { %v2234_v28 = vpop.f32.mrf.mxu0 }
 0x3cf   : > { %v2260_v15 = vmul.f32 %v5082_v44, %v5082_v44  ;;  %v5091_v7 = vadd.f32 %v2234_v28, %v2142_v42  ;;  %v2271_v6 = vmul.f32 %v2259_v1, %v5095_v60 }
 0x3d0   : > { %v2236_v47 = vpop.f32.mrf.mxu0 }
 0x3d1   : > { %v2272_v43 = vmul.f32 %v2260_v15, %v5082_v44  ;;  %v5087_v48 = vadd.f32 %v2236_v47, %v2142_v42  ;;  %v2261_v10 = vmul.f32 %v5091_v7, %v5091_v7  ;;  %v2283_v28 = vmul.f32 0.044715, %v2271_v6 }
 0x3d2   : > { %v2240_v40 = vpop.f32.mrf.mxu0 }
 0x3d3   : > { %v5089_v12 = vadd.f32 %v2240_v40, %v2147_v20  ;;  %v2284_v3 = vmul.f32 0.044715, %v2272_v43  ;;  %v2262_v51 = vmul.f32 %v5087_v48, %v5087_v48  ;;  %v2273_v57 = vmul.f32 %v2261_v10, %v5091_v7 }
 0x3d4   : > { %v2242_v49 = vpop.f32.mrf.mxu0  ;;  %v2295_v10 = vadd.f32 %v2283_v28, %v5095_v60 }
 0x3d5   : > { %v5093_v11 = vadd.f32 %v2242_v49, %v2147_v20  ;;  %v2263_v31 = vmul.f32 %v5089_v12, %v5089_v12  ;;  %v2296_v21 = vadd.f32 %v2284_v3, %v5082_v44  ;;  %v2274_v27 = vmul.f32 %v2262_v51, %v5087_v48 }
 0x3d6   : > { %v2244_v56 = vpop.f32.mrf.mxu0  ;;  %v2285_v39 = vmul.f32 0.044715, %v2273_v57 }
 0x3d7   : > { %v2264_v19 = vmul.f32 %v5093_v11, %v5093_v11  ;;  %v5103_v35 = vadd.f32 %v2244_v56, %v2152_v45  ;;  %v2275_v26 = vmul.f32 %v2263_v31, %v5089_v12  ;;  %v2308_v17 = vmul.f32 0.7978846, %v2296_v21 }
 0x3d8   : > { %v2246_v8 = vpop.f32.mrf.mxu0  ;;  %v2286_v52 = vmul.f32 0.044715, %v2274_v27  ;;  %v2297_v3 = vadd.f32 %v2285_v39, %v5091_v7 }
 0x3d9   : > { %v5105_v54 = vadd.f32 %v2246_v8, %v2152_v45  ;;  %v2276_v36 = vmul.f32 %v2264_v19, %v5093_v11  ;;  %v2265_v14 = vmul.f32 %v5103_v35, %v5103_v35  ;;  %v2287_v41 = vmul.f32 0.044715, %v2275_v26 }
 0x3da   : > { %v2250_v23 = vpop.f32.mrf.mxu0  ;;  %2711 = vtanh.f32 %v2308_v17  ;;  %v2298_v15 = vadd.f32 %v2286_v52, %v5087_v48  ;;  %v2309_v1 = vmul.f32 0.7978846, %v2297_v3 }
 0x3db   : > { %v2266_v9 = vmul.f32 %v5105_v54, %v5105_v54  ;;  %v5117_v38 = vadd.f32 %v2250_v23, %v2157_v33  ;;  %v2288_v22 = vmul.f32 0.044715, %v2276_v36  ;;  %v2277_v55 = vmul.f32 %v2265_v14, %v5103_v35 }
 0x3dc   : > { %v2252_v16 = vpop.f32.mrf.mxu0  ;;  %v2299_v40 = vadd.f32 %v2287_v41, %v5089_v12  ;;  %v2310_v19 = vmul.f32 0.7978846, %v2298_v15 }
 0x3dd   : > { %v2278_v29 = vmul.f32 %v2266_v9, %v5105_v54  ;;  %v2267_v46 = vmul.f32 %v5117_v38, %v5117_v38  ;;  %v5125_v5 = vadd.f32 %v2252_v16, %v2157_v33  ;;  %v2300_v58 = vadd.f32 %v2288_v22, %v5093_v11 }
 0x3de   : > { %v2289_v25 = vmul.f32 0.044715, %v2277_v55  ;;  %v2254_v13 = vpop.f32.mrf.mxu0  ;;  %v2311_v36 = vmul.f32 0.7978846, %v2299_v40  ;;  %v2307_v9 = vmul.f32 0.7978846, %v2295_v10 }
 0x3df   : > { %v2290_v2 = vmul.f32 0.044715, %v2278_v29  ;;  %v2279_v30 = vmul.f32 %v2267_v46, %v5117_v38  ;;  %v2268_v18 = vmul.f32 %v5125_v5, %v5125_v5  ;;  %v5133_v50 = vadd.f32 %v2254_v13, %v5080_v24 }
 0x3e0   : > { %v2256_v37 = vpop.f32.mrf.mxu0  ;;  %v2312_v0 = vmul.f32 0.7978846, %v2300_v58  ;;  %v2301_v33 = vadd.f32 %v2289_v25, %v5103_v35 }
 0x3e1   : > { %v2302_v34 = vadd.f32 %v2290_v2, %v5105_v54  ;;  %v2291_v32 = vmul.f32 0.044715, %v2279_v30  ;;  %v2280_v59 = vmul.f32 %v2268_v18, %v5125_v5  ;;  %v2269_v53 = vmul.f32 %v5133_v50, %v5133_v50 }
 0x3e2   : > { %v5142_v45 = vadd.f32 %v2256_v37, %v5080_v24  ;;  %2713 = vtanh.f32 %v2312_v0  ;;  %v2313_v49 = vmul.f32 0.7978846, %v2301_v33 }
 0x3e3   : > { %v2314_v62 = vmul.f32 0.7978846, %v2302_v34  ;;  %v2303_v63 = vadd.f32 %v2291_v32, %v5117_v38  ;;  %v2292_v4 = vmul.f32 0.044715, %v2280_v59  ;;  %v2281_v20 = vmul.f32 %v2269_v53, %v5133_v50 }
 0x3e4   : > { %v2270_v47 = vmul.f32 %v5142_v45, %v5142_v45 }
 0x3e5   : > { %v2315_v43 = vmul.f32 0.7978846, %v2303_v63  ;;  %v2304_v42 = vadd.f32 %v2292_v4, %v5125_v5  ;;  %v2293_v24 = vmul.f32 0.044715, %v2281_v20  ;;  %2715 = vtanh.f32 %v2314_v62 }
 0x3e6   : > { %v2282_v56 = vmul.f32 %v2270_v47, %v5142_v45 }
 0x3e7   : > { %v2305_v51 = vadd.f32 %v2293_v24, %v5133_v50  ;;  %v2316_v31 = vmul.f32 0.7978846, %v2304_v42  ;;  %2717 = vtanh.f32 %v2315_v43  ;;  %v2712_v27 = vpop.eup %2711 }
 0x3e8   : > { %v2294_v8 = vmul.f32 0.044715, %v2282_v56  ;;  %v2332_v63 = vadd.f32 1.0, %v2712_v27 }
 0x3e9   : > { %v2317_v14 = vmul.f32 0.7978846, %v2305_v51  ;;  %2719 = vtanh.f32 %v2316_v31 }
 0x3ea   : > { %2721 = vtanh.f32 %v2313_v49  ;;  %v2306_v23 = vadd.f32 %v2294_v8, %v5142_v45  ;;  %v2344_v51 = vmul.f32 0.5, %v2332_v63 }
 0x3eb   : > { %2723 = vtanh.f32 %v2317_v14 }
 0x3ec   : > { %2725 = vtanh.f32 %v2310_v19  ;;  %v2318_v21 = vmul.f32 0.7978846, %v2306_v23 }
 0x3ed   : > { %2727 = vtanh.f32 %v2311_v36 }
 0x3ee   : > { %2729 = vtanh.f32 %v2318_v21 }
 0x3ef   : > { %2731 = vtanh.f32 %v2309_v1  ;;  %v2714_v26 = vpop.eup %2713 }
 0x3f0   : > { %2733 = vtanh.f32 %v2307_v9  ;;  %v2336_v18 = vadd.f32 1.0, %v2714_v26 }
 0x3f2   : > { %v2716_v22 = vpop.eup %2715  ;;  %v2348_v62 = vmul.f32 0.5, %v2336_v18  ;;  %v5676_v18 = vld [vmem:[#allocation42_spill] sm:$0xff] }
 0x3f3   : > { %v2338_v58 = vadd.f32 1.0, %v2716_v22  ;;  %v2741_v22 = vld [vmem:[%s2911_s18] sm:$0xff] }
 0x3f4   : > { %v2718_v55 = vpop.eup %2717  ;;  %v2360_v3 = vmul.f32 %v2348_v62, %v5093_v11 }
 0x3f5   : > { %v2339_v13 = vadd.f32 1.0, %v2718_v55  ;;  %v2350_v32 = vmul.f32 0.5, %v2338_v58 }
 0x3f6   : > { %v2720_v16 = vpop.eup %2719 }
 0x3f7   : > { %v2722_v29 = vpop.eup %2721  ;;  %v2340_v57 = vadd.f32 1.0, %v2720_v16  ;;  %v2351_v53 = vmul.f32 0.5, %v2339_v13  ;;  %v2362_v40 = vmul.f32 %v2350_v32, %v5105_v54 }
 0x3f8   : > { %v2724_v46 = vpop.eup %2723  ;;  %v2337_v52 = vadd.f32 1.0, %v2722_v29 }
 0x3f9   : > { %v2726_v25 = vpop.eup %2725  ;;  %v2341_v2 = vadd.f32 1.0, %v2724_v46  ;;  %v2352_v34 = vmul.f32 0.5, %v2340_v57  ;;  %v2363_v42 = vmul.f32 %v2351_v53, %v5117_v38  ;;  %v2370_v8 = vpack.c.bf16 %v2362_v40, %v2360_v3  ;;  %v5675_v57 = vld [vmem:[#allocation2_spill] sm:$0xff] }
 0x3fa   : > { %v2728_v30 = vpop.eup %2727  ;;  %v2334_v59 = vadd.f32 1.0, %v2726_v25  ;;  %v2349_v20 = vmul.f32 0.5, %v2337_v52  ;;  %v2356_v38 = vmul.f32 %v2344_v51, %v5082_v44  ;;  %v2381_v44 = vpop.permute.xlu0 %2380 }
 0x3fb   : > { %v2730_v6 = vpop.eup %2729  ;;  %v2353_v17 = vmul.f32 0.5, %v2341_v2  ;;  %v2335_v39 = vadd.f32 1.0, %v2728_v30  ;;  %v2364_v15 = vmul.f32 %v2352_v34, %v5125_v5 }
 0x3fc   : > { %v2732_v41 = vpop.eup %2731  ;;  %v2342_v37 = vadd.f32 1.0, %v2730_v6  ;;  %v2346_v43 = vmul.f32 0.5, %v2334_v59 }
 0x3fd   : > { %v2734_v0 = vpop.eup %2733  ;;  %v2365_v4 = vmul.f32 %v2353_v17, %v5133_v50  ;;  %v2333_v28 = vadd.f32 1.0, %v2732_v41  ;;  %v2347_v24 = vmul.f32 0.5, %v2335_v39  ;;  %v2361_v50 = vmul.f32 %v2349_v20, %v5103_v35 }
 0x3fe   : > { %v2354_v33 = vmul.f32 0.5, %v2342_v37  ;;  %v2331_v49 = vadd.f32 1.0, %v2734_v0  ;;  %v2358_v5 = vmul.f32 %v2346_v43, %v5087_v48  ;;  %v2702_v48 = vld [vmem:[%s5192_s9] sm:$0x3f]   ;;  %v2441_v26 = vpop.permute.xlu0 %2440 }
 0x3ff   : > { %v2371_v31 = vpack.c.bf16 %v2365_v4, %v2363_v42  ;;  %v2345_v19 = vmul.f32 0.5, %v2333_v28  ;;  %v2359_v54 = vmul.f32 %v2347_v24, %v5089_v12  ;;  %v2376_v12 = vpop.permute.xlu1 %2375 }
 0x400   : > { %v2366_v47 = vmul.f32 %v2354_v33, %v5142_v45  ;;  %v2343_v45 = vmul.f32 0.5, %v2331_v49  ;;  %v2368_v11 = vpack.c.bf16 %v2358_v5, %v2356_v38 }
 0x401   : > { %v2369_v10 = vpack.c.bf16 %v2361_v50, %v2359_v54  ;;  %v2357_v36 = vmul.f32 %v2345_v19, %v5091_v7 }
 0x402   : > { %v2372_v56 = vpack.c.bf16 %v2366_v47, %v2364_v15  ;;  %v2355_v35 = vmul.f32 %v2343_v45, %v5095_v60 }
 0x403   : > { %v2437_v1 = vpop.permute.xlu1 %2436 }
 0x404   : > { %2402 = vmatprep.subr.bf16.mxu1 %v2372_v56  ;;  %v2367_v14 = vpack.c.bf16 %v2357_v36, %v2355_v35 }
 0x405   : > { %2403 = vmatpush1.bf16.msra.mxu1 %v2371_v31 }
 0x406   : > { %2404 = vmatprep.subr.bf16.mxu1 %v2370_v8 }
 0x409   : > { %2405 = vmatpush1.bf16.msra.mxu1 %v2369_v10 }
 0x40a   : > { %2406 = vmatprep.subr.bf16.mxu1 %v2368_v11 }
 0x40d   : > { %2407 = vmatpush1.bf16.msra.mxu1 %v2367_v14 }
 0x410   : > { %2527 = vmatmul.mubr.msk.bf16.vlgmr.msra.gmra.mxu1 %vm2388_vm5, %v2702_v48 }
 0x4d0   : > { %v2426_v23 = vpop.f32.mrf.mxu1 }
 0x4d1   : > { %v2427_v7 = vadd.f32 %v2426_v23, %v2376_v12 }
 0x4d2   : > { %v2428_v21 = vpop.f32.mrf.mxu1 }
 0x4d3   : > { %v2443_v9 = vmul.f32 %v2437_v1, %v2427_v7  ;;  %v2429_v27 = vadd.f32 %v2428_v21, %v2376_v12 }
 0x4d4   : > { %v2430_v60 = vpop.f32.mrf.mxu1 }
 0x4d5   : > { %v2447_v55 = vadd.f32 %v2741_v22, %v2443_v9  ;;  %v2444_v16 = vmul.f32 %v2437_v1, %v2429_v27  ;;  %v2431_v29 = vadd.f32 %v2430_v60, %v2381_v44 }
 0x4d6   : > { %v2432_v46 = vpop.f32.mrf.mxu1 }
 0x4d7   : > { %2451 = vst [vmem:[%s359_s26] sm:$0xff] %v2447_v55  ;;  %v2448_v58 = vadd.f32 %v2444_v16, %v5675_v57  ;;  %v2445_v25 = vmul.f32 %v2441_v26, %v2431_v29  ;;  %v2433_v13 = vadd.f32 %v2432_v46, %v2381_v44 }
 0x4d9   : > { %2452 = vst [vmem:[%s359_s26 + $0x8] sm:$0xff] %v2448_v58  ;;  %v2449_v2 = vadd.f32 %v4881_v61, %v2445_v25  ;;  %v2446_v30 = vmul.f32 %v2441_v26, %v2433_v13 }
 0x4db   : > { %2453 = vst [vmem:[%s359_s26 + $0x10] sm:$0xf] %v2449_v2  ;;  %v2450_v6 = vadd.f32 %v5676_v18, %v2446_v30 }
 0x4dd   : > { %2454 = vst [vmem:[%s359_s26 + $0x18] sm:$0xf] %v2450_v6 }
 0x4de PF: > { %s20_s13 = sadd.s32 1, %s2748_s13  }
 0x4df   : > { %p17_p4 = scmp.ge.s32.totalorder %s20_s13, 4  }
 0x4e1   :  { %19 = sbr.rel (!%p17_p4) target bundleno = 1 (0x1), region = 90 }

</bundles_post_ra>
